<compile_context>
chip_gen: v6e
topology: v6e:2x2x1
jax: 0.10.0
libtpu: 0.0.40
codegen_flags: <defaults>
</compile_context>

<pallas_src>
import jax
import jax.numpy as jnp
from jax import lax
from jax.experimental import pallas as pl
from jax.experimental.pallas import tpu as pltpu

EPS = 1e-5

# bit assignments in the per-lane boundary bitmask
_BIT_D_LO, _BIT_D_HI = 1, 2        # d >= 1, d <= D-2
_BIT_H_LO, _BIT_H_HI = 4, 8        # h >= 1, h <= H-2
_BIT_W_LO, _BIT_W_HI = 16, 32      # w >= 1, w <= W-2


def _round_up(x, m):
    return (x + m - 1) // m * m


def _choose_tile_m(M, cap=2048):
    """Largest lane tile: multiple of 128, divides M, <= cap, prefer >=2 tiles."""
    cands = [t for t in range(128, min(M, cap) + 1, 128) if M % t == 0]
    multi = [t for t in cands if M // t >= 2]
    return max(multi) if multi else max(cands)


def _make_conv_kernel(*, C_pad, T, HALO, PAD_M, H, W, n_tiles, pre_norm):
    """3x3x3 conv (pad 1) on a (C_pad, T) tile + resident BN stat accumulation.

    pre_norm=True additionally applies relu(x*scale + shift) to the raw halo'd
    input window before convolving (fuses the previous layer's BN + ReLU).
    """
    HW = H * W
    WIN = T + 2 * HALO

    def kernel(*refs):
        if pre_norm:
            (src_hbm, w_ref, m_ref, sc_ref, sh_ref,
             y_ref, sum_ref, sq_ref, buf, sem) = refs
        else:
            (src_hbm, w_ref, m_ref,
             y_ref, sum_ref, sq_ref, buf, sem) = refs

        i = pl.program_id(0)
        slot = i % 2

        def halo_copy(tile_idx, slot_idx):
            # 128-aligned halo window: [PAD_M + tile*T - HALO, ... + WIN)
            start = PAD_M - HALO + tile_idx * T
            return pltpu.make_async_copy(
                src_hbm.at[:, pl.ds(start, WIN)],
                buf.at[slot_idx],
                sem.at[slot_idx],
            )

        @pl.when(i == 0)
        def _():
            halo_copy(i, slot).start()        # prime slot 0 (exposed once)
            sum_ref[...] = jnp.zeros_like(sum_ref)
            sq_ref[...] = jnp.zeros_like(sq_ref)

        @pl.when(i + 1 < n_tiles)
        def _():
            halo_copy(i + 1, 1 - slot).start()   # prefetch next tile, other slot

        # Wait for the current tile's window (descriptor matches the .start()).
        halo_copy(i, slot).wait()

        window = buf[slot]                    # (C_pad, WIN) f32
        if pre_norm:
            # Fused BN + ReLU of the producer's raw output (halo included).
            window = jnp.maximum(window * sc_ref[...] + sh_ref[...], 0.0)

        bits = m_ref[...]                     # (1, T) int32 boundary bitmask

        acc = jnp.zeros((C_pad, T), jnp.float32)
        tap = 0
        for kd in range(3):
            for kh in range(3):
                for kw in range(3):
                    off = (kd - 1) * HW + (kh - 1) * W + (kw - 1)
                    piece = window[:, HALO + off: HALO + off + T]
                    req = 0
                    if kd == 0:
                        req |= _BIT_D_LO
                    elif kd == 2:
                        req |= _BIT_D_HI
                    if kh == 0:
                        req |= _BIT_H_LO
                    elif kh == 2:
                        req |= _BIT_H_HI
                    if kw == 0:
                        req |= _BIT_W_LO
                    elif kw == 2:
                        req |= _BIT_W_HI
                    if req:
                        valid = jnp.bitwise_and(bits, req) == req
                        piece = jnp.where(valid, piece, 0.0)
                    acc = acc + jnp.dot(w_ref[tap], piece,
                                        preferred_element_type=jnp.float32)
                    tap += 1

        y_ref[...] = acc
        sum_ref[...] += jnp.sum(acc, axis=1, keepdims=True)
        sq_ref[...] += jnp.sum(acc * acc, axis=1, keepdims=True)

    return kernel


def _conv_bn_stats(src_pad, w_taps, mask_bits, scale_in, shift_in, *,
                   C_pad, T, HALO, PAD_M, D, H, W, n_tiles, M, pad_out):
    """One 3x3x3 conv over the whole volume + per-channel BN stats."""
    del D  # boundary validity is pre-packed into mask_bits
    pre_norm = scale_in is not None
    WIN = T + 2 * HALO
    blocks_pad = PAD_M // T

    kernel = _make_conv_kernel(C_pad=C_pad, T=T, HALO=HALO, PAD_M=PAD_M,
                               H=H, W=W, n_tiles=n_tiles, pre_norm=pre_norm)

    in_specs = [
        pl.BlockSpec(memory_space=pl.ANY),                       # halo'd src (HBM)
        pl.BlockSpec((27, C_pad, C_pad), lambda i: (0, 0, 0)),   # weights, resident
        pl.BlockSpec((1, T), lambda i: (0, i)),                  # boundary bitmask
    ]
    args = [src_pad, w_taps, mask_bits]
    if pre_norm:
        in_specs += [pl.BlockSpec((C_pad, 1), lambda i: (0, 0)),
                     pl.BlockSpec((C_pad, 1), lambda i: (0, 0))]
        args += [scale_in, shift_in]

    if pad_out:
        # Write directly into a PAD_M-padded layout so the next conv can
        # halo-DMA it with no extra XLA copy.
        y_shape = (C_pad, M + 2 * PAD_M)
        y_spec = pl.BlockSpec((C_pad, T), lambda i: (0, i + blocks_pad))
    else:
        y_shape = (C_pad, M)
        y_spec = pl.BlockSpec((C_pad, T), lambda i: (0, i))

    return pl.pallas_call(
        kernel,
        grid=(n_tiles,),
        in_specs=in_specs,
        out_shape=(
            jax.ShapeDtypeStruct(y_shape, jnp.float32),
            jax.ShapeDtypeStruct((C_pad, 1), jnp.float32),
            jax.ShapeDtypeStruct((C_pad, 1), jnp.float32),
        ),
        out_specs=(
            y_spec,
            pl.BlockSpec((C_pad, 1), lambda i: (0, 0)),   # resident accumulator
            pl.BlockSpec((C_pad, 1), lambda i: (0, 0)),   # resident accumulator
        ),
        scratch_shapes=[
            pltpu.VMEM((2, C_pad, WIN), jnp.float32),
            pltpu.SemaphoreType.DMA((2,)),
        ],
        # "arbitrary": the manual double-buffer and resident stat accumulators
        # are primed at step 0 and carried across grid steps.
        compiler_params=pltpu.CompilerParams(
            dimension_semantics=("arbitrary",)),
    )(*args)


def _make_bn_residual_kernel(C):
    def kernel(y_ref, r_ref, sc_ref, sh_ref, o_ref):
        # Single per-channel FMA (folded BN) + residual add, one store per tile.
        o_ref[...] = y_ref[0:C, :] * sc_ref[...] + sh_ref[...] + r_ref[...]
    return kernel


def _bn_residual(y, res, scale, shift, *, C, C_pad, T, n_tiles, M):
    return pl.pallas_call(
        _make_bn_residual_kernel(C),
        grid=(n_tiles,),
        in_specs=[
            pl.BlockSpec((C_pad, T), lambda i: (0, i)),
            pl.BlockSpec((C, T), lambda i: (0, i)),
            pl.BlockSpec((C, 1), lambda i: (0, 0)),
            pl.BlockSpec((C, 1), lambda i: (0, 0)),
        ],
        out_shape=jax.ShapeDtypeStruct((C, M), jnp.float32),
        out_specs=pl.BlockSpec((C, T), lambda i: (0, i)),
        compiler_params=pltpu.CompilerParams(
            dimension_semantics=("parallel",)),
    )(y, res, scale, shift)


@jax.jit
def resblock_pallas(x, w1, b1, g1, be1, w2, b2, g2, be2):
    """x: (N, C, D, H, W) float32 (PyTorch NCDHW).  Returns the same shape.

    Conv biases b1/b2 are accepted for signature parity but unused: under
    training-mode BatchNorm the per-channel bias cancels exactly in the mean
    subtraction (and therefore in the variance), so dropping it is
    numerically identical.
    """
    del b1, b2
    N, C, D, H, W = x.shape
    M = N * D * H * W
    assert M % 128 == 0, "N*D*H*W must be a multiple of 128"

    C_pad = _round_up(max(C, 8), 8)
    T = _choose_tile_m(M)
    n_tiles = M // T
    HALO = _round_up(H * W + W + 1, 128)     # max |tap offset| on the flat axis
    PAD_M = _round_up(HALO, T)               # source pad, block-aligned

    # --- XLA-side layout plumbing (module input/output boundaries only) ----
    x_cm = jnp.transpose(x, (1, 0, 2, 3, 4)).reshape(C, M)
    x_src = jnp.pad(x_cm, ((0, C_pad - C), (PAD_M, PAD_M)))   # (C_pad, M+2*PAD_M)

    d_idx = lax.broadcasted_iota(jnp.int32, (N, D, H, W), 1)
    h_idx = lax.broadcasted_iota(jnp.int32, (N, D, H, W), 2)
    w_idx = lax.broadcasted_iota(jnp.int32, (N, D, H, W), 3)
    mask_bits = ((d_idx >= 1).astype(jnp.int32) * _BIT_D_LO
                 + (d_idx <= D - 2).astype(jnp.int32) * _BIT_D_HI
                 + (h_idx >= 1).astype(jnp.int32) * _BIT_H_LO
                 + (h_idx <= H - 2).astype(jnp.int32) * _BIT_H_HI
                 + (w_idx >= 1).astype(jnp.int32) * _BIT_W_LO
                 + (w_idx <= W - 2).astype(jnp.int32) * _BIT_W_HI
                 ).reshape(1, M)

    def prep_w(w):  # (Cout, Cin, 3,3,3) -> (27, C_pad, C_pad), tap-major
        wp = jnp.zeros((C_pad, C_pad, 3, 3, 3), w.dtype).at[:C, :C].set(w)
        return jnp.transpose(wp, (2, 3, 4, 0, 1)).reshape(27, C_pad, C_pad)

    def pad_c(v):
        return jnp.pad(v, (0, C_pad - C))

    def bn_scale_shift(s, q, g, be):
        mean = s[:, 0] / M
        var = jnp.maximum(q[:, 0] / M - mean * mean, 0.0)
        scale = g * lax.rsqrt(var + EPS)
        shift = be - scale * mean
        return scale, shift

    common = dict(C_pad=C_pad, T=T, HALO=HALO, PAD_M=PAD_M, D=D, H=H, W=W,
                  n_tiles=n_tiles, M=M)

    # conv1 -> raw pre-BN activations (padded layout so conv2 can halo-DMA it).
    y1, s1, q1 = _conv_bn_stats(x_src, prep_w(w1), mask_bits, None, None,
                                pad_out=True, **common)
    scale1, shift1 = bn_scale_shift(s1, q1, pad_c(g1), pad_c(be1))

    # conv2 consumes raw y1 and applies BN1 + ReLU on the fly in-kernel.
    y2, s2, q2 = _conv_bn_stats(y1, prep_w(w2), mask_bits,
                                scale1.reshape(C_pad, 1),
                                shift1.reshape(C_pad, 1),
                                pad_out=False, **common)
    scale2, shift2 = bn_scale_shift(s2, q2, pad_c(g2), pad_c(be2))

    # BN2 + residual add.
    out_cm = _bn_residual(y2, x_cm,
                          scale2[:C].reshape(C, 1), shift2[:C].reshape(C, 1),
                          C=C, C_pad=C_pad, T=T, n_tiles=n_tiles, M=M)

    return jnp.transpose(out_cm.reshape(C, N, D, H, W), (1, 0, 2, 3, 4))


def resblock_reference(x, w1, b1, g1, be1, w2, b2, g2, be2):
    """Pure-JAX reference matching the PyTorch forward (training-mode BN)."""

    def conv(xx, w, b):
        out = lax.conv_general_dilated(
            xx, w, window_strides=(1, 1, 1),
            padding=((1, 1), (1, 1), (1, 1)),
            dimension_numbers=("NCDHW", "OIDHW", "NCDHW"))
        return out + b[None, :, None, None, None]

    def bn(xx, g, be):
        mean = jnp.mean(xx, axis=(0, 2, 3, 4), keepdims=True)
        var = jnp.mean((xx - mean) ** 2, axis=(0, 2, 3, 4), keepdims=True)
        xn = (xx - mean) / jnp.sqrt(var + EPS)
        return g[None, :, None, None, None] * xn + be[None, :, None, None, None]

    h = jnp.maximum(bn(conv(x, w1, b1), g1, be1), 0.0)
    return x + bn(conv(h, w2, b2), g2, be2)


if __name__ == "__main__":
    N, C, D, H, W = 2, 4, 8, 8, 8

    key = jax.random.PRNGKey(0)
    ks = jax.random.split(key, 9)
    w1 = 0.1 * jax.random.normal(ks[0], (C, C, 3, 3, 3), jnp.float32)
    b1 = 0.1 * jax.random.normal(ks[1], (C,), jnp.float32)
    g1 = 1.0 + 0.1 * jax.random.normal(ks[2], (C,), jnp.float32)
    be1 = 0.1 * jax.random.normal(ks[3], (C,), jnp.float32)
    w2 = 0.1 * jax.random.normal(ks[4], (C, C, 3, 3, 3), jnp.float32)
    b2 = 0.1 * jax.random.normal(ks[5], (C,), jnp.float32)
    g2 = 1.0 + 0.1 * jax.random.normal(ks[6], (C,), jnp.float32)
    be2 = 0.1 * jax.random.normal(ks[7], (C,), jnp.float32)
    x = jax.random.normal(ks[8], (N, C, D, H, W), jnp.float32)

    out = resblock_pallas(x, w1, b1, g1, be1, w2, b2, g2, be2)
    out = jax.block_until_ready(out)

    ref = resblock_reference(x, w1, b1, g1, be1, w2, b2, g2, be2)
    ref = jax.block_until_ready(ref)

    assert out.shape == (N, C, D, H, W)
    max_err = float(jnp.max(jnp.abs(out - ref)))
    assert max_err < 5e-2, f"mismatch vs reference, max abs err = {max_err}"
    print("KERNEL_OK")
</pallas_src>

<mosaic_0001>
module attributes {stable_mosaic.version = 11 : i64} {
  func.func @kernel(%arg0: i32, %arg1: memref<8x2048xf32, #tpu.memory_space<any>>, %arg2: memref<27x8x8xf32, #tpu.memory_space<vmem>>, %arg3: memref<1x512xi32, #tpu.memory_space<vmem>>, %arg4: memref<8x512xf32, #tpu.memory_space<vmem>>, %arg5: memref<8x1xf32, #tpu.memory_space<vmem>>, %arg6: memref<8x1xf32, #tpu.memory_space<vmem>>, %arg7: memref<2x8x768xf32, #tpu.memory_space<vmem>>, %arg8: memref<2x!tpu.dma_semaphore, #tpu.memory_space<semaphore_mem>>) attributes {dimension_semantics = [#tpu.dimension_semantics<arbitrary>], iteration_bounds = array<i64: 2>, scalar_prefetch = 0 : i64, scratch_operands = 2 : i64, tpu.core_type = #tpu.core_type<tc>, window_params = [{}, {pipeline_mode = #tpu.pipeline_mode<synchronous>, transform_indices = @transform_1, window_bounds = array<i64: 27, 8, 8>}, {transform_indices = @transform_2, window_bounds = array<i64: 1, 512>}, {transform_indices = @transform_3, window_bounds = array<i64: 8, 512>}, {pipeline_mode = #tpu.pipeline_mode<synchronous>, transform_indices = @transform_4, window_bounds = array<i64: 8, 1>}, {pipeline_mode = #tpu.pipeline_mode<synchronous>, transform_indices = @transform_5, window_bounds = array<i64: 8, 1>}]} {
    %c2_i32 = arith.constant 2 : i32
    %c0_i32 = arith.constant 0 : i32
    %0 = arith.cmpi eq, %c2_i32, %c0_i32 : i32
    %c1_i32 = arith.constant 1 : i32
    %1 = arith.select %0, %c1_i32, %c2_i32 : i32
    %2 = arith.remsi %arg0, %1 : i32
    %c0_i32_0 = arith.constant 0 : i32
    %3 = arith.cmpi ne, %2, %c0_i32_0 : i32
    %c0_i32_1 = arith.constant 0 : i32
    %4 = arith.cmpi slt, %2, %c0_i32_1 : i32
    %c0_i32_2 = arith.constant 0 : i32
    %5 = arith.cmpi slt, %1, %c0_i32_2 : i32
    %6 = arith.xori %4, %5 : i1
    %7 = arith.andi %6, %3 : i1
    %8 = arith.addi %2, %1 : i32
    %9 = arith.select %7, %8, %2 : i32
    %c0_i32_3 = arith.constant 0 : i32
    %10 = arith.cmpi eq, %arg0, %c0_i32_3 : i32
    %11 = arith.extui %10 : i1 to i32
    %c0_i32_4 = arith.constant 0 : i32
    %12 = arith.cmpi ne, %11, %c0_i32_4 : i32
    scf.if %12 {
      %c512_i32_162 = arith.constant 512 : i32
      %384 = arith.muli %arg0, %c512_i32_162 : i32
      %c384_i32_163 = arith.constant 384 : i32
      %385 = arith.addi %c384_i32_163, %384 : i32
      %c0_i32_164 = arith.constant 0 : i32
      %386 = tpu.memref_slice %arg1[%c0_i32_164, %385] : memref<8x2048xf32, #tpu.memory_space<any>> -> memref<8x768xf32, #tpu.memory_space<any>>
      %c0_i32_165 = arith.constant 0 : i32
      %c0_i32_166 = arith.constant 0 : i32
      %387 = tpu.memref_slice %arg7[%9, %c0_i32_165, %c0_i32_166] : memref<2x8x768xf32, #tpu.memory_space<vmem>> -> memref<1x8x768xf32, #tpu.memory_space<vmem>>
      %388 = tpu.memref_squeeze %387 : memref<1x8x768xf32, #tpu.memory_space<vmem>> -> memref<8x768xf32, #tpu.memory_space<vmem>>
      %389 = tpu.memref_slice %arg8[%9] : memref<2x!tpu.dma_semaphore, #tpu.memory_space<semaphore_mem>> -> memref<1x!tpu.dma_semaphore, #tpu.memory_space<semaphore_mem>>
      %390 = tpu.memref_squeeze %389 : memref<1x!tpu.dma_semaphore, #tpu.memory_space<semaphore_mem>> -> memref<!tpu.dma_semaphore, #tpu.memory_space<semaphore_mem>>
      tpu.enqueue_dma source(%386 : memref<8x768xf32, #tpu.memory_space<any>>) target(%388 : memref<8x768xf32, #tpu.memory_space<vmem>>) target_semaphore(%390 : memref<!tpu.dma_semaphore, #tpu.memory_space<semaphore_mem>>)
      %cst_167 = arith.constant 0.000000e+00 : f32
      %391 = vector.broadcast %cst_167 : f32 to vector<8x1xf32>
      %c0_168 = arith.constant 0 : index
      %c0_169 = arith.constant 0 : index
      %392 = vector.load %arg5[%c0_168, %c0_169] : memref<8x1xf32, #tpu.memory_space<vmem>>, vector<8x1xf32>
      tpu.vector_store %arg5[%c0_168, %c0_169], %391 {strides = array<i32>} : memref<8x1xf32, #tpu.memory_space<vmem>>, vector<8x1xf32>,
      %cst_170 = arith.constant 0.000000e+00 : f32
      %393 = vector.broadcast %cst_170 : f32 to vector<8x1xf32>
      %c0_171 = arith.constant 0 : index
      %c0_172 = arith.constant 0 : index
      %394 = vector.load %arg6[%c0_171, %c0_172] : memref<8x1xf32, #tpu.memory_space<vmem>>, vector<8x1xf32>
      tpu.vector_store %arg6[%c0_171, %c0_172], %393 {strides = array<i32>} : memref<8x1xf32, #tpu.memory_space<vmem>>, vector<8x1xf32>,
    } else {
    }
    %c1_i32_5 = arith.constant 1 : i32
    %13 = arith.addi %arg0, %c1_i32_5 : i32
    %c2_i32_6 = arith.constant 2 : i32
    %14 = arith.cmpi slt, %13, %c2_i32_6 : i32
    %15 = arith.extui %14 : i1 to i32
    %c0_i32_7 = arith.constant 0 : i32
    %16 = arith.cmpi ne, %15, %c0_i32_7 : i32
    scf.if %16 {
      %c1_i32_162 = arith.constant 1 : i32
      %384 = arith.addi %arg0, %c1_i32_162 : i32
      %c1_i32_163 = arith.constant 1 : i32
      %385 = arith.subi %c1_i32_163, %9 : i32
      %c512_i32_164 = arith.constant 512 : i32
      %386 = arith.muli %384, %c512_i32_164 : i32
      %c384_i32_165 = arith.constant 384 : i32
      %387 = arith.addi %c384_i32_165, %386 : i32
      %c0_i32_166 = arith.constant 0 : i32
      %388 = tpu.memref_slice %arg1[%c0_i32_166, %387] : memref<8x2048xf32, #tpu.memory_space<any>> -> memref<8x768xf32, #tpu.memory_space<any>>
      %c0_i32_167 = arith.constant 0 : i32
      %c0_i32_168 = arith.constant 0 : i32
      %389 = tpu.memref_slice %arg7[%385, %c0_i32_167, %c0_i32_168] : memref<2x8x768xf32, #tpu.memory_space<vmem>> -> memref<1x8x768xf32, #tpu.memory_space<vmem>>
      %390 = tpu.memref_squeeze %389 : memref<1x8x768xf32, #tpu.memory_space<vmem>> -> memref<8x768xf32, #tpu.memory_space<vmem>>
      %391 = tpu.memref_slice %arg8[%385] : memref<2x!tpu.dma_semaphore, #tpu.memory_space<semaphore_mem>> -> memref<1x!tpu.dma_semaphore, #tpu.memory_space<semaphore_mem>>
      %392 = tpu.memref_squeeze %391 : memref<1x!tpu.dma_semaphore, #tpu.memory_space<semaphore_mem>> -> memref<!tpu.dma_semaphore, #tpu.memory_space<semaphore_mem>>
      tpu.enqueue_dma source(%388 : memref<8x768xf32, #tpu.memory_space<any>>) target(%390 : memref<8x768xf32, #tpu.memory_space<vmem>>) target_semaphore(%392 : memref<!tpu.dma_semaphore, #tpu.memory_space<semaphore_mem>>)
    } else {
    }
    %c512_i32 = arith.constant 512 : i32
    %17 = arith.muli %arg0, %c512_i32 : i32
    %c384_i32 = arith.constant 384 : i32
    %18 = arith.addi %c384_i32, %17 : i32
    %c0_i32_8 = arith.constant 0 : i32
    %19 = tpu.memref_slice %arg1[%c0_i32_8, %18] : memref<8x2048xf32, #tpu.memory_space<any>> -> memref<8x768xf32, #tpu.memory_space<any>>
    %c0_i32_9 = arith.constant 0 : i32
    %c0_i32_10 = arith.constant 0 : i32
    %20 = tpu.memref_slice %arg7[%9, %c0_i32_9, %c0_i32_10] : memref<2x8x768xf32, #tpu.memory_space<vmem>> -> memref<1x8x768xf32, #tpu.memory_space<vmem>>
    %21 = tpu.memref_squeeze %20 : memref<1x8x768xf32, #tpu.memory_space<vmem>> -> memref<8x768xf32, #tpu.memory_space<vmem>>
    %22 = tpu.memref_slice %arg8[%9] : memref<2x!tpu.dma_semaphore, #tpu.memory_space<semaphore_mem>> -> memref<1x!tpu.dma_semaphore, #tpu.memory_space<semaphore_mem>>
    %23 = tpu.memref_squeeze %22 : memref<1x!tpu.dma_semaphore, #tpu.memory_space<semaphore_mem>> -> memref<!tpu.dma_semaphore, #tpu.memory_space<semaphore_mem>>
    tpu.wait_dma2 semaphore(%23 : memref<!tpu.dma_semaphore, #tpu.memory_space<semaphore_mem>>) src(%19 : memref<8x768xf32, #tpu.memory_space<any>>) dst(%21 : memref<8x768xf32, #tpu.memory_space<vmem>>)
    %24 = arith.index_cast %9 : i32 to index
    %c0 = arith.constant 0 : index
    %c0_11 = arith.constant 0 : index
    %25 = vector.load %arg7[%24, %c0, %c0_11] : memref<2x8x768xf32, #tpu.memory_space<vmem>>, vector<1x8x768xf32>
    %26 = vector.shape_cast %25 : vector<1x8x768xf32> to vector<8x768xf32>
    %c0_12 = arith.constant 0 : index
    %c0_13 = arith.constant 0 : index
    %27 = vector.load %arg3[%c0_12, %c0_13] : memref<1x512xi32, #tpu.memory_space<vmem>>, vector<1x512xi32>
    %cst = arith.constant 0.000000e+00 : f32
    %28 = vector.broadcast %cst : f32 to vector<8x512xf32>
    %29 = vector.extract_strided_slice %26 {offsets = [0, 55], sizes = [8, 512], strides = [1, 1]} : vector<8x768xf32> to vector<8x512xf32>
    %c21_i32 = arith.constant 21 : i32
    %30 = vector.broadcast %c21_i32 : i32 to vector<1x512xi32>
    %31 = arith.andi %27, %30 : vector<1x512xi32>
    %c21_i32_14 = arith.constant 21 : i32
    %32 = vector.broadcast %c21_i32_14 : i32 to vector<1x512xi32>
    %33 = arith.cmpi eq, %31, %32 : vector<1x512xi32>
    %cst_15 = arith.constant 0.000000e+00 : f32
    %34 = vector.shape_cast %33 : vector<1x512xi1> to vector<1x512xi1>
    %35 = vector.broadcast %34 : vector<1x512xi1> to vector<8x512xi1>
    %36 = vector.broadcast %cst_15 : f32 to vector<8x512xf32>
    %37 = arith.select %35, %29, %36 : vector<8x512xi1>, vector<8x512xf32>
    %c0_16 = arith.constant 0 : index
    %c0_17 = arith.constant 0 : index
    %c0_18 = arith.constant 0 : index
    %38 = vector.load %arg2[%c0_16, %c0_17, %c0_18] : memref<27x8x8xf32, #tpu.memory_space<vmem>>, vector<1x8x8xf32>
    %39 = vector.shape_cast %38 : vector<1x8x8xf32> to vector<8x8xf32>
    %cst_19 = arith.constant dense<0.000000e+00> : vector<8x512xf32>
    %40 = tpu.matmul %39, %37, %cst_19 {dimension_numbers = #tpu.dot_dimension_numbers<[1], [0], [0], [1], [0, 0, 1, 1], [], []>} : vector<8x8xf32>, vector<8x512xf32>, vector<8x512xf32> -> vector<8x512xf32>
    %41 = arith.addf %28, %40 : vector<8x512xf32>
    %42 = vector.extract_strided_slice %26 {offsets = [0, 56], sizes = [8, 512], strides = [1, 1]} : vector<8x768xf32> to vector<8x512xf32>
    %c5_i32 = arith.constant 5 : i32
    %43 = vector.broadcast %c5_i32 : i32 to vector<1x512xi32>
    %44 = arith.andi %27, %43 : vector<1x512xi32>
    %c5_i32_20 = arith.constant 5 : i32
    %45 = vector.broadcast %c5_i32_20 : i32 to vector<1x512xi32>
    %46 = arith.cmpi eq, %44, %45 : vector<1x512xi32>
    %cst_21 = arith.constant 0.000000e+00 : f32
    %47 = vector.shape_cast %46 : vector<1x512xi1> to vector<1x512xi1>
    %48 = vector.broadcast %47 : vector<1x512xi1> to vector<8x512xi1>
    %49 = vector.broadcast %cst_21 : f32 to vector<8x512xf32>
    %50 = arith.select %48, %42, %49 : vector<8x512xi1>, vector<8x512xf32>
    %c1 = arith.constant 1 : index
    %c0_22 = arith.constant 0 : index
    %c0_23 = arith.constant 0 : index
    %51 = vector.load %arg2[%c1, %c0_22, %c0_23] : memref<27x8x8xf32, #tpu.memory_space<vmem>>, vector<1x8x8xf32>
    %52 = vector.shape_cast %51 : vector<1x8x8xf32> to vector<8x8xf32>
    %cst_24 = arith.constant dense<0.000000e+00> : vector<8x512xf32>
    %53 = tpu.matmul %52, %50, %cst_24 {dimension_numbers = #tpu.dot_dimension_numbers<[1], [0], [0], [1], [0, 0, 1, 1], [], []>} : vector<8x8xf32>, vector<8x512xf32>, vector<8x512xf32> -> vector<8x512xf32>
    %54 = arith.addf %41, %53 : vector<8x512xf32>
    %55 = vector.extract_strided_slice %26 {offsets = [0, 57], sizes = [8, 512], strides = [1, 1]} : vector<8x768xf32> to vector<8x512xf32>
    %c37_i32 = arith.constant 37 : i32
    %56 = vector.broadcast %c37_i32 : i32 to vector<1x512xi32>
    %57 = arith.andi %27, %56 : vector<1x512xi32>
    %c37_i32_25 = arith.constant 37 : i32
    %58 = vector.broadcast %c37_i32_25 : i32 to vector<1x512xi32>
    %59 = arith.cmpi eq, %57, %58 : vector<1x512xi32>
    %cst_26 = arith.constant 0.000000e+00 : f32
    %60 = vector.shape_cast %59 : vector<1x512xi1> to vector<1x512xi1>
    %61 = vector.broadcast %60 : vector<1x512xi1> to vector<8x512xi1>
    %62 = vector.broadcast %cst_26 : f32 to vector<8x512xf32>
    %63 = arith.select %61, %55, %62 : vector<8x512xi1>, vector<8x512xf32>
    %c2 = arith.constant 2 : index
    %c0_27 = arith.constant 0 : index
    %c0_28 = arith.constant 0 : index
    %64 = vector.load %arg2[%c2, %c0_27, %c0_28] : memref<27x8x8xf32, #tpu.memory_space<vmem>>, vector<1x8x8xf32>
    %65 = vector.shape_cast %64 : vector<1x8x8xf32> to vector<8x8xf32>
    %cst_29 = arith.constant dense<0.000000e+00> : vector<8x512xf32>
    %66 = tpu.matmul %65, %63, %cst_29 {dimension_numbers = #tpu.dot_dimension_numbers<[1], [0], [0], [1], [0, 0, 1, 1], [], []>} : vector<8x8xf32>, vector<8x512xf32>, vector<8x512xf32> -> vector<8x512xf32>
    %67 = arith.addf %54, %66 : vector<8x512xf32>
    %68 = vector.extract_strided_slice %26 {offsets = [0, 63], sizes = [8, 512], strides = [1, 1]} : vector<8x768xf32> to vector<8x512xf32>
    %c17_i32 = arith.constant 17 : i32
    %69 = vector.broadcast %c17_i32 : i32 to vector<1x512xi32>
    %70 = arith.andi %27, %69 : vector<1x512xi32>
    %c17_i32_30 = arith.constant 17 : i32
    %71 = vector.broadcast %c17_i32_30 : i32 to vector<1x512xi32>
    %72 = arith.cmpi eq, %70, %71 : vector<1x512xi32>
    %cst_31 = arith.constant 0.000000e+00 : f32
    %73 = vector.shape_cast %72 : vector<1x512xi1> to vector<1x512xi1>
    %74 = vector.broadcast %73 : vector<1x512xi1> to vector<8x512xi1>
    %75 = vector.broadcast %cst_31 : f32 to vector<8x512xf32>
    %76 = arith.select %74, %68, %75 : vector<8x512xi1>, vector<8x512xf32>
    %c3 = arith.constant 3 : index
    %c0_32 = arith.constant 0 : index
    %c0_33 = arith.constant 0 : index
    %77 = vector.load %arg2[%c3, %c0_32, %c0_33] : memref<27x8x8xf32, #tpu.memory_space<vmem>>, vector<1x8x8xf32>
    %78 = vector.shape_cast %77 : vector<1x8x8xf32> to vector<8x8xf32>
    %cst_34 = arith.constant dense<0.000000e+00> : vector<8x512xf32>
    %79 = tpu.matmul %78, %76, %cst_34 {dimension_numbers = #tpu.dot_dimension_numbers<[1], [0], [0], [1], [0, 0, 1, 1], [], []>} : vector<8x8xf32>, vector<8x512xf32>, vector<8x512xf32> -> vector<8x512xf32>
    %80 = arith.addf %67, %79 : vector<8x512xf32>
    %81 = vector.extract_strided_slice %26 {offsets = [0, 64], sizes = [8, 512], strides = [1, 1]} : vector<8x768xf32> to vector<8x512xf32>
    %c1_i32_35 = arith.constant 1 : i32
    %82 = vector.broadcast %c1_i32_35 : i32 to vector<1x512xi32>
    %83 = arith.andi %27, %82 : vector<1x512xi32>
    %c1_i32_36 = arith.constant 1 : i32
    %84 = vector.broadcast %c1_i32_36 : i32 to vector<1x512xi32>
    %85 = arith.cmpi eq, %83, %84 : vector<1x512xi32>
    %cst_37 = arith.constant 0.000000e+00 : f32
    %86 = vector.shape_cast %85 : vector<1x512xi1> to vector<1x512xi1>
    %87 = vector.broadcast %86 : vector<1x512xi1> to vector<8x512xi1>
    %88 = vector.broadcast %cst_37 : f32 to vector<8x512xf32>
    %89 = arith.select %87, %81, %88 : vector<8x512xi1>, vector<8x512xf32>
    %c4 = arith.constant 4 : index
    %c0_38 = arith.constant 0 : index
    %c0_39 = arith.constant 0 : index
    %90 = vector.load %arg2[%c4, %c0_38, %c0_39] : memref<27x8x8xf32, #tpu.memory_space<vmem>>, vector<1x8x8xf32>
    %91 = vector.shape_cast %90 : vector<1x8x8xf32> to vector<8x8xf32>
    %cst_40 = arith.constant dense<0.000000e+00> : vector<8x512xf32>
    %92 = tpu.matmul %91, %89, %cst_40 {dimension_numbers = #tpu.dot_dimension_numbers<[1], [0], [0], [1], [0, 0, 1, 1], [], []>} : vector<8x8xf32>, vector<8x512xf32>, vector<8x512xf32> -> vector<8x512xf32>
    %93 = arith.addf %80, %92 : vector<8x512xf32>
    %94 = vector.extract_strided_slice %26 {offsets = [0, 65], sizes = [8, 512], strides = [1, 1]} : vector<8x768xf32> to vector<8x512xf32>
    %c33_i32 = arith.constant 33 : i32
    %95 = vector.broadcast %c33_i32 : i32 to vector<1x512xi32>
    %96 = arith.andi %27, %95 : vector<1x512xi32>
    %c33_i32_41 = arith.constant 33 : i32
    %97 = vector.broadcast %c33_i32_41 : i32 to vector<1x512xi32>
    %98 = arith.cmpi eq, %96, %97 : vector<1x512xi32>
    %cst_42 = arith.constant 0.000000e+00 : f32
    %99 = vector.shape_cast %98 : vector<1x512xi1> to vector<1x512xi1>
    %100 = vector.broadcast %99 : vector<1x512xi1> to vector<8x512xi1>
    %101 = vector.broadcast %cst_42 : f32 to vector<8x512xf32>
    %102 = arith.select %100, %94, %101 : vector<8x512xi1>, vector<8x512xf32>
    %c5 = arith.constant 5 : index
    %c0_43 = arith.constant 0 : index
    %c0_44 = arith.constant 0 : index
    %103 = vector.load %arg2[%c5, %c0_43, %c0_44] : memref<27x8x8xf32, #tpu.memory_space<vmem>>, vector<1x8x8xf32>
    %104 = vector.shape_cast %103 : vector<1x8x8xf32> to vector<8x8xf32>
    %cst_45 = arith.constant dense<0.000000e+00> : vector<8x512xf32>
    %105 = tpu.matmul %104, %102, %cst_45 {dimension_numbers = #tpu.dot_dimension_numbers<[1], [0], [0], [1], [0, 0, 1, 1], [], []>} : vector<8x8xf32>, vector<8x512xf32>, vector<8x512xf32> -> vector<8x512xf32>
    %106 = arith.addf %93, %105 : vector<8x512xf32>
    %107 = vector.extract_strided_slice %26 {offsets = [0, 71], sizes = [8, 512], strides = [1, 1]} : vector<8x768xf32> to vector<8x512xf32>
    %c25_i32 = arith.constant 25 : i32
    %108 = vector.broadcast %c25_i32 : i32 to vector<1x512xi32>
    %109 = arith.andi %27, %108 : vector<1x512xi32>
    %c25_i32_46 = arith.constant 25 : i32
    %110 = vector.broadcast %c25_i32_46 : i32 to vector<1x512xi32>
    %111 = arith.cmpi eq, %109, %110 : vector<1x512xi32>
    %cst_47 = arith.constant 0.000000e+00 : f32
    %112 = vector.shape_cast %111 : vector<1x512xi1> to vector<1x512xi1>
    %113 = vector.broadcast %112 : vector<1x512xi1> to vector<8x512xi1>
    %114 = vector.broadcast %cst_47 : f32 to vector<8x512xf32>
    %115 = arith.select %113, %107, %114 : vector<8x512xi1>, vector<8x512xf32>
    %c6 = arith.constant 6 : index
    %c0_48 = arith.constant 0 : index
    %c0_49 = arith.constant 0 : index
    %116 = vector.load %arg2[%c6, %c0_48, %c0_49] : memref<27x8x8xf32, #tpu.memory_space<vmem>>, vector<1x8x8xf32>
    %117 = vector.shape_cast %116 : vector<1x8x8xf32> to vector<8x8xf32>
    %cst_50 = arith.constant dense<0.000000e+00> : vector<8x512xf32>
    %118 = tpu.matmul %117, %115, %cst_50 {dimension_numbers = #tpu.dot_dimension_numbers<[1], [0], [0], [1], [0, 0, 1, 1], [], []>} : vector<8x8xf32>, vector<8x512xf32>, vector<8x512xf32> -> vector<8x512xf32>
    %119 = arith.addf %106, %118 : vector<8x512xf32>
    %120 = vector.extract_strided_slice %26 {offsets = [0, 72], sizes = [8, 512], strides = [1, 1]} : vector<8x768xf32> to vector<8x512xf32>
    %c9_i32 = arith.constant 9 : i32
    %121 = vector.broadcast %c9_i32 : i32 to vector<1x512xi32>
    %122 = arith.andi %27, %121 : vector<1x512xi32>
    %c9_i32_51 = arith.constant 9 : i32
    %123 = vector.broadcast %c9_i32_51 : i32 to vector<1x512xi32>
    %124 = arith.cmpi eq, %122, %123 : vector<1x512xi32>
    %cst_52 = arith.constant 0.000000e+00 : f32
    %125 = vector.shape_cast %124 : vector<1x512xi1> to vector<1x512xi1>
    %126 = vector.broadcast %125 : vector<1x512xi1> to vector<8x512xi1>
    %127 = vector.broadcast %cst_52 : f32 to vector<8x512xf32>
    %128 = arith.select %126, %120, %127 : vector<8x512xi1>, vector<8x512xf32>
    %c7 = arith.constant 7 : index
    %c0_53 = arith.constant 0 : index
    %c0_54 = arith.constant 0 : index
    %129 = vector.load %arg2[%c7, %c0_53, %c0_54] : memref<27x8x8xf32, #tpu.memory_space<vmem>>, vector<1x8x8xf32>
    %130 = vector.shape_cast %129 : vector<1x8x8xf32> to vector<8x8xf32>
    %cst_55 = arith.constant dense<0.000000e+00> : vector<8x512xf32>
    %131 = tpu.matmul %130, %128, %cst_55 {dimension_numbers = #tpu.dot_dimension_numbers<[1], [0], [0], [1], [0, 0, 1, 1], [], []>} : vector<8x8xf32>, vector<8x512xf32>, vector<8x512xf32> -> vector<8x512xf32>
    %132 = arith.addf %119, %131 : vector<8x512xf32>
    %133 = vector.extract_strided_slice %26 {offsets = [0, 73], sizes = [8, 512], strides = [1, 1]} : vector<8x768xf32> to vector<8x512xf32>
    %c41_i32 = arith.constant 41 : i32
    %134 = vector.broadcast %c41_i32 : i32 to vector<1x512xi32>
    %135 = arith.andi %27, %134 : vector<1x512xi32>
    %c41_i32_56 = arith.constant 41 : i32
    %136 = vector.broadcast %c41_i32_56 : i32 to vector<1x512xi32>
    %137 = arith.cmpi eq, %135, %136 : vector<1x512xi32>
    %cst_57 = arith.constant 0.000000e+00 : f32
    %138 = vector.shape_cast %137 : vector<1x512xi1> to vector<1x512xi1>
    %139 = vector.broadcast %138 : vector<1x512xi1> to vector<8x512xi1>
    %140 = vector.broadcast %cst_57 : f32 to vector<8x512xf32>
    %141 = arith.select %139, %133, %140 : vector<8x512xi1>, vector<8x512xf32>
    %c8 = arith.constant 8 : index
    %c0_58 = arith.constant 0 : index
    %c0_59 = arith.constant 0 : index
    %142 = vector.load %arg2[%c8, %c0_58, %c0_59] : memref<27x8x8xf32, #tpu.memory_space<vmem>>, vector<1x8x8xf32>
    %143 = vector.shape_cast %142 : vector<1x8x8xf32> to vector<8x8xf32>
    %cst_60 = arith.constant dense<0.000000e+00> : vector<8x512xf32>
    %144 = tpu.matmul %143, %141, %cst_60 {dimension_numbers = #tpu.dot_dimension_numbers<[1], [0], [0], [1], [0, 0, 1, 1], [], []>} : vector<8x8xf32>, vector<8x512xf32>, vector<8x512xf32> -> vector<8x512xf32>
    %145 = arith.addf %132, %144 : vector<8x512xf32>
    %146 = vector.extract_strided_slice %26 {offsets = [0, 119], sizes = [8, 512], strides = [1, 1]} : vector<8x768xf32> to vector<8x512xf32>
    %c20_i32 = arith.constant 20 : i32
    %147 = vector.broadcast %c20_i32 : i32 to vector<1x512xi32>
    %148 = arith.andi %27, %147 : vector<1x512xi32>
    %c20_i32_61 = arith.constant 20 : i32
    %149 = vector.broadcast %c20_i32_61 : i32 to vector<1x512xi32>
    %150 = arith.cmpi eq, %148, %149 : vector<1x512xi32>
    %cst_62 = arith.constant 0.000000e+00 : f32
    %151 = vector.shape_cast %150 : vector<1x512xi1> to vector<1x512xi1>
    %152 = vector.broadcast %151 : vector<1x512xi1> to vector<8x512xi1>
    %153 = vector.broadcast %cst_62 : f32 to vector<8x512xf32>
    %154 = arith.select %152, %146, %153 : vector<8x512xi1>, vector<8x512xf32>
    %c9 = arith.constant 9 : index
    %c0_63 = arith.constant 0 : index
    %c0_64 = arith.constant 0 : index
    %155 = vector.load %arg2[%c9, %c0_63, %c0_64] : memref<27x8x8xf32, #tpu.memory_space<vmem>>, vector<1x8x8xf32>
    %156 = vector.shape_cast %155 : vector<1x8x8xf32> to vector<8x8xf32>
    %cst_65 = arith.constant dense<0.000000e+00> : vector<8x512xf32>
    %157 = tpu.matmul %156, %154, %cst_65 {dimension_numbers = #tpu.dot_dimension_numbers<[1], [0], [0], [1], [0, 0, 1, 1], [], []>} : vector<8x8xf32>, vector<8x512xf32>, vector<8x512xf32> -> vector<8x512xf32>
    %158 = arith.addf %145, %157 : vector<8x512xf32>
    %159 = vector.extract_strided_slice %26 {offsets = [0, 120], sizes = [8, 512], strides = [1, 1]} : vector<8x768xf32> to vector<8x512xf32>
    %c4_i32 = arith.constant 4 : i32
    %160 = vector.broadcast %c4_i32 : i32 to vector<1x512xi32>
    %161 = arith.andi %27, %160 : vector<1x512xi32>
    %c4_i32_66 = arith.constant 4 : i32
    %162 = vector.broadcast %c4_i32_66 : i32 to vector<1x512xi32>
    %163 = arith.cmpi eq, %161, %162 : vector<1x512xi32>
    %cst_67 = arith.constant 0.000000e+00 : f32
    %164 = vector.shape_cast %163 : vector<1x512xi1> to vector<1x512xi1>
    %165 = vector.broadcast %164 : vector<1x512xi1> to vector<8x512xi1>
    %166 = vector.broadcast %cst_67 : f32 to vector<8x512xf32>
    %167 = arith.select %165, %159, %166 : vector<8x512xi1>, vector<8x512xf32>
    %c10 = arith.constant 10 : index
    %c0_68 = arith.constant 0 : index
    %c0_69 = arith.constant 0 : index
    %168 = vector.load %arg2[%c10, %c0_68, %c0_69] : memref<27x8x8xf32, #tpu.memory_space<vmem>>, vector<1x8x8xf32>
    %169 = vector.shape_cast %168 : vector<1x8x8xf32> to vector<8x8xf32>
    %cst_70 = arith.constant dense<0.000000e+00> : vector<8x512xf32>
    %170 = tpu.matmul %169, %167, %cst_70 {dimension_numbers = #tpu.dot_dimension_numbers<[1], [0], [0], [1], [0, 0, 1, 1], [], []>} : vector<8x8xf32>, vector<8x512xf32>, vector<8x512xf32> -> vector<8x512xf32>
    %171 = arith.addf %158, %170 : vector<8x512xf32>
    %172 = vector.extract_strided_slice %26 {offsets = [0, 121], sizes = [8, 512], strides = [1, 1]} : vector<8x768xf32> to vector<8x512xf32>
    %c36_i32 = arith.constant 36 : i32
    %173 = vector.broadcast %c36_i32 : i32 to vector<1x512xi32>
    %174 = arith.andi %27, %173 : vector<1x512xi32>
    %c36_i32_71 = arith.constant 36 : i32
    %175 = vector.broadcast %c36_i32_71 : i32 to vector<1x512xi32>
    %176 = arith.cmpi eq, %174, %175 : vector<1x512xi32>
    %cst_72 = arith.constant 0.000000e+00 : f32
    %177 = vector.shape_cast %176 : vector<1x512xi1> to vector<1x512xi1>
    %178 = vector.broadcast %177 : vector<1x512xi1> to vector<8x512xi1>
    %179 = vector.broadcast %cst_72 : f32 to vector<8x512xf32>
    %180 = arith.select %178, %172, %179 : vector<8x512xi1>, vector<8x512xf32>
    %c11 = arith.constant 11 : index
    %c0_73 = arith.constant 0 : index
    %c0_74 = arith.constant 0 : index
    %181 = vector.load %arg2[%c11, %c0_73, %c0_74] : memref<27x8x8xf32, #tpu.memory_space<vmem>>, vector<1x8x8xf32>
    %182 = vector.shape_cast %181 : vector<1x8x8xf32> to vector<8x8xf32>
    %cst_75 = arith.constant dense<0.000000e+00> : vector<8x512xf32>
    %183 = tpu.matmul %182, %180, %cst_75 {dimension_numbers = #tpu.dot_dimension_numbers<[1], [0], [0], [1], [0, 0, 1, 1], [], []>} : vector<8x8xf32>, vector<8x512xf32>, vector<8x512xf32> -> vector<8x512xf32>
    %184 = arith.addf %171, %183 : vector<8x512xf32>
    %185 = vector.extract_strided_slice %26 {offsets = [0, 127], sizes = [8, 512], strides = [1, 1]} : vector<8x768xf32> to vector<8x512xf32>
    %c16_i32 = arith.constant 16 : i32
    %186 = vector.broadcast %c16_i32 : i32 to vector<1x512xi32>
    %187 = arith.andi %27, %186 : vector<1x512xi32>
    %c16_i32_76 = arith.constant 16 : i32
    %188 = vector.broadcast %c16_i32_76 : i32 to vector<1x512xi32>
    %189 = arith.cmpi eq, %187, %188 : vector<1x512xi32>
    %cst_77 = arith.constant 0.000000e+00 : f32
    %190 = vector.shape_cast %189 : vector<1x512xi1> to vector<1x512xi1>
    %191 = vector.broadcast %190 : vector<1x512xi1> to vector<8x512xi1>
    %192 = vector.broadcast %cst_77 : f32 to vector<8x512xf32>
    %193 = arith.select %191, %185, %192 : vector<8x512xi1>, vector<8x512xf32>
    %c12 = arith.constant 12 : index
    %c0_78 = arith.constant 0 : index
    %c0_79 = arith.constant 0 : index
    %194 = vector.load %arg2[%c12, %c0_78, %c0_79] : memref<27x8x8xf32, #tpu.memory_space<vmem>>, vector<1x8x8xf32>
    %195 = vector.shape_cast %194 : vector<1x8x8xf32> to vector<8x8xf32>
    %cst_80 = arith.constant dense<0.000000e+00> : vector<8x512xf32>
    %196 = tpu.matmul %195, %193, %cst_80 {dimension_numbers = #tpu.dot_dimension_numbers<[1], [0], [0], [1], [0, 0, 1, 1], [], []>} : vector<8x8xf32>, vector<8x512xf32>, vector<8x512xf32> -> vector<8x512xf32>
    %197 = arith.addf %184, %196 : vector<8x512xf32>
    %198 = vector.extract_strided_slice %26 {offsets = [0, 128], sizes = [8, 512], strides = [1, 1]} : vector<8x768xf32> to vector<8x512xf32>
    %c13 = arith.constant 13 : index
    %c0_81 = arith.constant 0 : index
    %c0_82 = arith.constant 0 : index
    %199 = vector.load %arg2[%c13, %c0_81, %c0_82] : memref<27x8x8xf32, #tpu.memory_space<vmem>>, vector<1x8x8xf32>
    %200 = vector.shape_cast %199 : vector<1x8x8xf32> to vector<8x8xf32>
    %cst_83 = arith.constant dense<0.000000e+00> : vector<8x512xf32>
    %201 = tpu.matmul %200, %198, %cst_83 {dimension_numbers = #tpu.dot_dimension_numbers<[1], [0], [0], [1], [0, 0, 1, 1], [], []>} : vector<8x8xf32>, vector<8x512xf32>, vector<8x512xf32> -> vector<8x512xf32>
    %202 = arith.addf %197, %201 : vector<8x512xf32>
    %203 = vector.extract_strided_slice %26 {offsets = [0, 129], sizes = [8, 512], strides = [1, 1]} : vector<8x768xf32> to vector<8x512xf32>
    %c32_i32 = arith.constant 32 : i32
    %204 = vector.broadcast %c32_i32 : i32 to vector<1x512xi32>
    %205 = arith.andi %27, %204 : vector<1x512xi32>
    %c32_i32_84 = arith.constant 32 : i32
    %206 = vector.broadcast %c32_i32_84 : i32 to vector<1x512xi32>
    %207 = arith.cmpi eq, %205, %206 : vector<1x512xi32>
    %cst_85 = arith.constant 0.000000e+00 : f32
    %208 = vector.shape_cast %207 : vector<1x512xi1> to vector<1x512xi1>
    %209 = vector.broadcast %208 : vector<1x512xi1> to vector<8x512xi1>
    %210 = vector.broadcast %cst_85 : f32 to vector<8x512xf32>
    %211 = arith.select %209, %203, %210 : vector<8x512xi1>, vector<8x512xf32>
    %c14 = arith.constant 14 : index
    %c0_86 = arith.constant 0 : index
    %c0_87 = arith.constant 0 : index
    %212 = vector.load %arg2[%c14, %c0_86, %c0_87] : memref<27x8x8xf32, #tpu.memory_space<vmem>>, vector<1x8x8xf32>
    %213 = vector.shape_cast %212 : vector<1x8x8xf32> to vector<8x8xf32>
    %cst_88 = arith.constant dense<0.000000e+00> : vector<8x512xf32>
    %214 = tpu.matmul %213, %211, %cst_88 {dimension_numbers = #tpu.dot_dimension_numbers<[1], [0], [0], [1], [0, 0, 1, 1], [], []>} : vector<8x8xf32>, vector<8x512xf32>, vector<8x512xf32> -> vector<8x512xf32>
    %215 = arith.addf %202, %214 : vector<8x512xf32>
    %216 = vector.extract_strided_slice %26 {offsets = [0, 135], sizes = [8, 512], strides = [1, 1]} : vector<8x768xf32> to vector<8x512xf32>
    %c24_i32 = arith.constant 24 : i32
    %217 = vector.broadcast %c24_i32 : i32 to vector<1x512xi32>
    %218 = arith.andi %27, %217 : vector<1x512xi32>
    %c24_i32_89 = arith.constant 24 : i32
    %219 = vector.broadcast %c24_i32_89 : i32 to vector<1x512xi32>
    %220 = arith.cmpi eq, %218, %219 : vector<1x512xi32>
    %cst_90 = arith.constant 0.000000e+00 : f32
    %221 = vector.shape_cast %220 : vector<1x512xi1> to vector<1x512xi1>
    %222 = vector.broadcast %221 : vector<1x512xi1> to vector<8x512xi1>
    %223 = vector.broadcast %cst_90 : f32 to vector<8x512xf32>
    %224 = arith.select %222, %216, %223 : vector<8x512xi1>, vector<8x512xf32>
    %c15 = arith.constant 15 : index
    %c0_91 = arith.constant 0 : index
    %c0_92 = arith.constant 0 : index
    %225 = vector.load %arg2[%c15, %c0_91, %c0_92] : memref<27x8x8xf32, #tpu.memory_space<vmem>>, vector<1x8x8xf32>
    %226 = vector.shape_cast %225 : vector<1x8x8xf32> to vector<8x8xf32>
    %cst_93 = arith.constant dense<0.000000e+00> : vector<8x512xf32>
    %227 = tpu.matmul %226, %224, %cst_93 {dimension_numbers = #tpu.dot_dimension_numbers<[1], [0], [0], [1], [0, 0, 1, 1], [], []>} : vector<8x8xf32>, vector<8x512xf32>, vector<8x512xf32> -> vector<8x512xf32>
    %228 = arith.addf %215, %227 : vector<8x512xf32>
    %229 = vector.extract_strided_slice %26 {offsets = [0, 136], sizes = [8, 512], strides = [1, 1]} : vector<8x768xf32> to vector<8x512xf32>
    %c8_i32 = arith.constant 8 : i32
    %230 = vector.broadcast %c8_i32 : i32 to vector<1x512xi32>
    %231 = arith.andi %27, %230 : vector<1x512xi32>
    %c8_i32_94 = arith.constant 8 : i32
    %232 = vector.broadcast %c8_i32_94 : i32 to vector<1x512xi32>
    %233 = arith.cmpi eq, %231, %232 : vector<1x512xi32>
    %cst_95 = arith.constant 0.000000e+00 : f32
    %234 = vector.shape_cast %233 : vector<1x512xi1> to vector<1x512xi1>
    %235 = vector.broadcast %234 : vector<1x512xi1> to vector<8x512xi1>
    %236 = vector.broadcast %cst_95 : f32 to vector<8x512xf32>
    %237 = arith.select %235, %229, %236 : vector<8x512xi1>, vector<8x512xf32>
    %c16 = arith.constant 16 : index
    %c0_96 = arith.constant 0 : index
    %c0_97 = arith.constant 0 : index
    %238 = vector.load %arg2[%c16, %c0_96, %c0_97] : memref<27x8x8xf32, #tpu.memory_space<vmem>>, vector<1x8x8xf32>
    %239 = vector.shape_cast %238 : vector<1x8x8xf32> to vector<8x8xf32>
    %cst_98 = arith.constant dense<0.000000e+00> : vector<8x512xf32>
    %240 = tpu.matmul %239, %237, %cst_98 {dimension_numbers = #tpu.dot_dimension_numbers<[1], [0], [0], [1], [0, 0, 1, 1], [], []>} : vector<8x8xf32>, vector<8x512xf32>, vector<8x512xf32> -> vector<8x512xf32>
    %241 = arith.addf %228, %240 : vector<8x512xf32>
    %242 = vector.extract_strided_slice %26 {offsets = [0, 137], sizes = [8, 512], strides = [1, 1]} : vector<8x768xf32> to vector<8x512xf32>
    %c40_i32 = arith.constant 40 : i32
    %243 = vector.broadcast %c40_i32 : i32 to vector<1x512xi32>
    %244 = arith.andi %27, %243 : vector<1x512xi32>
    %c40_i32_99 = arith.constant 40 : i32
    %245 = vector.broadcast %c40_i32_99 : i32 to vector<1x512xi32>
    %246 = arith.cmpi eq, %244, %245 : vector<1x512xi32>
    %cst_100 = arith.constant 0.000000e+00 : f32
    %247 = vector.shape_cast %246 : vector<1x512xi1> to vector<1x512xi1>
    %248 = vector.broadcast %247 : vector<1x512xi1> to vector<8x512xi1>
    %249 = vector.broadcast %cst_100 : f32 to vector<8x512xf32>
    %250 = arith.select %248, %242, %249 : vector<8x512xi1>, vector<8x512xf32>
    %c17 = arith.constant 17 : index
    %c0_101 = arith.constant 0 : index
    %c0_102 = arith.constant 0 : index
    %251 = vector.load %arg2[%c17, %c0_101, %c0_102] : memref<27x8x8xf32, #tpu.memory_space<vmem>>, vector<1x8x8xf32>
    %252 = vector.shape_cast %251 : vector<1x8x8xf32> to vector<8x8xf32>
    %cst_103 = arith.constant dense<0.000000e+00> : vector<8x512xf32>
    %253 = tpu.matmul %252, %250, %cst_103 {dimension_numbers = #tpu.dot_dimension_numbers<[1], [0], [0], [1], [0, 0, 1, 1], [], []>} : vector<8x8xf32>, vector<8x512xf32>, vector<8x512xf32> -> vector<8x512xf32>
    %254 = arith.addf %241, %253 : vector<8x512xf32>
    %255 = vector.extract_strided_slice %26 {offsets = [0, 183], sizes = [8, 512], strides = [1, 1]} : vector<8x768xf32> to vector<8x512xf32>
    %c22_i32 = arith.constant 22 : i32
    %256 = vector.broadcast %c22_i32 : i32 to vector<1x512xi32>
    %257 = arith.andi %27, %256 : vector<1x512xi32>
    %c22_i32_104 = arith.constant 22 : i32
    %258 = vector.broadcast %c22_i32_104 : i32 to vector<1x512xi32>
    %259 = arith.cmpi eq, %257, %258 : vector<1x512xi32>
    %cst_105 = arith.constant 0.000000e+00 : f32
    %260 = vector.shape_cast %259 : vector<1x512xi1> to vector<1x512xi1>
    %261 = vector.broadcast %260 : vector<1x512xi1> to vector<8x512xi1>
    %262 = vector.broadcast %cst_105 : f32 to vector<8x512xf32>
    %263 = arith.select %261, %255, %262 : vector<8x512xi1>, vector<8x512xf32>
    %c18 = arith.constant 18 : index
    %c0_106 = arith.constant 0 : index
    %c0_107 = arith.constant 0 : index
    %264 = vector.load %arg2[%c18, %c0_106, %c0_107] : memref<27x8x8xf32, #tpu.memory_space<vmem>>, vector<1x8x8xf32>
    %265 = vector.shape_cast %264 : vector<1x8x8xf32> to vector<8x8xf32>
    %cst_108 = arith.constant dense<0.000000e+00> : vector<8x512xf32>
    %266 = tpu.matmul %265, %263, %cst_108 {dimension_numbers = #tpu.dot_dimension_numbers<[1], [0], [0], [1], [0, 0, 1, 1], [], []>} : vector<8x8xf32>, vector<8x512xf32>, vector<8x512xf32> -> vector<8x512xf32>
    %267 = arith.addf %254, %266 : vector<8x512xf32>
    %268 = vector.extract_strided_slice %26 {offsets = [0, 184], sizes = [8, 512], strides = [1, 1]} : vector<8x768xf32> to vector<8x512xf32>
    %c6_i32 = arith.constant 6 : i32
    %269 = vector.broadcast %c6_i32 : i32 to vector<1x512xi32>
    %270 = arith.andi %27, %269 : vector<1x512xi32>
    %c6_i32_109 = arith.constant 6 : i32
    %271 = vector.broadcast %c6_i32_109 : i32 to vector<1x512xi32>
    %272 = arith.cmpi eq, %270, %271 : vector<1x512xi32>
    %cst_110 = arith.constant 0.000000e+00 : f32
    %273 = vector.shape_cast %272 : vector<1x512xi1> to vector<1x512xi1>
    %274 = vector.broadcast %273 : vector<1x512xi1> to vector<8x512xi1>
    %275 = vector.broadcast %cst_110 : f32 to vector<8x512xf32>
    %276 = arith.select %274, %268, %275 : vector<8x512xi1>, vector<8x512xf32>
    %c19 = arith.constant 19 : index
    %c0_111 = arith.constant 0 : index
    %c0_112 = arith.constant 0 : index
    %277 = vector.load %arg2[%c19, %c0_111, %c0_112] : memref<27x8x8xf32, #tpu.memory_space<vmem>>, vector<1x8x8xf32>
    %278 = vector.shape_cast %277 : vector<1x8x8xf32> to vector<8x8xf32>
    %cst_113 = arith.constant dense<0.000000e+00> : vector<8x512xf32>
    %279 = tpu.matmul %278, %276, %cst_113 {dimension_numbers = #tpu.dot_dimension_numbers<[1], [0], [0], [1], [0, 0, 1, 1], [], []>} : vector<8x8xf32>, vector<8x512xf32>, vector<8x512xf32> -> vector<8x512xf32>
    %280 = arith.addf %267, %279 : vector<8x512xf32>
    %281 = vector.extract_strided_slice %26 {offsets = [0, 185], sizes = [8, 512], strides = [1, 1]} : vector<8x768xf32> to vector<8x512xf32>
    %c38_i32 = arith.constant 38 : i32
    %282 = vector.broadcast %c38_i32 : i32 to vector<1x512xi32>
    %283 = arith.andi %27, %282 : vector<1x512xi32>
    %c38_i32_114 = arith.constant 38 : i32
    %284 = vector.broadcast %c38_i32_114 : i32 to vector<1x512xi32>
    %285 = arith.cmpi eq, %283, %284 : vector<1x512xi32>
    %cst_115 = arith.constant 0.000000e+00 : f32
    %286 = vector.shape_cast %285 : vector<1x512xi1> to vector<1x512xi1>
    %287 = vector.broadcast %286 : vector<1x512xi1> to vector<8x512xi1>
    %288 = vector.broadcast %cst_115 : f32 to vector<8x512xf32>
    %289 = arith.select %287, %281, %288 : vector<8x512xi1>, vector<8x512xf32>
    %c20 = arith.constant 20 : index
    %c0_116 = arith.constant 0 : index
    %c0_117 = arith.constant 0 : index
    %290 = vector.load %arg2[%c20, %c0_116, %c0_117] : memref<27x8x8xf32, #tpu.memory_space<vmem>>, vector<1x8x8xf32>
    %291 = vector.shape_cast %290 : vector<1x8x8xf32> to vector<8x8xf32>
    %cst_118 = arith.constant dense<0.000000e+00> : vector<8x512xf32>
    %292 = tpu.matmul %291, %289, %cst_118 {dimension_numbers = #tpu.dot_dimension_numbers<[1], [0], [0], [1], [0, 0, 1, 1], [], []>} : vector<8x8xf32>, vector<8x512xf32>, vector<8x512xf32> -> vector<8x512xf32>
    %293 = arith.addf %280, %292 : vector<8x512xf32>
    %294 = vector.extract_strided_slice %26 {offsets = [0, 191], sizes = [8, 512], strides = [1, 1]} : vector<8x768xf32> to vector<8x512xf32>
    %c18_i32 = arith.constant 18 : i32
    %295 = vector.broadcast %c18_i32 : i32 to vector<1x512xi32>
    %296 = arith.andi %27, %295 : vector<1x512xi32>
    %c18_i32_119 = arith.constant 18 : i32
    %297 = vector.broadcast %c18_i32_119 : i32 to vector<1x512xi32>
    %298 = arith.cmpi eq, %296, %297 : vector<1x512xi32>
    %cst_120 = arith.constant 0.000000e+00 : f32
    %299 = vector.shape_cast %298 : vector<1x512xi1> to vector<1x512xi1>
    %300 = vector.broadcast %299 : vector<1x512xi1> to vector<8x512xi1>
    %301 = vector.broadcast %cst_120 : f32 to vector<8x512xf32>
    %302 = arith.select %300, %294, %301 : vector<8x512xi1>, vector<8x512xf32>
    %c21 = arith.constant 21 : index
    %c0_121 = arith.constant 0 : index
    %c0_122 = arith.constant 0 : index
    %303 = vector.load %arg2[%c21, %c0_121, %c0_122] : memref<27x8x8xf32, #tpu.memory_space<vmem>>, vector<1x8x8xf32>
    %304 = vector.shape_cast %303 : vector<1x8x8xf32> to vector<8x8xf32>
    %cst_123 = arith.constant dense<0.000000e+00> : vector<8x512xf32>
    %305 = tpu.matmul %304, %302, %cst_123 {dimension_numbers = #tpu.dot_dimension_numbers<[1], [0], [0], [1], [0, 0, 1, 1], [], []>} : vector<8x8xf32>, vector<8x512xf32>, vector<8x512xf32> -> vector<8x512xf32>
    %306 = arith.addf %293, %305 : vector<8x512xf32>
    %307 = vector.extract_strided_slice %26 {offsets = [0, 192], sizes = [8, 512], strides = [1, 1]} : vector<8x768xf32> to vector<8x512xf32>
    %c2_i32_124 = arith.constant 2 : i32
    %308 = vector.broadcast %c2_i32_124 : i32 to vector<1x512xi32>
    %309 = arith.andi %27, %308 : vector<1x512xi32>
    %c2_i32_125 = arith.constant 2 : i32
    %310 = vector.broadcast %c2_i32_125 : i32 to vector<1x512xi32>
    %311 = arith.cmpi eq, %309, %310 : vector<1x512xi32>
    %cst_126 = arith.constant 0.000000e+00 : f32
    %312 = vector.shape_cast %311 : vector<1x512xi1> to vector<1x512xi1>
    %313 = vector.broadcast %312 : vector<1x512xi1> to vector<8x512xi1>
    %314 = vector.broadcast %cst_126 : f32 to vector<8x512xf32>
    %315 = arith.select %313, %307, %314 : vector<8x512xi1>, vector<8x512xf32>
    %c22 = arith.constant 22 : index
    %c0_127 = arith.constant 0 : index
    %c0_128 = arith.constant 0 : index
    %316 = vector.load %arg2[%c22, %c0_127, %c0_128] : memref<27x8x8xf32, #tpu.memory_space<vmem>>, vector<1x8x8xf32>
    %317 = vector.shape_cast %316 : vector<1x8x8xf32> to vector<8x8xf32>
    %cst_129 = arith.constant dense<0.000000e+00> : vector<8x512xf32>
    %318 = tpu.matmul %317, %315, %cst_129 {dimension_numbers = #tpu.dot_dimension_numbers<[1], [0], [0], [1], [0, 0, 1, 1], [], []>} : vector<8x8xf32>, vector<8x512xf32>, vector<8x512xf32> -> vector<8x512xf32>
    %319 = arith.addf %306, %318 : vector<8x512xf32>
    %320 = vector.extract_strided_slice %26 {offsets = [0, 193], sizes = [8, 512], strides = [1, 1]} : vector<8x768xf32> to vector<8x512xf32>
    %c34_i32 = arith.constant 34 : i32
    %321 = vector.broadcast %c34_i32 : i32 to vector<1x512xi32>
    %322 = arith.andi %27, %321 : vector<1x512xi32>
    %c34_i32_130 = arith.constant 34 : i32
    %323 = vector.broadcast %c34_i32_130 : i32 to vector<1x512xi32>
    %324 = arith.cmpi eq, %322, %323 : vector<1x512xi32>
    %cst_131 = arith.constant 0.000000e+00 : f32
    %325 = vector.shape_cast %324 : vector<1x512xi1> to vector<1x512xi1>
    %326 = vector.broadcast %325 : vector<1x512xi1> to vector<8x512xi1>
    %327 = vector.broadcast %cst_131 : f32 to vector<8x512xf32>
    %328 = arith.select %326, %320, %327 : vector<8x512xi1>, vector<8x512xf32>
    %c23 = arith.constant 23 : index
    %c0_132 = arith.constant 0 : index
    %c0_133 = arith.constant 0 : index
    %329 = vector.load %arg2[%c23, %c0_132, %c0_133] : memref<27x8x8xf32, #tpu.memory_space<vmem>>, vector<1x8x8xf32>
    %330 = vector.shape_cast %329 : vector<1x8x8xf32> to vector<8x8xf32>
    %cst_134 = arith.constant dense<0.000000e+00> : vector<8x512xf32>
    %331 = tpu.matmul %330, %328, %cst_134 {dimension_numbers = #tpu.dot_dimension_numbers<[1], [0], [0], [1], [0, 0, 1, 1], [], []>} : vector<8x8xf32>, vector<8x512xf32>, vector<8x512xf32> -> vector<8x512xf32>
    %332 = arith.addf %319, %331 : vector<8x512xf32>
    %333 = vector.extract_strided_slice %26 {offsets = [0, 199], sizes = [8, 512], strides = [1, 1]} : vector<8x768xf32> to vector<8x512xf32>
    %c26_i32 = arith.constant 26 : i32
    %334 = vector.broadcast %c26_i32 : i32 to vector<1x512xi32>
    %335 = arith.andi %27, %334 : vector<1x512xi32>
    %c26_i32_135 = arith.constant 26 : i32
    %336 = vector.broadcast %c26_i32_135 : i32 to vector<1x512xi32>
    %337 = arith.cmpi eq, %335, %336 : vector<1x512xi32>
    %cst_136 = arith.constant 0.000000e+00 : f32
    %338 = vector.shape_cast %337 : vector<1x512xi1> to vector<1x512xi1>
    %339 = vector.broadcast %338 : vector<1x512xi1> to vector<8x512xi1>
    %340 = vector.broadcast %cst_136 : f32 to vector<8x512xf32>
    %341 = arith.select %339, %333, %340 : vector<8x512xi1>, vector<8x512xf32>
    %c24 = arith.constant 24 : index
    %c0_137 = arith.constant 0 : index
    %c0_138 = arith.constant 0 : index
    %342 = vector.load %arg2[%c24, %c0_137, %c0_138] : memref<27x8x8xf32, #tpu.memory_space<vmem>>, vector<1x8x8xf32>
    %343 = vector.shape_cast %342 : vector<1x8x8xf32> to vector<8x8xf32>
    %cst_139 = arith.constant dense<0.000000e+00> : vector<8x512xf32>
    %344 = tpu.matmul %343, %341, %cst_139 {dimension_numbers = #tpu.dot_dimension_numbers<[1], [0], [0], [1], [0, 0, 1, 1], [], []>} : vector<8x8xf32>, vector<8x512xf32>, vector<8x512xf32> -> vector<8x512xf32>
    %345 = arith.addf %332, %344 : vector<8x512xf32>
    %346 = vector.extract_strided_slice %26 {offsets = [0, 200], sizes = [8, 512], strides = [1, 1]} : vector<8x768xf32> to vector<8x512xf32>
    %c10_i32 = arith.constant 10 : i32
    %347 = vector.broadcast %c10_i32 : i32 to vector<1x512xi32>
    %348 = arith.andi %27, %347 : vector<1x512xi32>
    %c10_i32_140 = arith.constant 10 : i32
    %349 = vector.broadcast %c10_i32_140 : i32 to vector<1x512xi32>
    %350 = arith.cmpi eq, %348, %349 : vector<1x512xi32>
    %cst_141 = arith.constant 0.000000e+00 : f32
    %351 = vector.shape_cast %350 : vector<1x512xi1> to vector<1x512xi1>
    %352 = vector.broadcast %351 : vector<1x512xi1> to vector<8x512xi1>
    %353 = vector.broadcast %cst_141 : f32 to vector<8x512xf32>
    %354 = arith.select %352, %346, %353 : vector<8x512xi1>, vector<8x512xf32>
    %c25 = arith.constant 25 : index
    %c0_142 = arith.constant 0 : index
    %c0_143 = arith.constant 0 : index
    %355 = vector.load %arg2[%c25, %c0_142, %c0_143] : memref<27x8x8xf32, #tpu.memory_space<vmem>>, vector<1x8x8xf32>
    %356 = vector.shape_cast %355 : vector<1x8x8xf32> to vector<8x8xf32>
    %cst_144 = arith.constant dense<0.000000e+00> : vector<8x512xf32>
    %357 = tpu.matmul %356, %354, %cst_144 {dimension_numbers = #tpu.dot_dimension_numbers<[1], [0], [0], [1], [0, 0, 1, 1], [], []>} : vector<8x8xf32>, vector<8x512xf32>, vector<8x512xf32> -> vector<8x512xf32>
    %358 = arith.addf %345, %357 : vector<8x512xf32>
    %359 = vector.extract_strided_slice %26 {offsets = [0, 201], sizes = [8, 512], strides = [1, 1]} : vector<8x768xf32> to vector<8x512xf32>
    %c42_i32 = arith.constant 42 : i32
    %360 = vector.broadcast %c42_i32 : i32 to vector<1x512xi32>
    %361 = arith.andi %27, %360 : vector<1x512xi32>
    %c42_i32_145 = arith.constant 42 : i32
    %362 = vector.broadcast %c42_i32_145 : i32 to vector<1x512xi32>
    %363 = arith.cmpi eq, %361, %362 : vector<1x512xi32>
    %cst_146 = arith.constant 0.000000e+00 : f32
    %364 = vector.shape_cast %363 : vector<1x512xi1> to vector<1x512xi1>
    %365 = vector.broadcast %364 : vector<1x512xi1> to vector<8x512xi1>
    %366 = vector.broadcast %cst_146 : f32 to vector<8x512xf32>
    %367 = arith.select %365, %359, %366 : vector<8x512xi1>, vector<8x512xf32>
    %c26 = arith.constant 26 : index
    %c0_147 = arith.constant 0 : index
    %c0_148 = arith.constant 0 : index
    %368 = vector.load %arg2[%c26, %c0_147, %c0_148] : memref<27x8x8xf32, #tpu.memory_space<vmem>>, vector<1x8x8xf32>
    %369 = vector.shape_cast %368 : vector<1x8x8xf32> to vector<8x8xf32>
    %cst_149 = arith.constant dense<0.000000e+00> : vector<8x512xf32>
    %370 = tpu.matmul %369, %367, %cst_149 {dimension_numbers = #tpu.dot_dimension_numbers<[1], [0], [0], [1], [0, 0, 1, 1], [], []>} : vector<8x8xf32>, vector<8x512xf32>, vector<8x512xf32> -> vector<8x512xf32>
    %371 = arith.addf %358, %370 : vector<8x512xf32>
    %c0_150 = arith.constant 0 : index
    %c0_151 = arith.constant 0 : index
    %372 = vector.load %arg4[%c0_150, %c0_151] : memref<8x512xf32, #tpu.memory_space<vmem>>, vector<8x512xf32>
    tpu.vector_store %arg4[%c0_150, %c0_151], %371 {strides = array<i32>} : memref<8x512xf32, #tpu.memory_space<vmem>>, vector<8x512xf32>,
    %c0_152 = arith.constant 0 : index
    %c0_153 = arith.constant 0 : index
    %373 = vector.load %arg5[%c0_152, %c0_153] : memref<8x1xf32, #tpu.memory_space<vmem>>, vector<8x1xf32>
    %cst_154 = arith.constant dense<0.000000e+00> : vector<8xf32>
    %374 = vector.multi_reduction <add>, %371, %cst_154 [1] : vector<8x512xf32> to vector<8xf32>
    %375 = vector.shape_cast %374 : vector<8xf32> to vector<8x1xf32>
    %376 = arith.addf %373, %375 : vector<8x1xf32>
    %c0_155 = arith.constant 0 : index
    %c0_156 = arith.constant 0 : index
    %377 = vector.load %arg5[%c0_155, %c0_156] : memref<8x1xf32, #tpu.memory_space<vmem>>, vector<8x1xf32>
    tpu.vector_store %arg5[%c0_155, %c0_156], %376 {strides = array<i32>} : memref<8x1xf32, #tpu.memory_space<vmem>>, vector<8x1xf32>,
    %c0_157 = arith.constant 0 : index
    %c0_158 = arith.constant 0 : index
    %378 = vector.load %arg6[%c0_157, %c0_158] : memref<8x1xf32, #tpu.memory_space<vmem>>, vector<8x1xf32>
    %379 = arith.mulf %371, %371 : vector<8x512xf32>
    %cst_159 = arith.constant dense<0.000000e+00> : vector<8xf32>
    %380 = vector.multi_reduction <add>, %379, %cst_159 [1] : vector<8x512xf32> to vector<8xf32>
    %381 = vector.shape_cast %380 : vector<8xf32> to vector<8x1xf32>
    %382 = arith.addf %378, %381 : vector<8x1xf32>
    %c0_160 = arith.constant 0 : index
    %c0_161 = arith.constant 0 : index
    %383 = vector.load %arg6[%c0_160, %c0_161] : memref<8x1xf32, #tpu.memory_space<vmem>>, vector<8x1xf32>
    tpu.vector_store %arg6[%c0_160, %c0_161], %382 {strides = array<i32>} : memref<8x1xf32, #tpu.memory_space<vmem>>, vector<8x1xf32>,
    return
  }
  func.func @transform_1(%arg0: i32) -> (i32, i32, i32) {
    %c0_i32 = arith.constant 0 : i32
    %c0_i32_0 = arith.constant 0 : i32
    %c0_i32_1 = arith.constant 0 : i32
    %c0_i32_2 = arith.constant 0 : i32
    return %c0_i32, %c0_i32_0, %c0_i32_1 : i32, i32, i32
  }
  func.func @transform_2(%arg0: i32) -> (i32, i32) {
    %c0_i32 = arith.constant 0 : i32
    %c0_i32_0 = arith.constant 0 : i32
    return %c0_i32, %arg0 : i32, i32
  }
  func.func @transform_3(%arg0: i32) -> (i32, i32) {
    %c1_i32 = arith.constant 1 : i32
    %0 = arith.addi %arg0, %c1_i32 : i32
    %c0_i32 = arith.constant 0 : i32
    %c0_i32_0 = arith.constant 0 : i32
    return %c0_i32, %0 : i32, i32
  }
  func.func @transform_4(%arg0: i32) -> (i32, i32) {
    %c0_i32 = arith.constant 0 : i32
    %c0_i32_0 = arith.constant 0 : i32
    %c0_i32_1 = arith.constant 0 : i32
    return %c0_i32, %c0_i32_0 : i32, i32
  }
  func.func @transform_5(%arg0: i32) -> (i32, i32) {
    %c0_i32 = arith.constant 0 : i32
    %c0_i32_0 = arith.constant 0 : i32
    %c0_i32_1 = arith.constant 0 : i32
    return %c0_i32, %c0_i32_0 : i32, i32
  }
}

module attributes {stable_mosaic.version = 11 : i64} {
  func.func @kernel(%arg0: i32, %arg1: memref<8x2048xf32, #tpu.memory_space<any>>, %arg2: memref<27x8x8xf32, #tpu.memory_space<vmem>>, %arg3: memref<1x512xi32, #tpu.memory_space<vmem>>, %arg4: memref<8x1xf32, #tpu.memory_space<vmem>>, %arg5: memref<8x1xf32, #tpu.memory_space<vmem>>, %arg6: memref<8x512xf32, #tpu.memory_space<vmem>>, %arg7: memref<8x1xf32, #tpu.memory_space<vmem>>, %arg8: memref<8x1xf32, #tpu.memory_space<vmem>>, %arg9: memref<2x8x768xf32, #tpu.memory_space<vmem>>, %arg10: memref<2x!tpu.dma_semaphore, #tpu.memory_space<semaphore_mem>>) attributes {dimension_semantics = [#tpu.dimension_semantics<arbitrary>], iteration_bounds = array<i64: 2>, scalar_prefetch = 0 : i64, scratch_operands = 2 : i64, tpu.core_type = #tpu.core_type<tc>, window_params = [{}, {pipeline_mode = #tpu.pipeline_mode<synchronous>, transform_indices = @transform_1, window_bounds = array<i64: 27, 8, 8>}, {transform_indices = @transform_2, window_bounds = array<i64: 1, 512>}, {pipeline_mode = #tpu.pipeline_mode<synchronous>, transform_indices = @transform_3, window_bounds = array<i64: 8, 1>}, {pipeline_mode = #tpu.pipeline_mode<synchronous>, transform_indices = @transform_4, window_bounds = array<i64: 8, 1>}, {transform_indices = @transform_5, window_bounds = array<i64: 8, 512>}, {pipeline_mode = #tpu.pipeline_mode<synchronous>, transform_indices = @transform_6, window_bounds = array<i64: 8, 1>}, {pipeline_mode = #tpu.pipeline_mode<synchronous>, transform_indices = @transform_7, window_bounds = array<i64: 8, 1>}]} {
    %c2_i32 = arith.constant 2 : i32
    %c0_i32 = arith.constant 0 : i32
    %0 = arith.cmpi eq, %c2_i32, %c0_i32 : i32
    %c1_i32 = arith.constant 1 : i32
    %1 = arith.select %0, %c1_i32, %c2_i32 : i32
    %2 = arith.remsi %arg0, %1 : i32
    %c0_i32_0 = arith.constant 0 : i32
    %3 = arith.cmpi ne, %2, %c0_i32_0 : i32
    %c0_i32_1 = arith.constant 0 : i32
    %4 = arith.cmpi slt, %2, %c0_i32_1 : i32
    %c0_i32_2 = arith.constant 0 : i32
    %5 = arith.cmpi slt, %1, %c0_i32_2 : i32
    %6 = arith.xori %4, %5 : i1
    %7 = arith.andi %6, %3 : i1
    %8 = arith.addi %2, %1 : i32
    %9 = arith.select %7, %8, %2 : i32
    %c0_i32_3 = arith.constant 0 : i32
    %10 = arith.cmpi eq, %arg0, %c0_i32_3 : i32
    %11 = arith.extui %10 : i1 to i32
    %c0_i32_4 = arith.constant 0 : i32
    %12 = arith.cmpi ne, %11, %c0_i32_4 : i32
    scf.if %12 {
      %c512_i32_167 = arith.constant 512 : i32
      %392 = arith.muli %arg0, %c512_i32_167 : i32
      %c384_i32_168 = arith.constant 384 : i32
      %393 = arith.addi %c384_i32_168, %392 : i32
      %c0_i32_169 = arith.constant 0 : i32
      %394 = tpu.memref_slice %arg1[%c0_i32_169, %393] : memref<8x2048xf32, #tpu.memory_space<any>> -> memref<8x768xf32, #tpu.memory_space<any>>
      %c0_i32_170 = arith.constant 0 : i32
      %c0_i32_171 = arith.constant 0 : i32
      %395 = tpu.memref_slice %arg9[%9, %c0_i32_170, %c0_i32_171] : memref<2x8x768xf32, #tpu.memory_space<vmem>> -> memref<1x8x768xf32, #tpu.memory_space<vmem>>
      %396 = tpu.memref_squeeze %395 : memref<1x8x768xf32, #tpu.memory_space<vmem>> -> memref<8x768xf32, #tpu.memory_space<vmem>>
      %397 = tpu.memref_slice %arg10[%9] : memref<2x!tpu.dma_semaphore, #tpu.memory_space<semaphore_mem>> -> memref<1x!tpu.dma_semaphore, #tpu.memory_space<semaphore_mem>>
      %398 = tpu.memref_squeeze %397 : memref<1x!tpu.dma_semaphore, #tpu.memory_space<semaphore_mem>> -> memref<!tpu.dma_semaphore, #tpu.memory_space<semaphore_mem>>
      tpu.enqueue_dma source(%394 : memref<8x768xf32, #tpu.memory_space<any>>) target(%396 : memref<8x768xf32, #tpu.memory_space<vmem>>) target_semaphore(%398 : memref<!tpu.dma_semaphore, #tpu.memory_space<semaphore_mem>>)
      %cst_172 = arith.constant 0.000000e+00 : f32
      %399 = vector.broadcast %cst_172 : f32 to vector<8x1xf32>
      %c0_173 = arith.constant 0 : index
      %c0_174 = arith.constant 0 : index
      %400 = vector.load %arg7[%c0_173, %c0_174] : memref<8x1xf32, #tpu.memory_space<vmem>>, vector<8x1xf32>
      tpu.vector_store %arg7[%c0_173, %c0_174], %399 {strides = array<i32>} : memref<8x1xf32, #tpu.memory_space<vmem>>, vector<8x1xf32>,
      %cst_175 = arith.constant 0.000000e+00 : f32
      %401 = vector.broadcast %cst_175 : f32 to vector<8x1xf32>
      %c0_176 = arith.constant 0 : index
      %c0_177 = arith.constant 0 : index
      %402 = vector.load %arg8[%c0_176, %c0_177] : memref<8x1xf32, #tpu.memory_space<vmem>>, vector<8x1xf32>
      tpu.vector_store %arg8[%c0_176, %c0_177], %401 {strides = array<i32>} : memref<8x1xf32, #tpu.memory_space<vmem>>, vector<8x1xf32>,
    } else {
    }
    %c1_i32_5 = arith.constant 1 : i32
    %13 = arith.addi %arg0, %c1_i32_5 : i32
    %c2_i32_6 = arith.constant 2 : i32
    %14 = arith.cmpi slt, %13, %c2_i32_6 : i32
    %15 = arith.extui %14 : i1 to i32
    %c0_i32_7 = arith.constant 0 : i32
    %16 = arith.cmpi ne, %15, %c0_i32_7 : i32
    scf.if %16 {
      %c1_i32_167 = arith.constant 1 : i32
      %392 = arith.addi %arg0, %c1_i32_167 : i32
      %c1_i32_168 = arith.constant 1 : i32
      %393 = arith.subi %c1_i32_168, %9 : i32
      %c512_i32_169 = arith.constant 512 : i32
      %394 = arith.muli %392, %c512_i32_169 : i32
      %c384_i32_170 = arith.constant 384 : i32
      %395 = arith.addi %c384_i32_170, %394 : i32
      %c0_i32_171 = arith.constant 0 : i32
      %396 = tpu.memref_slice %arg1[%c0_i32_171, %395] : memref<8x2048xf32, #tpu.memory_space<any>> -> memref<8x768xf32, #tpu.memory_space<any>>
      %c0_i32_172 = arith.constant 0 : i32
      %c0_i32_173 = arith.constant 0 : i32
      %397 = tpu.memref_slice %arg9[%393, %c0_i32_172, %c0_i32_173] : memref<2x8x768xf32, #tpu.memory_space<vmem>> -> memref<1x8x768xf32, #tpu.memory_space<vmem>>
      %398 = tpu.memref_squeeze %397 : memref<1x8x768xf32, #tpu.memory_space<vmem>> -> memref<8x768xf32, #tpu.memory_space<vmem>>
      %399 = tpu.memref_slice %arg10[%393] : memref<2x!tpu.dma_semaphore, #tpu.memory_space<semaphore_mem>> -> memref<1x!tpu.dma_semaphore, #tpu.memory_space<semaphore_mem>>
      %400 = tpu.memref_squeeze %399 : memref<1x!tpu.dma_semaphore, #tpu.memory_space<semaphore_mem>> -> memref<!tpu.dma_semaphore, #tpu.memory_space<semaphore_mem>>
      tpu.enqueue_dma source(%396 : memref<8x768xf32, #tpu.memory_space<any>>) target(%398 : memref<8x768xf32, #tpu.memory_space<vmem>>) target_semaphore(%400 : memref<!tpu.dma_semaphore, #tpu.memory_space<semaphore_mem>>)
    } else {
    }
    %c512_i32 = arith.constant 512 : i32
    %17 = arith.muli %arg0, %c512_i32 : i32
    %c384_i32 = arith.constant 384 : i32
    %18 = arith.addi %c384_i32, %17 : i32
    %c0_i32_8 = arith.constant 0 : i32
    %19 = tpu.memref_slice %arg1[%c0_i32_8, %18] : memref<8x2048xf32, #tpu.memory_space<any>> -> memref<8x768xf32, #tpu.memory_space<any>>
    %c0_i32_9 = arith.constant 0 : i32
    %c0_i32_10 = arith.constant 0 : i32
    %20 = tpu.memref_slice %arg9[%9, %c0_i32_9, %c0_i32_10] : memref<2x8x768xf32, #tpu.memory_space<vmem>> -> memref<1x8x768xf32, #tpu.memory_space<vmem>>
    %21 = tpu.memref_squeeze %20 : memref<1x8x768xf32, #tpu.memory_space<vmem>> -> memref<8x768xf32, #tpu.memory_space<vmem>>
    %22 = tpu.memref_slice %arg10[%9] : memref<2x!tpu.dma_semaphore, #tpu.memory_space<semaphore_mem>> -> memref<1x!tpu.dma_semaphore, #tpu.memory_space<semaphore_mem>>
    %23 = tpu.memref_squeeze %22 : memref<1x!tpu.dma_semaphore, #tpu.memory_space<semaphore_mem>> -> memref<!tpu.dma_semaphore, #tpu.memory_space<semaphore_mem>>
    tpu.wait_dma2 semaphore(%23 : memref<!tpu.dma_semaphore, #tpu.memory_space<semaphore_mem>>) src(%19 : memref<8x768xf32, #tpu.memory_space<any>>) dst(%21 : memref<8x768xf32, #tpu.memory_space<vmem>>)
    %24 = arith.index_cast %9 : i32 to index
    %c0 = arith.constant 0 : index
    %c0_11 = arith.constant 0 : index
    %25 = vector.load %arg9[%24, %c0, %c0_11] : memref<2x8x768xf32, #tpu.memory_space<vmem>>, vector<1x8x768xf32>
    %26 = vector.shape_cast %25 : vector<1x8x768xf32> to vector<8x768xf32>
    %c0_12 = arith.constant 0 : index
    %c0_13 = arith.constant 0 : index
    %27 = vector.load %arg4[%c0_12, %c0_13] : memref<8x1xf32, #tpu.memory_space<vmem>>, vector<8x1xf32>
    %28 = vector.broadcast %27 : vector<8x1xf32> to vector<8x768xf32>
    %29 = arith.mulf %26, %28 : vector<8x768xf32>
    %c0_14 = arith.constant 0 : index
    %c0_15 = arith.constant 0 : index
    %30 = vector.load %arg5[%c0_14, %c0_15] : memref<8x1xf32, #tpu.memory_space<vmem>>, vector<8x1xf32>
    %31 = vector.broadcast %30 : vector<8x1xf32> to vector<8x768xf32>
    %32 = arith.addf %29, %31 : vector<8x768xf32>
    %cst = arith.constant 0.000000e+00 : f32
    %33 = vector.broadcast %cst : f32 to vector<8x768xf32>
    %34 = arith.maximumf %32, %33 : vector<8x768xf32>
    %c0_16 = arith.constant 0 : index
    %c0_17 = arith.constant 0 : index
    %35 = vector.load %arg3[%c0_16, %c0_17] : memref<1x512xi32, #tpu.memory_space<vmem>>, vector<1x512xi32>
    %cst_18 = arith.constant 0.000000e+00 : f32
    %36 = vector.broadcast %cst_18 : f32 to vector<8x512xf32>
    %37 = vector.extract_strided_slice %34 {offsets = [0, 55], sizes = [8, 512], strides = [1, 1]} : vector<8x768xf32> to vector<8x512xf32>
    %c21_i32 = arith.constant 21 : i32
    %38 = vector.broadcast %c21_i32 : i32 to vector<1x512xi32>
    %39 = arith.andi %35, %38 : vector<1x512xi32>
    %c21_i32_19 = arith.constant 21 : i32
    %40 = vector.broadcast %c21_i32_19 : i32 to vector<1x512xi32>
    %41 = arith.cmpi eq, %39, %40 : vector<1x512xi32>
    %cst_20 = arith.constant 0.000000e+00 : f32
    %42 = vector.shape_cast %41 : vector<1x512xi1> to vector<1x512xi1>
    %43 = vector.broadcast %42 : vector<1x512xi1> to vector<8x512xi1>
    %44 = vector.broadcast %cst_20 : f32 to vector<8x512xf32>
    %45 = arith.select %43, %37, %44 : vector<8x512xi1>, vector<8x512xf32>
    %c0_21 = arith.constant 0 : index
    %c0_22 = arith.constant 0 : index
    %c0_23 = arith.constant 0 : index
    %46 = vector.load %arg2[%c0_21, %c0_22, %c0_23] : memref<27x8x8xf32, #tpu.memory_space<vmem>>, vector<1x8x8xf32>
    %47 = vector.shape_cast %46 : vector<1x8x8xf32> to vector<8x8xf32>
    %cst_24 = arith.constant dense<0.000000e+00> : vector<8x512xf32>
    %48 = tpu.matmul %47, %45, %cst_24 {dimension_numbers = #tpu.dot_dimension_numbers<[1], [0], [0], [1], [0, 0, 1, 1], [], []>} : vector<8x8xf32>, vector<8x512xf32>, vector<8x512xf32> -> vector<8x512xf32>
    %49 = arith.addf %36, %48 : vector<8x512xf32>
    %50 = vector.extract_strided_slice %34 {offsets = [0, 56], sizes = [8, 512], strides = [1, 1]} : vector<8x768xf32> to vector<8x512xf32>
    %c5_i32 = arith.constant 5 : i32
    %51 = vector.broadcast %c5_i32 : i32 to vector<1x512xi32>
    %52 = arith.andi %35, %51 : vector<1x512xi32>
    %c5_i32_25 = arith.constant 5 : i32
    %53 = vector.broadcast %c5_i32_25 : i32 to vector<1x512xi32>
    %54 = arith.cmpi eq, %52, %53 : vector<1x512xi32>
    %cst_26 = arith.constant 0.000000e+00 : f32
    %55 = vector.shape_cast %54 : vector<1x512xi1> to vector<1x512xi1>
    %56 = vector.broadcast %55 : vector<1x512xi1> to vector<8x512xi1>
    %57 = vector.broadcast %cst_26 : f32 to vector<8x512xf32>
    %58 = arith.select %56, %50, %57 : vector<8x512xi1>, vector<8x512xf32>
    %c1 = arith.constant 1 : index
    %c0_27 = arith.constant 0 : index
    %c0_28 = arith.constant 0 : index
    %59 = vector.load %arg2[%c1, %c0_27, %c0_28] : memref<27x8x8xf32, #tpu.memory_space<vmem>>, vector<1x8x8xf32>
    %60 = vector.shape_cast %59 : vector<1x8x8xf32> to vector<8x8xf32>
    %cst_29 = arith.constant dense<0.000000e+00> : vector<8x512xf32>
    %61 = tpu.matmul %60, %58, %cst_29 {dimension_numbers = #tpu.dot_dimension_numbers<[1], [0], [0], [1], [0, 0, 1, 1], [], []>} : vector<8x8xf32>, vector<8x512xf32>, vector<8x512xf32> -> vector<8x512xf32>
    %62 = arith.addf %49, %61 : vector<8x512xf32>
    %63 = vector.extract_strided_slice %34 {offsets = [0, 57], sizes = [8, 512], strides = [1, 1]} : vector<8x768xf32> to vector<8x512xf32>
    %c37_i32 = arith.constant 37 : i32
    %64 = vector.broadcast %c37_i32 : i32 to vector<1x512xi32>
    %65 = arith.andi %35, %64 : vector<1x512xi32>
    %c37_i32_30 = arith.constant 37 : i32
    %66 = vector.broadcast %c37_i32_30 : i32 to vector<1x512xi32>
    %67 = arith.cmpi eq, %65, %66 : vector<1x512xi32>
    %cst_31 = arith.constant 0.000000e+00 : f32
    %68 = vector.shape_cast %67 : vector<1x512xi1> to vector<1x512xi1>
    %69 = vector.broadcast %68 : vector<1x512xi1> to vector<8x512xi1>
    %70 = vector.broadcast %cst_31 : f32 to vector<8x512xf32>
    %71 = arith.select %69, %63, %70 : vector<8x512xi1>, vector<8x512xf32>
    %c2 = arith.constant 2 : index
    %c0_32 = arith.constant 0 : index
    %c0_33 = arith.constant 0 : index
    %72 = vector.load %arg2[%c2, %c0_32, %c0_33] : memref<27x8x8xf32, #tpu.memory_space<vmem>>, vector<1x8x8xf32>
    %73 = vector.shape_cast %72 : vector<1x8x8xf32> to vector<8x8xf32>
    %cst_34 = arith.constant dense<0.000000e+00> : vector<8x512xf32>
    %74 = tpu.matmul %73, %71, %cst_34 {dimension_numbers = #tpu.dot_dimension_numbers<[1], [0], [0], [1], [0, 0, 1, 1], [], []>} : vector<8x8xf32>, vector<8x512xf32>, vector<8x512xf32> -> vector<8x512xf32>
    %75 = arith.addf %62, %74 : vector<8x512xf32>
    %76 = vector.extract_strided_slice %34 {offsets = [0, 63], sizes = [8, 512], strides = [1, 1]} : vector<8x768xf32> to vector<8x512xf32>
    %c17_i32 = arith.constant 17 : i32
    %77 = vector.broadcast %c17_i32 : i32 to vector<1x512xi32>
    %78 = arith.andi %35, %77 : vector<1x512xi32>
    %c17_i32_35 = arith.constant 17 : i32
    %79 = vector.broadcast %c17_i32_35 : i32 to vector<1x512xi32>
    %80 = arith.cmpi eq, %78, %79 : vector<1x512xi32>
    %cst_36 = arith.constant 0.000000e+00 : f32
    %81 = vector.shape_cast %80 : vector<1x512xi1> to vector<1x512xi1>
    %82 = vector.broadcast %81 : vector<1x512xi1> to vector<8x512xi1>
    %83 = vector.broadcast %cst_36 : f32 to vector<8x512xf32>
    %84 = arith.select %82, %76, %83 : vector<8x512xi1>, vector<8x512xf32>
    %c3 = arith.constant 3 : index
    %c0_37 = arith.constant 0 : index
    %c0_38 = arith.constant 0 : index
    %85 = vector.load %arg2[%c3, %c0_37, %c0_38] : memref<27x8x8xf32, #tpu.memory_space<vmem>>, vector<1x8x8xf32>
    %86 = vector.shape_cast %85 : vector<1x8x8xf32> to vector<8x8xf32>
    %cst_39 = arith.constant dense<0.000000e+00> : vector<8x512xf32>
    %87 = tpu.matmul %86, %84, %cst_39 {dimension_numbers = #tpu.dot_dimension_numbers<[1], [0], [0], [1], [0, 0, 1, 1], [], []>} : vector<8x8xf32>, vector<8x512xf32>, vector<8x512xf32> -> vector<8x512xf32>
    %88 = arith.addf %75, %87 : vector<8x512xf32>
    %89 = vector.extract_strided_slice %34 {offsets = [0, 64], sizes = [8, 512], strides = [1, 1]} : vector<8x768xf32> to vector<8x512xf32>
    %c1_i32_40 = arith.constant 1 : i32
    %90 = vector.broadcast %c1_i32_40 : i32 to vector<1x512xi32>
    %91 = arith.andi %35, %90 : vector<1x512xi32>
    %c1_i32_41 = arith.constant 1 : i32
    %92 = vector.broadcast %c1_i32_41 : i32 to vector<1x512xi32>
    %93 = arith.cmpi eq, %91, %92 : vector<1x512xi32>
    %cst_42 = arith.constant 0.000000e+00 : f32
    %94 = vector.shape_cast %93 : vector<1x512xi1> to vector<1x512xi1>
    %95 = vector.broadcast %94 : vector<1x512xi1> to vector<8x512xi1>
    %96 = vector.broadcast %cst_42 : f32 to vector<8x512xf32>
    %97 = arith.select %95, %89, %96 : vector<8x512xi1>, vector<8x512xf32>
    %c4 = arith.constant 4 : index
    %c0_43 = arith.constant 0 : index
    %c0_44 = arith.constant 0 : index
    %98 = vector.load %arg2[%c4, %c0_43, %c0_44] : memref<27x8x8xf32, #tpu.memory_space<vmem>>, vector<1x8x8xf32>
    %99 = vector.shape_cast %98 : vector<1x8x8xf32> to vector<8x8xf32>
    %cst_45 = arith.constant dense<0.000000e+00> : vector<8x512xf32>
    %100 = tpu.matmul %99, %97, %cst_45 {dimension_numbers = #tpu.dot_dimension_numbers<[1], [0], [0], [1], [0, 0, 1, 1], [], []>} : vector<8x8xf32>, vector<8x512xf32>, vector<8x512xf32> -> vector<8x512xf32>
    %101 = arith.addf %88, %100 : vector<8x512xf32>
    %102 = vector.extract_strided_slice %34 {offsets = [0, 65], sizes = [8, 512], strides = [1, 1]} : vector<8x768xf32> to vector<8x512xf32>
    %c33_i32 = arith.constant 33 : i32
    %103 = vector.broadcast %c33_i32 : i32 to vector<1x512xi32>
    %104 = arith.andi %35, %103 : vector<1x512xi32>
    %c33_i32_46 = arith.constant 33 : i32
    %105 = vector.broadcast %c33_i32_46 : i32 to vector<1x512xi32>
    %106 = arith.cmpi eq, %104, %105 : vector<1x512xi32>
    %cst_47 = arith.constant 0.000000e+00 : f32
    %107 = vector.shape_cast %106 : vector<1x512xi1> to vector<1x512xi1>
    %108 = vector.broadcast %107 : vector<1x512xi1> to vector<8x512xi1>
    %109 = vector.broadcast %cst_47 : f32 to vector<8x512xf32>
    %110 = arith.select %108, %102, %109 : vector<8x512xi1>, vector<8x512xf32>
    %c5 = arith.constant 5 : index
    %c0_48 = arith.constant 0 : index
    %c0_49 = arith.constant 0 : index
    %111 = vector.load %arg2[%c5, %c0_48, %c0_49] : memref<27x8x8xf32, #tpu.memory_space<vmem>>, vector<1x8x8xf32>
    %112 = vector.shape_cast %111 : vector<1x8x8xf32> to vector<8x8xf32>
    %cst_50 = arith.constant dense<0.000000e+00> : vector<8x512xf32>
    %113 = tpu.matmul %112, %110, %cst_50 {dimension_numbers = #tpu.dot_dimension_numbers<[1], [0], [0], [1], [0, 0, 1, 1], [], []>} : vector<8x8xf32>, vector<8x512xf32>, vector<8x512xf32> -> vector<8x512xf32>
    %114 = arith.addf %101, %113 : vector<8x512xf32>
    %115 = vector.extract_strided_slice %34 {offsets = [0, 71], sizes = [8, 512], strides = [1, 1]} : vector<8x768xf32> to vector<8x512xf32>
    %c25_i32 = arith.constant 25 : i32
    %116 = vector.broadcast %c25_i32 : i32 to vector<1x512xi32>
    %117 = arith.andi %35, %116 : vector<1x512xi32>
    %c25_i32_51 = arith.constant 25 : i32
    %118 = vector.broadcast %c25_i32_51 : i32 to vector<1x512xi32>
    %119 = arith.cmpi eq, %117, %118 : vector<1x512xi32>
    %cst_52 = arith.constant 0.000000e+00 : f32
    %120 = vector.shape_cast %119 : vector<1x512xi1> to vector<1x512xi1>
    %121 = vector.broadcast %120 : vector<1x512xi1> to vector<8x512xi1>
    %122 = vector.broadcast %cst_52 : f32 to vector<8x512xf32>
    %123 = arith.select %121, %115, %122 : vector<8x512xi1>, vector<8x512xf32>
    %c6 = arith.constant 6 : index
    %c0_53 = arith.constant 0 : index
    %c0_54 = arith.constant 0 : index
    %124 = vector.load %arg2[%c6, %c0_53, %c0_54] : memref<27x8x8xf32, #tpu.memory_space<vmem>>, vector<1x8x8xf32>
    %125 = vector.shape_cast %124 : vector<1x8x8xf32> to vector<8x8xf32>
    %cst_55 = arith.constant dense<0.000000e+00> : vector<8x512xf32>
    %126 = tpu.matmul %125, %123, %cst_55 {dimension_numbers = #tpu.dot_dimension_numbers<[1], [0], [0], [1], [0, 0, 1, 1], [], []>} : vector<8x8xf32>, vector<8x512xf32>, vector<8x512xf32> -> vector<8x512xf32>
    %127 = arith.addf %114, %126 : vector<8x512xf32>
    %128 = vector.extract_strided_slice %34 {offsets = [0, 72], sizes = [8, 512], strides = [1, 1]} : vector<8x768xf32> to vector<8x512xf32>
    %c9_i32 = arith.constant 9 : i32
    %129 = vector.broadcast %c9_i32 : i32 to vector<1x512xi32>
    %130 = arith.andi %35, %129 : vector<1x512xi32>
    %c9_i32_56 = arith.constant 9 : i32
    %131 = vector.broadcast %c9_i32_56 : i32 to vector<1x512xi32>
    %132 = arith.cmpi eq, %130, %131 : vector<1x512xi32>
    %cst_57 = arith.constant 0.000000e+00 : f32
    %133 = vector.shape_cast %132 : vector<1x512xi1> to vector<1x512xi1>
    %134 = vector.broadcast %133 : vector<1x512xi1> to vector<8x512xi1>
    %135 = vector.broadcast %cst_57 : f32 to vector<8x512xf32>
    %136 = arith.select %134, %128, %135 : vector<8x512xi1>, vector<8x512xf32>
    %c7 = arith.constant 7 : index
    %c0_58 = arith.constant 0 : index
    %c0_59 = arith.constant 0 : index
    %137 = vector.load %arg2[%c7, %c0_58, %c0_59] : memref<27x8x8xf32, #tpu.memory_space<vmem>>, vector<1x8x8xf32>
    %138 = vector.shape_cast %137 : vector<1x8x8xf32> to vector<8x8xf32>
    %cst_60 = arith.constant dense<0.000000e+00> : vector<8x512xf32>
    %139 = tpu.matmul %138, %136, %cst_60 {dimension_numbers = #tpu.dot_dimension_numbers<[1], [0], [0], [1], [0, 0, 1, 1], [], []>} : vector<8x8xf32>, vector<8x512xf32>, vector<8x512xf32> -> vector<8x512xf32>
    %140 = arith.addf %127, %139 : vector<8x512xf32>
    %141 = vector.extract_strided_slice %34 {offsets = [0, 73], sizes = [8, 512], strides = [1, 1]} : vector<8x768xf32> to vector<8x512xf32>
    %c41_i32 = arith.constant 41 : i32
    %142 = vector.broadcast %c41_i32 : i32 to vector<1x512xi32>
    %143 = arith.andi %35, %142 : vector<1x512xi32>
    %c41_i32_61 = arith.constant 41 : i32
    %144 = vector.broadcast %c41_i32_61 : i32 to vector<1x512xi32>
    %145 = arith.cmpi eq, %143, %144 : vector<1x512xi32>
    %cst_62 = arith.constant 0.000000e+00 : f32
    %146 = vector.shape_cast %145 : vector<1x512xi1> to vector<1x512xi1>
    %147 = vector.broadcast %146 : vector<1x512xi1> to vector<8x512xi1>
    %148 = vector.broadcast %cst_62 : f32 to vector<8x512xf32>
    %149 = arith.select %147, %141, %148 : vector<8x512xi1>, vector<8x512xf32>
    %c8 = arith.constant 8 : index
    %c0_63 = arith.constant 0 : index
    %c0_64 = arith.constant 0 : index
    %150 = vector.load %arg2[%c8, %c0_63, %c0_64] : memref<27x8x8xf32, #tpu.memory_space<vmem>>, vector<1x8x8xf32>
    %151 = vector.shape_cast %150 : vector<1x8x8xf32> to vector<8x8xf32>
    %cst_65 = arith.constant dense<0.000000e+00> : vector<8x512xf32>
    %152 = tpu.matmul %151, %149, %cst_65 {dimension_numbers = #tpu.dot_dimension_numbers<[1], [0], [0], [1], [0, 0, 1, 1], [], []>} : vector<8x8xf32>, vector<8x512xf32>, vector<8x512xf32> -> vector<8x512xf32>
    %153 = arith.addf %140, %152 : vector<8x512xf32>
    %154 = vector.extract_strided_slice %34 {offsets = [0, 119], sizes = [8, 512], strides = [1, 1]} : vector<8x768xf32> to vector<8x512xf32>
    %c20_i32 = arith.constant 20 : i32
    %155 = vector.broadcast %c20_i32 : i32 to vector<1x512xi32>
    %156 = arith.andi %35, %155 : vector<1x512xi32>
    %c20_i32_66 = arith.constant 20 : i32
    %157 = vector.broadcast %c20_i32_66 : i32 to vector<1x512xi32>
    %158 = arith.cmpi eq, %156, %157 : vector<1x512xi32>
    %cst_67 = arith.constant 0.000000e+00 : f32
    %159 = vector.shape_cast %158 : vector<1x512xi1> to vector<1x512xi1>
    %160 = vector.broadcast %159 : vector<1x512xi1> to vector<8x512xi1>
    %161 = vector.broadcast %cst_67 : f32 to vector<8x512xf32>
    %162 = arith.select %160, %154, %161 : vector<8x512xi1>, vector<8x512xf32>
    %c9 = arith.constant 9 : index
    %c0_68 = arith.constant 0 : index
    %c0_69 = arith.constant 0 : index
    %163 = vector.load %arg2[%c9, %c0_68, %c0_69] : memref<27x8x8xf32, #tpu.memory_space<vmem>>, vector<1x8x8xf32>
    %164 = vector.shape_cast %163 : vector<1x8x8xf32> to vector<8x8xf32>
    %cst_70 = arith.constant dense<0.000000e+00> : vector<8x512xf32>
    %165 = tpu.matmul %164, %162, %cst_70 {dimension_numbers = #tpu.dot_dimension_numbers<[1], [0], [0], [1], [0, 0, 1, 1], [], []>} : vector<8x8xf32>, vector<8x512xf32>, vector<8x512xf32> -> vector<8x512xf32>
    %166 = arith.addf %153, %165 : vector<8x512xf32>
    %167 = vector.extract_strided_slice %34 {offsets = [0, 120], sizes = [8, 512], strides = [1, 1]} : vector<8x768xf32> to vector<8x512xf32>
    %c4_i32 = arith.constant 4 : i32
    %168 = vector.broadcast %c4_i32 : i32 to vector<1x512xi32>
    %169 = arith.andi %35, %168 : vector<1x512xi32>
    %c4_i32_71 = arith.constant 4 : i32
    %170 = vector.broadcast %c4_i32_71 : i32 to vector<1x512xi32>
    %171 = arith.cmpi eq, %169, %170 : vector<1x512xi32>
    %cst_72 = arith.constant 0.000000e+00 : f32
    %172 = vector.shape_cast %171 : vector<1x512xi1> to vector<1x512xi1>
    %173 = vector.broadcast %172 : vector<1x512xi1> to vector<8x512xi1>
    %174 = vector.broadcast %cst_72 : f32 to vector<8x512xf32>
    %175 = arith.select %173, %167, %174 : vector<8x512xi1>, vector<8x512xf32>
    %c10 = arith.constant 10 : index
    %c0_73 = arith.constant 0 : index
    %c0_74 = arith.constant 0 : index
    %176 = vector.load %arg2[%c10, %c0_73, %c0_74] : memref<27x8x8xf32, #tpu.memory_space<vmem>>, vector<1x8x8xf32>
    %177 = vector.shape_cast %176 : vector<1x8x8xf32> to vector<8x8xf32>
    %cst_75 = arith.constant dense<0.000000e+00> : vector<8x512xf32>
    %178 = tpu.matmul %177, %175, %cst_75 {dimension_numbers = #tpu.dot_dimension_numbers<[1], [0], [0], [1], [0, 0, 1, 1], [], []>} : vector<8x8xf32>, vector<8x512xf32>, vector<8x512xf32> -> vector<8x512xf32>
    %179 = arith.addf %166, %178 : vector<8x512xf32>
    %180 = vector.extract_strided_slice %34 {offsets = [0, 121], sizes = [8, 512], strides = [1, 1]} : vector<8x768xf32> to vector<8x512xf32>
    %c36_i32 = arith.constant 36 : i32
    %181 = vector.broadcast %c36_i32 : i32 to vector<1x512xi32>
    %182 = arith.andi %35, %181 : vector<1x512xi32>
    %c36_i32_76 = arith.constant 36 : i32
    %183 = vector.broadcast %c36_i32_76 : i32 to vector<1x512xi32>
    %184 = arith.cmpi eq, %182, %183 : vector<1x512xi32>
    %cst_77 = arith.constant 0.000000e+00 : f32
    %185 = vector.shape_cast %184 : vector<1x512xi1> to vector<1x512xi1>
    %186 = vector.broadcast %185 : vector<1x512xi1> to vector<8x512xi1>
    %187 = vector.broadcast %cst_77 : f32 to vector<8x512xf32>
    %188 = arith.select %186, %180, %187 : vector<8x512xi1>, vector<8x512xf32>
    %c11 = arith.constant 11 : index
    %c0_78 = arith.constant 0 : index
    %c0_79 = arith.constant 0 : index
    %189 = vector.load %arg2[%c11, %c0_78, %c0_79] : memref<27x8x8xf32, #tpu.memory_space<vmem>>, vector<1x8x8xf32>
    %190 = vector.shape_cast %189 : vector<1x8x8xf32> to vector<8x8xf32>
    %cst_80 = arith.constant dense<0.000000e+00> : vector<8x512xf32>
    %191 = tpu.matmul %190, %188, %cst_80 {dimension_numbers = #tpu.dot_dimension_numbers<[1], [0], [0], [1], [0, 0, 1, 1], [], []>} : vector<8x8xf32>, vector<8x512xf32>, vector<8x512xf32> -> vector<8x512xf32>
    %192 = arith.addf %179, %191 : vector<8x512xf32>
    %193 = vector.extract_strided_slice %34 {offsets = [0, 127], sizes = [8, 512], strides = [1, 1]} : vector<8x768xf32> to vector<8x512xf32>
    %c16_i32 = arith.constant 16 : i32
    %194 = vector.broadcast %c16_i32 : i32 to vector<1x512xi32>
    %195 = arith.andi %35, %194 : vector<1x512xi32>
    %c16_i32_81 = arith.constant 16 : i32
    %196 = vector.broadcast %c16_i32_81 : i32 to vector<1x512xi32>
    %197 = arith.cmpi eq, %195, %196 : vector<1x512xi32>
    %cst_82 = arith.constant 0.000000e+00 : f32
    %198 = vector.shape_cast %197 : vector<1x512xi1> to vector<1x512xi1>
    %199 = vector.broadcast %198 : vector<1x512xi1> to vector<8x512xi1>
    %200 = vector.broadcast %cst_82 : f32 to vector<8x512xf32>
    %201 = arith.select %199, %193, %200 : vector<8x512xi1>, vector<8x512xf32>
    %c12 = arith.constant 12 : index
    %c0_83 = arith.constant 0 : index
    %c0_84 = arith.constant 0 : index
    %202 = vector.load %arg2[%c12, %c0_83, %c0_84] : memref<27x8x8xf32, #tpu.memory_space<vmem>>, vector<1x8x8xf32>
    %203 = vector.shape_cast %202 : vector<1x8x8xf32> to vector<8x8xf32>
    %cst_85 = arith.constant dense<0.000000e+00> : vector<8x512xf32>
    %204 = tpu.matmul %203, %201, %cst_85 {dimension_numbers = #tpu.dot_dimension_numbers<[1], [0], [0], [1], [0, 0, 1, 1], [], []>} : vector<8x8xf32>, vector<8x512xf32>, vector<8x512xf32> -> vector<8x512xf32>
    %205 = arith.addf %192, %204 : vector<8x512xf32>
    %206 = vector.extract_strided_slice %34 {offsets = [0, 128], sizes = [8, 512], strides = [1, 1]} : vector<8x768xf32> to vector<8x512xf32>
    %c13 = arith.constant 13 : index
    %c0_86 = arith.constant 0 : index
    %c0_87 = arith.constant 0 : index
    %207 = vector.load %arg2[%c13, %c0_86, %c0_87] : memref<27x8x8xf32, #tpu.memory_space<vmem>>, vector<1x8x8xf32>
    %208 = vector.shape_cast %207 : vector<1x8x8xf32> to vector<8x8xf32>
    %cst_88 = arith.constant dense<0.000000e+00> : vector<8x512xf32>
    %209 = tpu.matmul %208, %206, %cst_88 {dimension_numbers = #tpu.dot_dimension_numbers<[1], [0], [0], [1], [0, 0, 1, 1], [], []>} : vector<8x8xf32>, vector<8x512xf32>, vector<8x512xf32> -> vector<8x512xf32>
    %210 = arith.addf %205, %209 : vector<8x512xf32>
    %211 = vector.extract_strided_slice %34 {offsets = [0, 129], sizes = [8, 512], strides = [1, 1]} : vector<8x768xf32> to vector<8x512xf32>
    %c32_i32 = arith.constant 32 : i32
    %212 = vector.broadcast %c32_i32 : i32 to vector<1x512xi32>
    %213 = arith.andi %35, %212 : vector<1x512xi32>
    %c32_i32_89 = arith.constant 32 : i32
    %214 = vector.broadcast %c32_i32_89 : i32 to vector<1x512xi32>
    %215 = arith.cmpi eq, %213, %214 : vector<1x512xi32>
    %cst_90 = arith.constant 0.000000e+00 : f32
    %216 = vector.shape_cast %215 : vector<1x512xi1> to vector<1x512xi1>
    %217 = vector.broadcast %216 : vector<1x512xi1> to vector<8x512xi1>
    %218 = vector.broadcast %cst_90 : f32 to vector<8x512xf32>
    %219 = arith.select %217, %211, %218 : vector<8x512xi1>, vector<8x512xf32>
    %c14 = arith.constant 14 : index
    %c0_91 = arith.constant 0 : index
    %c0_92 = arith.constant 0 : index
    %220 = vector.load %arg2[%c14, %c0_91, %c0_92] : memref<27x8x8xf32, #tpu.memory_space<vmem>>, vector<1x8x8xf32>
    %221 = vector.shape_cast %220 : vector<1x8x8xf32> to vector<8x8xf32>
    %cst_93 = arith.constant dense<0.000000e+00> : vector<8x512xf32>
    %222 = tpu.matmul %221, %219, %cst_93 {dimension_numbers = #tpu.dot_dimension_numbers<[1], [0], [0], [1], [0, 0, 1, 1], [], []>} : vector<8x8xf32>, vector<8x512xf32>, vector<8x512xf32> -> vector<8x512xf32>
    %223 = arith.addf %210, %222 : vector<8x512xf32>
    %224 = vector.extract_strided_slice %34 {offsets = [0, 135], sizes = [8, 512], strides = [1, 1]} : vector<8x768xf32> to vector<8x512xf32>
    %c24_i32 = arith.constant 24 : i32
    %225 = vector.broadcast %c24_i32 : i32 to vector<1x512xi32>
    %226 = arith.andi %35, %225 : vector<1x512xi32>
    %c24_i32_94 = arith.constant 24 : i32
    %227 = vector.broadcast %c24_i32_94 : i32 to vector<1x512xi32>
    %228 = arith.cmpi eq, %226, %227 : vector<1x512xi32>
    %cst_95 = arith.constant 0.000000e+00 : f32
    %229 = vector.shape_cast %228 : vector<1x512xi1> to vector<1x512xi1>
    %230 = vector.broadcast %229 : vector<1x512xi1> to vector<8x512xi1>
    %231 = vector.broadcast %cst_95 : f32 to vector<8x512xf32>
    %232 = arith.select %230, %224, %231 : vector<8x512xi1>, vector<8x512xf32>
    %c15 = arith.constant 15 : index
    %c0_96 = arith.constant 0 : index
    %c0_97 = arith.constant 0 : index
    %233 = vector.load %arg2[%c15, %c0_96, %c0_97] : memref<27x8x8xf32, #tpu.memory_space<vmem>>, vector<1x8x8xf32>
    %234 = vector.shape_cast %233 : vector<1x8x8xf32> to vector<8x8xf32>
    %cst_98 = arith.constant dense<0.000000e+00> : vector<8x512xf32>
    %235 = tpu.matmul %234, %232, %cst_98 {dimension_numbers = #tpu.dot_dimension_numbers<[1], [0], [0], [1], [0, 0, 1, 1], [], []>} : vector<8x8xf32>, vector<8x512xf32>, vector<8x512xf32> -> vector<8x512xf32>
    %236 = arith.addf %223, %235 : vector<8x512xf32>
    %237 = vector.extract_strided_slice %34 {offsets = [0, 136], sizes = [8, 512], strides = [1, 1]} : vector<8x768xf32> to vector<8x512xf32>
    %c8_i32 = arith.constant 8 : i32
    %238 = vector.broadcast %c8_i32 : i32 to vector<1x512xi32>
    %239 = arith.andi %35, %238 : vector<1x512xi32>
    %c8_i32_99 = arith.constant 8 : i32
    %240 = vector.broadcast %c8_i32_99 : i32 to vector<1x512xi32>
    %241 = arith.cmpi eq, %239, %240 : vector<1x512xi32>
    %cst_100 = arith.constant 0.000000e+00 : f32
    %242 = vector.shape_cast %241 : vector<1x512xi1> to vector<1x512xi1>
    %243 = vector.broadcast %242 : vector<1x512xi1> to vector<8x512xi1>
    %244 = vector.broadcast %cst_100 : f32 to vector<8x512xf32>
    %245 = arith.select %243, %237, %244 : vector<8x512xi1>, vector<8x512xf32>
    %c16 = arith.constant 16 : index
    %c0_101 = arith.constant 0 : index
    %c0_102 = arith.constant 0 : index
    %246 = vector.load %arg2[%c16, %c0_101, %c0_102] : memref<27x8x8xf32, #tpu.memory_space<vmem>>, vector<1x8x8xf32>
    %247 = vector.shape_cast %246 : vector<1x8x8xf32> to vector<8x8xf32>
    %cst_103 = arith.constant dense<0.000000e+00> : vector<8x512xf32>
    %248 = tpu.matmul %247, %245, %cst_103 {dimension_numbers = #tpu.dot_dimension_numbers<[1], [0], [0], [1], [0, 0, 1, 1], [], []>} : vector<8x8xf32>, vector<8x512xf32>, vector<8x512xf32> -> vector<8x512xf32>
    %249 = arith.addf %236, %248 : vector<8x512xf32>
    %250 = vector.extract_strided_slice %34 {offsets = [0, 137], sizes = [8, 512], strides = [1, 1]} : vector<8x768xf32> to vector<8x512xf32>
    %c40_i32 = arith.constant 40 : i32
    %251 = vector.broadcast %c40_i32 : i32 to vector<1x512xi32>
    %252 = arith.andi %35, %251 : vector<1x512xi32>
    %c40_i32_104 = arith.constant 40 : i32
    %253 = vector.broadcast %c40_i32_104 : i32 to vector<1x512xi32>
    %254 = arith.cmpi eq, %252, %253 : vector<1x512xi32>
    %cst_105 = arith.constant 0.000000e+00 : f32
    %255 = vector.shape_cast %254 : vector<1x512xi1> to vector<1x512xi1>
    %256 = vector.broadcast %255 : vector<1x512xi1> to vector<8x512xi1>
    %257 = vector.broadcast %cst_105 : f32 to vector<8x512xf32>
    %258 = arith.select %256, %250, %257 : vector<8x512xi1>, vector<8x512xf32>
    %c17 = arith.constant 17 : index
    %c0_106 = arith.constant 0 : index
    %c0_107 = arith.constant 0 : index
    %259 = vector.load %arg2[%c17, %c0_106, %c0_107] : memref<27x8x8xf32, #tpu.memory_space<vmem>>, vector<1x8x8xf32>
    %260 = vector.shape_cast %259 : vector<1x8x8xf32> to vector<8x8xf32>
    %cst_108 = arith.constant dense<0.000000e+00> : vector<8x512xf32>
    %261 = tpu.matmul %260, %258, %cst_108 {dimension_numbers = #tpu.dot_dimension_numbers<[1], [0], [0], [1], [0, 0, 1, 1], [], []>} : vector<8x8xf32>, vector<8x512xf32>, vector<8x512xf32> -> vector<8x512xf32>
    %262 = arith.addf %249, %261 : vector<8x512xf32>
    %263 = vector.extract_strided_slice %34 {offsets = [0, 183], sizes = [8, 512], strides = [1, 1]} : vector<8x768xf32> to vector<8x512xf32>
    %c22_i32 = arith.constant 22 : i32
    %264 = vector.broadcast %c22_i32 : i32 to vector<1x512xi32>
    %265 = arith.andi %35, %264 : vector<1x512xi32>
    %c22_i32_109 = arith.constant 22 : i32
    %266 = vector.broadcast %c22_i32_109 : i32 to vector<1x512xi32>
    %267 = arith.cmpi eq, %265, %266 : vector<1x512xi32>
    %cst_110 = arith.constant 0.000000e+00 : f32
    %268 = vector.shape_cast %267 : vector<1x512xi1> to vector<1x512xi1>
    %269 = vector.broadcast %268 : vector<1x512xi1> to vector<8x512xi1>
    %270 = vector.broadcast %cst_110 : f32 to vector<8x512xf32>
    %271 = arith.select %269, %263, %270 : vector<8x512xi1>, vector<8x512xf32>
    %c18 = arith.constant 18 : index
    %c0_111 = arith.constant 0 : index
    %c0_112 = arith.constant 0 : index
    %272 = vector.load %arg2[%c18, %c0_111, %c0_112] : memref<27x8x8xf32, #tpu.memory_space<vmem>>, vector<1x8x8xf32>
    %273 = vector.shape_cast %272 : vector<1x8x8xf32> to vector<8x8xf32>
    %cst_113 = arith.constant dense<0.000000e+00> : vector<8x512xf32>
    %274 = tpu.matmul %273, %271, %cst_113 {dimension_numbers = #tpu.dot_dimension_numbers<[1], [0], [0], [1], [0, 0, 1, 1], [], []>} : vector<8x8xf32>, vector<8x512xf32>, vector<8x512xf32> -> vector<8x512xf32>
    %275 = arith.addf %262, %274 : vector<8x512xf32>
    %276 = vector.extract_strided_slice %34 {offsets = [0, 184], sizes = [8, 512], strides = [1, 1]} : vector<8x768xf32> to vector<8x512xf32>
    %c6_i32 = arith.constant 6 : i32
    %277 = vector.broadcast %c6_i32 : i32 to vector<1x512xi32>
    %278 = arith.andi %35, %277 : vector<1x512xi32>
    %c6_i32_114 = arith.constant 6 : i32
    %279 = vector.broadcast %c6_i32_114 : i32 to vector<1x512xi32>
    %280 = arith.cmpi eq, %278, %279 : vector<1x512xi32>
    %cst_115 = arith.constant 0.000000e+00 : f32
    %281 = vector.shape_cast %280 : vector<1x512xi1> to vector<1x512xi1>
    %282 = vector.broadcast %281 : vector<1x512xi1> to vector<8x512xi1>
    %283 = vector.broadcast %cst_115 : f32 to vector<8x512xf32>
    %284 = arith.select %282, %276, %283 : vector<8x512xi1>, vector<8x512xf32>
    %c19 = arith.constant 19 : index
    %c0_116 = arith.constant 0 : index
    %c0_117 = arith.constant 0 : index
    %285 = vector.load %arg2[%c19, %c0_116, %c0_117] : memref<27x8x8xf32, #tpu.memory_space<vmem>>, vector<1x8x8xf32>
    %286 = vector.shape_cast %285 : vector<1x8x8xf32> to vector<8x8xf32>
    %cst_118 = arith.constant dense<0.000000e+00> : vector<8x512xf32>
    %287 = tpu.matmul %286, %284, %cst_118 {dimension_numbers = #tpu.dot_dimension_numbers<[1], [0], [0], [1], [0, 0, 1, 1], [], []>} : vector<8x8xf32>, vector<8x512xf32>, vector<8x512xf32> -> vector<8x512xf32>
    %288 = arith.addf %275, %287 : vector<8x512xf32>
    %289 = vector.extract_strided_slice %34 {offsets = [0, 185], sizes = [8, 512], strides = [1, 1]} : vector<8x768xf32> to vector<8x512xf32>
    %c38_i32 = arith.constant 38 : i32
    %290 = vector.broadcast %c38_i32 : i32 to vector<1x512xi32>
    %291 = arith.andi %35, %290 : vector<1x512xi32>
    %c38_i32_119 = arith.constant 38 : i32
    %292 = vector.broadcast %c38_i32_119 : i32 to vector<1x512xi32>
    %293 = arith.cmpi eq, %291, %292 : vector<1x512xi32>
    %cst_120 = arith.constant 0.000000e+00 : f32
    %294 = vector.shape_cast %293 : vector<1x512xi1> to vector<1x512xi1>
    %295 = vector.broadcast %294 : vector<1x512xi1> to vector<8x512xi1>
    %296 = vector.broadcast %cst_120 : f32 to vector<8x512xf32>
    %297 = arith.select %295, %289, %296 : vector<8x512xi1>, vector<8x512xf32>
    %c20 = arith.constant 20 : index
    %c0_121 = arith.constant 0 : index
    %c0_122 = arith.constant 0 : index
    %298 = vector.load %arg2[%c20, %c0_121, %c0_122] : memref<27x8x8xf32, #tpu.memory_space<vmem>>, vector<1x8x8xf32>
    %299 = vector.shape_cast %298 : vector<1x8x8xf32> to vector<8x8xf32>
    %cst_123 = arith.constant dense<0.000000e+00> : vector<8x512xf32>
    %300 = tpu.matmul %299, %297, %cst_123 {dimension_numbers = #tpu.dot_dimension_numbers<[1], [0], [0], [1], [0, 0, 1, 1], [], []>} : vector<8x8xf32>, vector<8x512xf32>, vector<8x512xf32> -> vector<8x512xf32>
    %301 = arith.addf %288, %300 : vector<8x512xf32>
    %302 = vector.extract_strided_slice %34 {offsets = [0, 191], sizes = [8, 512], strides = [1, 1]} : vector<8x768xf32> to vector<8x512xf32>
    %c18_i32 = arith.constant 18 : i32
    %303 = vector.broadcast %c18_i32 : i32 to vector<1x512xi32>
    %304 = arith.andi %35, %303 : vector<1x512xi32>
    %c18_i32_124 = arith.constant 18 : i32
    %305 = vector.broadcast %c18_i32_124 : i32 to vector<1x512xi32>
    %306 = arith.cmpi eq, %304, %305 : vector<1x512xi32>
    %cst_125 = arith.constant 0.000000e+00 : f32
    %307 = vector.shape_cast %306 : vector<1x512xi1> to vector<1x512xi1>
    %308 = vector.broadcast %307 : vector<1x512xi1> to vector<8x512xi1>
    %309 = vector.broadcast %cst_125 : f32 to vector<8x512xf32>
    %310 = arith.select %308, %302, %309 : vector<8x512xi1>, vector<8x512xf32>
    %c21 = arith.constant 21 : index
    %c0_126 = arith.constant 0 : index
    %c0_127 = arith.constant 0 : index
    %311 = vector.load %arg2[%c21, %c0_126, %c0_127] : memref<27x8x8xf32, #tpu.memory_space<vmem>>, vector<1x8x8xf32>
    %312 = vector.shape_cast %311 : vector<1x8x8xf32> to vector<8x8xf32>
    %cst_128 = arith.constant dense<0.000000e+00> : vector<8x512xf32>
    %313 = tpu.matmul %312, %310, %cst_128 {dimension_numbers = #tpu.dot_dimension_numbers<[1], [0], [0], [1], [0, 0, 1, 1], [], []>} : vector<8x8xf32>, vector<8x512xf32>, vector<8x512xf32> -> vector<8x512xf32>
    %314 = arith.addf %301, %313 : vector<8x512xf32>
    %315 = vector.extract_strided_slice %34 {offsets = [0, 192], sizes = [8, 512], strides = [1, 1]} : vector<8x768xf32> to vector<8x512xf32>
    %c2_i32_129 = arith.constant 2 : i32
    %316 = vector.broadcast %c2_i32_129 : i32 to vector<1x512xi32>
    %317 = arith.andi %35, %316 : vector<1x512xi32>
    %c2_i32_130 = arith.constant 2 : i32
    %318 = vector.broadcast %c2_i32_130 : i32 to vector<1x512xi32>
    %319 = arith.cmpi eq, %317, %318 : vector<1x512xi32>
    %cst_131 = arith.constant 0.000000e+00 : f32
    %320 = vector.shape_cast %319 : vector<1x512xi1> to vector<1x512xi1>
    %321 = vector.broadcast %320 : vector<1x512xi1> to vector<8x512xi1>
    %322 = vector.broadcast %cst_131 : f32 to vector<8x512xf32>
    %323 = arith.select %321, %315, %322 : vector<8x512xi1>, vector<8x512xf32>
    %c22 = arith.constant 22 : index
    %c0_132 = arith.constant 0 : index
    %c0_133 = arith.constant 0 : index
    %324 = vector.load %arg2[%c22, %c0_132, %c0_133] : memref<27x8x8xf32, #tpu.memory_space<vmem>>, vector<1x8x8xf32>
    %325 = vector.shape_cast %324 : vector<1x8x8xf32> to vector<8x8xf32>
    %cst_134 = arith.constant dense<0.000000e+00> : vector<8x512xf32>
    %326 = tpu.matmul %325, %323, %cst_134 {dimension_numbers = #tpu.dot_dimension_numbers<[1], [0], [0], [1], [0, 0, 1, 1], [], []>} : vector<8x8xf32>, vector<8x512xf32>, vector<8x512xf32> -> vector<8x512xf32>
    %327 = arith.addf %314, %326 : vector<8x512xf32>
    %328 = vector.extract_strided_slice %34 {offsets = [0, 193], sizes = [8, 512], strides = [1, 1]} : vector<8x768xf32> to vector<8x512xf32>
    %c34_i32 = arith.constant 34 : i32
    %329 = vector.broadcast %c34_i32 : i32 to vector<1x512xi32>
    %330 = arith.andi %35, %329 : vector<1x512xi32>
    %c34_i32_135 = arith.constant 34 : i32
    %331 = vector.broadcast %c34_i32_135 : i32 to vector<1x512xi32>
    %332 = arith.cmpi eq, %330, %331 : vector<1x512xi32>
    %cst_136 = arith.constant 0.000000e+00 : f32
    %333 = vector.shape_cast %332 : vector<1x512xi1> to vector<1x512xi1>
    %334 = vector.broadcast %333 : vector<1x512xi1> to vector<8x512xi1>
    %335 = vector.broadcast %cst_136 : f32 to vector<8x512xf32>
    %336 = arith.select %334, %328, %335 : vector<8x512xi1>, vector<8x512xf32>
    %c23 = arith.constant 23 : index
    %c0_137 = arith.constant 0 : index
    %c0_138 = arith.constant 0 : index
    %337 = vector.load %arg2[%c23, %c0_137, %c0_138] : memref<27x8x8xf32, #tpu.memory_space<vmem>>, vector<1x8x8xf32>
    %338 = vector.shape_cast %337 : vector<1x8x8xf32> to vector<8x8xf32>
    %cst_139 = arith.constant dense<0.000000e+00> : vector<8x512xf32>
    %339 = tpu.matmul %338, %336, %cst_139 {dimension_numbers = #tpu.dot_dimension_numbers<[1], [0], [0], [1], [0, 0, 1, 1], [], []>} : vector<8x8xf32>, vector<8x512xf32>, vector<8x512xf32> -> vector<8x512xf32>
    %340 = arith.addf %327, %339 : vector<8x512xf32>
    %341 = vector.extract_strided_slice %34 {offsets = [0, 199], sizes = [8, 512], strides = [1, 1]} : vector<8x768xf32> to vector<8x512xf32>
    %c26_i32 = arith.constant 26 : i32
    %342 = vector.broadcast %c26_i32 : i32 to vector<1x512xi32>
    %343 = arith.andi %35, %342 : vector<1x512xi32>
    %c26_i32_140 = arith.constant 26 : i32
    %344 = vector.broadcast %c26_i32_140 : i32 to vector<1x512xi32>
    %345 = arith.cmpi eq, %343, %344 : vector<1x512xi32>
    %cst_141 = arith.constant 0.000000e+00 : f32
    %346 = vector.shape_cast %345 : vector<1x512xi1> to vector<1x512xi1>
    %347 = vector.broadcast %346 : vector<1x512xi1> to vector<8x512xi1>
    %348 = vector.broadcast %cst_141 : f32 to vector<8x512xf32>
    %349 = arith.select %347, %341, %348 : vector<8x512xi1>, vector<8x512xf32>
    %c24 = arith.constant 24 : index
    %c0_142 = arith.constant 0 : index
    %c0_143 = arith.constant 0 : index
    %350 = vector.load %arg2[%c24, %c0_142, %c0_143] : memref<27x8x8xf32, #tpu.memory_space<vmem>>, vector<1x8x8xf32>
    %351 = vector.shape_cast %350 : vector<1x8x8xf32> to vector<8x8xf32>
    %cst_144 = arith.constant dense<0.000000e+00> : vector<8x512xf32>
    %352 = tpu.matmul %351, %349, %cst_144 {dimension_numbers = #tpu.dot_dimension_numbers<[1], [0], [0], [1], [0, 0, 1, 1], [], []>} : vector<8x8xf32>, vector<8x512xf32>, vector<8x512xf32> -> vector<8x512xf32>
    %353 = arith.addf %340, %352 : vector<8x512xf32>
    %354 = vector.extract_strided_slice %34 {offsets = [0, 200], sizes = [8, 512], strides = [1, 1]} : vector<8x768xf32> to vector<8x512xf32>
    %c10_i32 = arith.constant 10 : i32
    %355 = vector.broadcast %c10_i32 : i32 to vector<1x512xi32>
    %356 = arith.andi %35, %355 : vector<1x512xi32>
    %c10_i32_145 = arith.constant 10 : i32
    %357 = vector.broadcast %c10_i32_145 : i32 to vector<1x512xi32>
    %358 = arith.cmpi eq, %356, %357 : vector<1x512xi32>
    %cst_146 = arith.constant 0.000000e+00 : f32
    %359 = vector.shape_cast %358 : vector<1x512xi1> to vector<1x512xi1>
    %360 = vector.broadcast %359 : vector<1x512xi1> to vector<8x512xi1>
    %361 = vector.broadcast %cst_146 : f32 to vector<8x512xf32>
    %362 = arith.select %360, %354, %361 : vector<8x512xi1>, vector<8x512xf32>
    %c25 = arith.constant 25 : index
    %c0_147 = arith.constant 0 : index
    %c0_148 = arith.constant 0 : index
    %363 = vector.load %arg2[%c25, %c0_147, %c0_148] : memref<27x8x8xf32, #tpu.memory_space<vmem>>, vector<1x8x8xf32>
    %364 = vector.shape_cast %363 : vector<1x8x8xf32> to vector<8x8xf32>
    %cst_149 = arith.constant dense<0.000000e+00> : vector<8x512xf32>
    %365 = tpu.matmul %364, %362, %cst_149 {dimension_numbers = #tpu.dot_dimension_numbers<[1], [0], [0], [1], [0, 0, 1, 1], [], []>} : vector<8x8xf32>, vector<8x512xf32>, vector<8x512xf32> -> vector<8x512xf32>
    %366 = arith.addf %353, %365 : vector<8x512xf32>
    %367 = vector.extract_strided_slice %34 {offsets = [0, 201], sizes = [8, 512], strides = [1, 1]} : vector<8x768xf32> to vector<8x512xf32>
    %c42_i32 = arith.constant 42 : i32
    %368 = vector.broadcast %c42_i32 : i32 to vector<1x512xi32>
    %369 = arith.andi %35, %368 : vector<1x512xi32>
    %c42_i32_150 = arith.constant 42 : i32
    %370 = vector.broadcast %c42_i32_150 : i32 to vector<1x512xi32>
    %371 = arith.cmpi eq, %369, %370 : vector<1x512xi32>
    %cst_151 = arith.constant 0.000000e+00 : f32
    %372 = vector.shape_cast %371 : vector<1x512xi1> to vector<1x512xi1>
    %373 = vector.broadcast %372 : vector<1x512xi1> to vector<8x512xi1>
    %374 = vector.broadcast %cst_151 : f32 to vector<8x512xf32>
    %375 = arith.select %373, %367, %374 : vector<8x512xi1>, vector<8x512xf32>
    %c26 = arith.constant 26 : index
    %c0_152 = arith.constant 0 : index
    %c0_153 = arith.constant 0 : index
    %376 = vector.load %arg2[%c26, %c0_152, %c0_153] : memref<27x8x8xf32, #tpu.memory_space<vmem>>, vector<1x8x8xf32>
    %377 = vector.shape_cast %376 : vector<1x8x8xf32> to vector<8x8xf32>
    %cst_154 = arith.constant dense<0.000000e+00> : vector<8x512xf32>
    %378 = tpu.matmul %377, %375, %cst_154 {dimension_numbers = #tpu.dot_dimension_numbers<[1], [0], [0], [1], [0, 0, 1, 1], [], []>} : vector<8x8xf32>, vector<8x512xf32>, vector<8x512xf32> -> vector<8x512xf32>
    %379 = arith.addf %366, %378 : vector<8x512xf32>
    %c0_155 = arith.constant 0 : index
    %c0_156 = arith.constant 0 : index
    %380 = vector.load %arg6[%c0_155, %c0_156] : memref<8x512xf32, #tpu.memory_space<vmem>>, vector<8x512xf32>
    tpu.vector_store %arg6[%c0_155, %c0_156], %379 {strides = array<i32>} : memref<8x512xf32, #tpu.memory_space<vmem>>, vector<8x512xf32>,
    %c0_157 = arith.constant 0 : index
    %c0_158 = arith.constant 0 : index
    %381 = vector.load %arg7[%c0_157, %c0_158] : memref<8x1xf32, #tpu.memory_space<vmem>>, vector<8x1xf32>
    %cst_159 = arith.constant dense<0.000000e+00> : vector<8xf32>
    %382 = vector.multi_reduction <add>, %379, %cst_159 [1] : vector<8x512xf32> to vector<8xf32>
    %383 = vector.shape_cast %382 : vector<8xf32> to vector<8x1xf32>
    %384 = arith.addf %381, %383 : vector<8x1xf32>
    %c0_160 = arith.constant 0 : index
    %c0_161 = arith.constant 0 : index
    %385 = vector.load %arg7[%c0_160, %c0_161] : memref<8x1xf32, #tpu.memory_space<vmem>>, vector<8x1xf32>
    tpu.vector_store %arg7[%c0_160, %c0_161], %384 {strides = array<i32>} : memref<8x1xf32, #tpu.memory_space<vmem>>, vector<8x1xf32>,
    %c0_162 = arith.constant 0 : index
    %c0_163 = arith.constant 0 : index
    %386 = vector.load %arg8[%c0_162, %c0_163] : memref<8x1xf32, #tpu.memory_space<vmem>>, vector<8x1xf32>
    %387 = arith.mulf %379, %379 : vector<8x512xf32>
    %cst_164 = arith.constant dense<0.000000e+00> : vector<8xf32>
    %388 = vector.multi_reduction <add>, %387, %cst_164 [1] : vector<8x512xf32> to vector<8xf32>
    %389 = vector.shape_cast %388 : vector<8xf32> to vector<8x1xf32>
    %390 = arith.addf %386, %389 : vector<8x1xf32>
    %c0_165 = arith.constant 0 : index
    %c0_166 = arith.constant 0 : index
    %391 = vector.load %arg8[%c0_165, %c0_166] : memref<8x1xf32, #tpu.memory_space<vmem>>, vector<8x1xf32>
    tpu.vector_store %arg8[%c0_165, %c0_166], %390 {strides = array<i32>} : memref<8x1xf32, #tpu.memory_space<vmem>>, vector<8x1xf32>,
    return
  }
  func.func @transform_1(%arg0: i32) -> (i32, i32, i32) {
    %c0_i32 = arith.constant 0 : i32
    %c0_i32_0 = arith.constant 0 : i32
    %c0_i32_1 = arith.constant 0 : i32
    %c0_i32_2 = arith.constant 0 : i32
    return %c0_i32, %c0_i32_0, %c0_i32_1 : i32, i32, i32
  }
  func.func @transform_2(%arg0: i32) -> (i32, i32) {
    %c0_i32 = arith.constant 0 : i32
    %c0_i32_0 = arith.constant 0 : i32
    return %c0_i32, %arg0 : i32, i32
  }
  func.func @transform_3(%arg0: i32) -> (i32, i32) {
    %c0_i32 = arith.constant 0 : i32
    %c0_i32_0 = arith.constant 0 : i32
    %c0_i32_1 = arith.constant 0 : i32
    return %c0_i32, %c0_i32_0 : i32, i32
  }
  func.func @transform_4(%arg0: i32) -> (i32, i32) {
    %c0_i32 = arith.constant 0 : i32
    %c0_i32_0 = arith.constant 0 : i32
    %c0_i32_1 = arith.constant 0 : i32
    return %c0_i32, %c0_i32_0 : i32, i32
  }
  func.func @transform_5(%arg0: i32) -> (i32, i32) {
    %c0_i32 = arith.constant 0 : i32
    %c0_i32_0 = arith.constant 0 : i32
    return %c0_i32, %arg0 : i32, i32
  }
  func.func @transform_6(%arg0: i32) -> (i32, i32) {
    %c0_i32 = arith.constant 0 : i32
    %c0_i32_0 = arith.constant 0 : i32
    %c0_i32_1 = arith.constant 0 : i32
    return %c0_i32, %c0_i32_0 : i32, i32
  }
  func.func @transform_7(%arg0: i32) -> (i32, i32) {
    %c0_i32 = arith.constant 0 : i32
    %c0_i32_0 = arith.constant 0 : i32
    %c0_i32_1 = arith.constant 0 : i32
    return %c0_i32, %c0_i32_0 : i32, i32
  }
}

module attributes {stable_mosaic.version = 11 : i64} {
  func.func @kernel(%arg0: i32, %arg1: memref<8x512xf32, #tpu.memory_space<vmem>>, %arg2: memref<4x512xf32, #tpu.memory_space<vmem>>, %arg3: memref<4x1xf32, #tpu.memory_space<vmem>>, %arg4: memref<4x1xf32, #tpu.memory_space<vmem>>, %arg5: memref<4x512xf32, #tpu.memory_space<vmem>>) attributes {dimension_semantics = [#tpu.dimension_semantics<parallel>], iteration_bounds = array<i64: 2>, scalar_prefetch = 0 : i64, scratch_operands = 0 : i64, tpu.core_type = #tpu.core_type<tc>, window_params = [{transform_indices = @transform_0, window_bounds = array<i64: 8, 512>}, {transform_indices = @transform_1, window_bounds = array<i64: 4, 512>}, {pipeline_mode = #tpu.pipeline_mode<synchronous>, transform_indices = @transform_2, window_bounds = array<i64: 4, 1>}, {pipeline_mode = #tpu.pipeline_mode<synchronous>, transform_indices = @transform_3, window_bounds = array<i64: 4, 1>}, {transform_indices = @transform_4, window_bounds = array<i64: 4, 512>}]} {
    %c0 = arith.constant 0 : index
    %c0_0 = arith.constant 0 : index
    %0 = vector.load %arg1[%c0, %c0_0] : memref<8x512xf32, #tpu.memory_space<vmem>>, vector<4x512xf32>
    %c0_1 = arith.constant 0 : index
    %c0_2 = arith.constant 0 : index
    %1 = vector.load %arg3[%c0_1, %c0_2] : memref<4x1xf32, #tpu.memory_space<vmem>>, vector<4x1xf32>
    %2 = vector.broadcast %1 : vector<4x1xf32> to vector<4x512xf32>
    %3 = arith.mulf %0, %2 : vector<4x512xf32>
    %c0_3 = arith.constant 0 : index
    %c0_4 = arith.constant 0 : index
    %4 = vector.load %arg4[%c0_3, %c0_4] : memref<4x1xf32, #tpu.memory_space<vmem>>, vector<4x1xf32>
    %5 = vector.broadcast %4 : vector<4x1xf32> to vector<4x512xf32>
    %6 = arith.addf %3, %5 : vector<4x512xf32>
    %c0_5 = arith.constant 0 : index
    %c0_6 = arith.constant 0 : index
    %7 = vector.load %arg2[%c0_5, %c0_6] : memref<4x512xf32, #tpu.memory_space<vmem>>, vector<4x512xf32>
    %8 = arith.addf %6, %7 : vector<4x512xf32>
    %c0_7 = arith.constant 0 : index
    %c0_8 = arith.constant 0 : index
    %9 = vector.load %arg5[%c0_7, %c0_8] : memref<4x512xf32, #tpu.memory_space<vmem>>, vector<4x512xf32>
    tpu.vector_store %arg5[%c0_7, %c0_8], %8 {strides = array<i32>} : memref<4x512xf32, #tpu.memory_space<vmem>>, vector<4x512xf32>,
    return
  }
  func.func @transform_0(%arg0: i32) -> (i32, i32) {
    %c0_i32 = arith.constant 0 : i32
    %c0_i32_0 = arith.constant 0 : i32
    return %c0_i32, %arg0 : i32, i32
  }
  func.func @transform_1(%arg0: i32) -> (i32, i32) {
    %c0_i32 = arith.constant 0 : i32
    %c0_i32_0 = arith.constant 0 : i32
    return %c0_i32, %arg0 : i32, i32
  }
  func.func @transform_2(%arg0: i32) -> (i32, i32) {
    %c0_i32 = arith.constant 0 : i32
    %c0_i32_0 = arith.constant 0 : i32
    %c0_i32_1 = arith.constant 0 : i32
    return %c0_i32, %c0_i32_0 : i32, i32
  }
  func.func @transform_3(%arg0: i32) -> (i32, i32) {
    %c0_i32 = arith.constant 0 : i32
    %c0_i32_0 = arith.constant 0 : i32
    %c0_i32_1 = arith.constant 0 : i32
    return %c0_i32, %c0_i32_0 : i32, i32
  }
  func.func @transform_4(%arg0: i32) -> (i32, i32) {
    %c0_i32 = arith.constant 0 : i32
    %c0_i32_0 = arith.constant 0 : i32
    return %c0_i32, %arg0 : i32, i32
  }
}

</mosaic_0001>

<bundles_post_ra>
// kernel: resblock_pallas.5
= control target key start
LH: loop header
LB: loop body
LE: loop exit
PB: predicated region body
PF: predicated region fallthrough
CT: control target
= control target key end

     0   :  { %s396_s15 = smov 0   ;;  %s422_s0 = inlined_call_operand.vmem [shape: f32[8,1024], index: 0, kind: input, shape index: {}]   ;;  %s423_s1 = inlined_call_operand.vmem [shape: f32[4,1024], index: 1, kind: input, shape index: {}]   ;;  %s424_s2 = inlined_call_operand.vmem [shape: f32[4,1], index: 2, kind: input, shape index: {}]   ;;  %s425_s3 = inlined_call_operand.vmem [shape: f32[4,1], index: 3, kind: input, shape index: {}]   ;;  %s426_s4 = inlined_call_operand.vmem [shape: f32[4,1024], index: 4, kind: output, shape index: {}]  }
   0x1 LB: > { %s337_s16 = sadd.s32 4294967295, %s368_s15   ;;  %p341_p0 = scmp.ge.s32.totalorder %s368_s15, 1  ;;  %s368_s15 = sphi %s396_s15, %s14_s15  }
   0x2   : > { %p174_p1 = scmp.lt.s32.totalorder %s368_s15, 3 }
   0x4   : > { %p175_p2 = pnand %p341_p0, %p174_p1 }
   0x5   : > { %s342_s21 = sshll.u32 (!%p175_p2), %s337_s16, 2 }
   0x6   : > { %178 = sbr.rel (%p175_p2) target bundleno = 148 (0x94), region = 36  ;;  %p206_p3 = scmp.lt.s32.totalorder (!%p175_p2), %s342_s21, 7 }
   0xb   : > { %v227_v0 = vld [vmem:[%s424_s2] sm:$0xf]  ;;  %v370_v1 = vmov 0   ;;  %s428_s21 = smov (!%p206_p3, %s342_s21), 7 }
   0xc   : > { %359 = vset.pattern.permute.xlu0 %v370_v1  ;;  %v237_v2 = vld [vmem:[%s425_s3] sm:$0xf]  ;;  %s343_s22 = sshll.u32 %s428_s21, 3  ;;  %s345_s23 = sshll.u32 %s428_s21, 2 }
   0xd   : > { %230 = vperm.xlu0 %359, %v227_v0   ;;  %s209_s26 = scalar_lea.vmem %s422_s0, %s343_s22  ;;  %s215_s29 = scalar_lea.vmem %s423_s1, %s345_s23 }
   0xe   : > { %v223_v3 = vld [vmem:[%s209_s26] sm:$0xf]  ;;  %v248_v5 = vld [vmem:[%s215_s29 + $0x8] sm:$0xff]  ;;  %v225_v8 = vld [vmem:[%s209_s26 + $0x10] sm:$0xf]  ;;  %s221_s6 = scalar_lea.vmem %s426_s4, %s345_s23 }
   0xf   : > { %v247_v4 = vld [vmem:[%s215_s29] sm:$0xff]  ;;  %v224_v7 = vld [vmem:[%s209_s26 + $0x8] sm:$0xf]  ;;  %v226_v9 = vld [vmem:[%s209_s26 + $0x18] sm:$0xf]  ;;  %v252_v11 = vcombine.high %v248_v5, %v248_v5 }
  0x10   : > { %v251_v10 = vcombine.high %v247_v4, %v247_v4 }
  0x11   : > { %240 = vperm.xlu0 %359, %v237_v2  }
  0x88   : > { %v231_v6 = vpop.permute.xlu0 %230 }
  0x89   : > { %v233_v12 = vmul.f32 %v231_v6, %v223_v3  ;;  %v234_v13 = vmul.f32 %v231_v6, %v224_v7  ;;  %v235_v14 = vmul.f32 %v231_v6, %v225_v8  ;;  %v236_v15 = vmul.f32 %v231_v6, %v226_v9 }
  0x8c   : > { %v241_v16 = vpop.permute.xlu0 %240 }
  0x8d   : > { %v243_v17 = vadd.f32 %v241_v16, %v233_v12  ;;  %v244_v18 = vadd.f32 %v241_v16, %v234_v13  ;;  %v245_v19 = vadd.f32 %v241_v16, %v235_v14  ;;  %v246_v20 = vadd.f32 %v241_v16, %v236_v15 }
  0x8f   : > { %v255_v21 = vadd.f32 %v247_v4, %v243_v17  ;;  %v256_v22 = vadd.f32 %v251_v10, %v244_v18  ;;  %v257_v23 = vadd.f32 %v248_v5, %v245_v19  ;;  %v258_v24 = vadd.f32 %v252_v11, %v246_v20 }
  0x91   : > { %v263_v25 = vcombine.low %v255_v21, %v256_v22  ;;  %v264_v26 = vcombine.low %v257_v23, %v258_v24 }
  0x93   : > { %267 = vst [vmem:[%s221_s6] sm:$0xff] %v263_v25  ;;  %268 = vst [vmem:[%s221_s6 + $0x8] sm:$0xff] %v264_v26 }
  0x94 PF: > { %s14_s15 = sadd.s32 1, %s368_s15  }
  0x95   : > { %p11_p4 = scmp.ge.s32.totalorder %s14_s15, 4  }
  0x97   :  { %13 = sbr.rel (!%p11_p4) target bundleno = 1 (0x1), region = 69 }

// kernel: resblock_pallas.3
= control target key start
LH: loop header
LB: loop body
LE: loop exit
PB: predicated region body
PF: predicated region fallthrough
CT: control target
= control target key end

     0   :  { %s5941_s18 = smov 0   ;;  %s6988_s0 = inlined_call_operand.vmem [shape: f32[8,2048], index: 0, kind: input, shape index: {}]   ;;  %s6989_s1 = inlined_call_operand.vmem [shape: f32[27,8,8], index: 1, kind: input, shape index: {}]   ;;  %s6990_s2 = inlined_call_operand.vmem [shape: s32[1,1024], index: 2, kind: input, shape index: {}]   ;;  %s6991_s3 = inlined_call_operand.vmem [shape: f32[8,2048], index: 3, kind: output, shape index: {0}]   ;;  %s6992_s4 = inlined_call_operand.vmem [shape: f32[8,1], index: 4, kind: output, shape index: {1}]   ;;  %s6993_s5 = inlined_call_operand.vmem [shape: f32[8,1], index: 5, kind: output, shape index: {2}]  }
   0x1 LB: > { %s5947_s19 = sadd.s32 4294967295, %s5889_s18   ;;  %p5638_p0 = scmp.ge.s32.totalorder %s5889_s18, 1  ;;  %s5889_s18 = sphi %s5941_s18, %s16_s18  }
   0x2   : > { %p160_p1 = scmp.lt.s32.totalorder %s5889_s18, 3 }
   0x4   : > { %p161_p2 = pnand %p5638_p0, %p160_p1 }
   0x6   : > { %164 = sbr.rel (%p161_p2) target bundleno = 714 (0x2ca), region = 28 }
   0xb   : > { %s5639_s20 = sshll.u32 %s5947_s19, 2  ;;  %p199_p3 = scmp.lt.s32.totalorder %s5947_s19, 0 }
   0xc   : > { %p187_p4 = scmp.lt.s32.totalorder %s5639_s20, 7  ;;  %s5843_s21 = sadd.s32 4, %s5639_s20 }
   0xd   : > { %p193_p5 = scmp.lt.s32.totalorder %s5843_s21, 15  ;;  %s200_s22 = ssub.s32 0, %s5947_s19 }
   0xe   : > { %s7036_s20 = smov (!%p187_p4, %s5639_s20), 7  ;;  %s5642_s26 = smin.u32 %s5947_s19, %s200_s22 }
   0xf   : > { %s7038_s21 = smov (!%p193_p5, %s5843_s21), 15  ;;  %s5957_s25 = scalar_lea.vmem %s6990_s2, %s7036_s20 }
  0x10   : > { %s5641_s27 = sshll.u32 %s7038_s21, 3  ;;  %s202_s28 = sand.u32 1, %s5642_s26  }
  0x11   : > { %s5963_s6 = scalar_lea.vmem %s6991_s3, %s5641_s27  ;;  %s203_s7 = ssub.s32 0, %s202_s28 }
  0x12   : > { %s7040_s7 = smov (!%p199_p3, %s203_s7), %s202_s28  ;;  %p5645_p7 = scmp.ne.s32.totalorder %s5947_s19, 0 }
  0x13   : > { %p5644_p6 = scmp.lt.s32.totalorder %s7040_s7, 0  ;;  %s209_s8 = sadd.s32 2, %s7040_s7 }
  0x14   : > { %214 = sbr.rel (%p5645_p7) target bundleno = 31 (0x1f), region = 32  ;;  %s5646_s9 = sshll.u32 (!%p5645_p7), %s5947_s19, 9 }
  0x15   : > { %s7042_s8 = smov (!%p5644_p6, %s209_s8), %s7040_s7  ;;  %s216_s11 = sadd.s32 (!%p5645_p7), 384, %s5646_s9 }
  0x16   : > { %s5844_s10 = smul.u32 (!%p5645_p7), 48, %s7042_s8  ;;  %s217_s12 = sshra.s32 (!%p5645_p7), %s216_s11, 7 }
  0x17   : > { %s5647_s13 = sshll.u32 (!%p5645_p7), %s217_s12, 3  ;;  %s224_s20 = scalar_lea.sflag (!%p5645_p7), [#allocation3], %s7042_s8 }
  0x18   : > { %s220_s16 = scalar_lea.vmem (!%p5645_p7), %s6988_s0, %s5647_s13  ;;  %s223_s17 = scalar_lea.vmem (!%p5645_p7), [#allocation2], %s5844_s10 }
  0x19   : > { %v258_v0 = vld [vmem:[%s220_s16] sm:$0xff]  ;;  %v260_v1 = vld [vmem:[%s220_s16 + $0x8] sm:$0xff]  ;;  %v262_v2 = vld [vmem:[%s220_s16 + $0x10] sm:$0xff] }
  0x1a   : > { %259 = vst [vmem:[%s223_s17] sm:$0xff] %v258_v0  ;;  %261 = vst [vmem:[%s223_s17 + $0x8] sm:$0xff] %v260_v1  ;;  %v264_v3 = vld [vmem:[%s220_s16 + $0x18] sm:$0xff]  ;;  %v266_v4 = vld [vmem:[%s220_s16 + $0x20] sm:$0xff] }
  0x1b   : > { %263 = vst [vmem:[%s223_s17 + $0x10] sm:$0xff] %v262_v2  ;;  %v268_v5 = vld [vmem:[%s220_s16 + $0x28] sm:$0xff]  ;;  %265 = vst [vmem:[%s223_s17 + $0x18] sm:$0xff] %v264_v3 }
  0x1c   : > { %267 = vst [vmem:[%s223_s17 + $0x20] sm:$0xff] %v266_v4  ;;  %269 = vst [vmem:[%s223_s17 + $0x28] sm:$0xff] %v268_v5 }
  0x1d   : > { %277 = vsyncadd %s224_s20, 768  ;;  %vm278_vm0 = vcmask 7168   ;;  %v5891_v6 = vmov 0.0  }
  0x1e   : > { %279 = vst.msk [vmem:[%s6992_s4] sm:$0xff] %vm278_vm0, %v5891_v6  ;;  %280 = vst.msk [vmem:[%s6993_s5] sm:$0xff] %vm278_vm0, %v5891_v6 }
  0x1f PF: > { %s281_s26 = sadd.s32 1, %s5947_s19 }
  0x20   : > { %p5649_p8 = scmp.ge.s32.totalorder %s281_s26, 2 }
  0x21   : > { %s286_s27 = ssub.s32 (!%p5649_p8), 1, %s7042_s8  ;;  %s5845_s28 = sshll.u32 (!%p5649_p8), %s5947_s19, 9 }
  0x22   : > { %285 = sbr.rel (%p5649_p8) target bundleno = 44 (0x2c), region = 70  ;;  %s5846_s29 = sadd.s32 (!%p5649_p8), 512, %s5845_s28 }
  0x23   : > { %s5847_s30 = smul.u32 (!%p5649_p8), 48, %s286_s27  ;;  %s288_s7 = sadd.s32 (!%p5649_p8), 384, %s5846_s29 }
  0x24   : > { %s289_s9 = sshra.s32 (!%p5649_p8), %s288_s7, 7  ;;  %s296_s19 = scalar_lea.sflag (!%p5649_p8), [#allocation3], %s286_s27 }
  0x25   : > { %s5651_s10 = sshll.u32 (!%p5649_p8), %s289_s9, 3  ;;  %s295_s14 = scalar_lea.vmem (!%p5649_p8), [#allocation2], %s5847_s30 }
  0x26   : > { %s292_s13 = scalar_lea.vmem (!%p5649_p8), %s6988_s0, %s5651_s10 }
  0x27   : > { %v330_v7 = vld [vmem:[%s292_s13] sm:$0xff]  ;;  %v332_v8 = vld [vmem:[%s292_s13 + $0x8] sm:$0xff]  ;;  %v334_v9 = vld [vmem:[%s292_s13 + $0x10] sm:$0xff] }
  0x28   : > { %331 = vst [vmem:[%s295_s14] sm:$0xff] %v330_v7  ;;  %333 = vst [vmem:[%s295_s14 + $0x8] sm:$0xff] %v332_v8  ;;  %v336_v10 = vld [vmem:[%s292_s13 + $0x18] sm:$0xff]  ;;  %v338_v11 = vld [vmem:[%s292_s13 + $0x20] sm:$0xff] }
  0x29   : > { %335 = vst [vmem:[%s295_s14 + $0x10] sm:$0xff] %v334_v9  ;;  %v340_v12 = vld [vmem:[%s292_s13 + $0x28] sm:$0xff]  ;;  %337 = vst [vmem:[%s295_s14 + $0x18] sm:$0xff] %v336_v10 }
  0x2a   : > { %339 = vst [vmem:[%s295_s14 + $0x20] sm:$0xff] %v338_v11  ;;  %341 = vst [vmem:[%s295_s14 + $0x28] sm:$0xff] %v340_v12 }
  0x2b   : > { %349 = vsyncadd %s296_s19, 768 }
  0x2c PF: > { %s5848_s15 = smul.u32 48, %s7042_s8  ;;  %s353_s17 = scalar_lea.sflag [#allocation3], %s7042_s8 }
  0x2e   : > { %s5987_s16 = scalar_lea.vmem [#allocation2], %s5848_s15 }
  0x2f   : > { %5885 = dma.done.wait %s353_s17, 768 }
  0x30   : > { %5886 = vsyncadd %s353_s17, 4294966528  ;;  %s5892_s20 = smov 72   ;;  %v5893_v16 = vmov 0.0   ;;  %s5894_s8 = smov 73   ;;  %v6105_v19 = vld [vmem:[%s5957_s25] sm:$0xf]  ;;  %v368_v20 = vlaneseq }
  0x31   : > { %v5991_v13 = vld [vmem:[%s5987_s16 + $0x8] sm:$0xff]  ;;  %v5994_v14 = vld [vmem:[%s5987_s16] sm:$0xff]  ;;  %v6001_v15 = vld [vmem:[%s5987_s16 + $0x10] sm:$0xff]  ;;  %533 = vmatprep.mubr.f32.mxu0 %v5893_v16  ;;  %604 = vmatprep.mubr.f32.mxu1 %v5893_v16  ;;  %s5895_s21 = smov 71   ;;  %s5896_s22 = smov 65   ;;  %v417_v21 = vand.u32 5, %v6105_v19 }
  0x32   : > { %442 = vrot.lane.b32.xlu0 %v5991_v13, %s5892_s20  ;;  %440 = vrot.lane.b32.xlu1 %v5994_v14, %s5892_s20  ;;  %v6010_v17 = vld [vmem:[%s5987_s16 + $0x18] sm:$0xff]  ;;  %v6017_v18 = vld [vmem:[%s5987_s16 + $0x20] sm:$0xff]  ;;  %s5897_s23 = smov 64   ;;  %s5898_s24 = smov 63   ;;  %v369_v22 = vshrl.u32 %v368_v20, 7  ;;  %v365_v23 = vand.u32 21, %v6105_v19 }
  0x33   : > { %s5899_s26 = smov 57   ;;  %s5900_s27 = smov 56   ;;  %vm418_vm1 = vcmp.eq.s32.totalorder %v417_v21, 5  ;;  %v5905_v25 = vmov 0   ;;  %vm450_vm4 = vcmask 588800   ;;  %v5654_v38 = vld [vmem:[%s6989_s1 + $0x8] sm:$0xff] }
  0x34   : > { %s5901_s28 = smov 55   ;;  %s5902_s29 = smov 9   ;;  %v6113_v24 = vsub.s32 1, %v369_v22  ;;  %v419_v26 = vsel %vm418_vm1, 1, %v5905_v25  ;;  %v6116_v27 = vsub.s32 0, %v369_v22  ;;  %vm366_vm2 = vcmp.eq.s32.totalorder %v365_v23, 21 }
  0x35   : > { %s5903_s30 = smov 8   ;;  %s5904_s7 = smov 7   ;;  %v367_v32 = vsel %vm366_vm2, 1, %v5905_v25  ;;  %v6126_v34 = vsub.s32 3, %v369_v22  ;;  %vm465_vm6 = vcmask 64512   ;;  %v6134_v39 = vsub.s32 2, %v369_v22 }
  0x36   : > { %444 = vrot.lane.b32.xlu0 %v6001_v15, %s5892_s20  ;;  %395 = vrot.lane.b32.xlu1 %v5991_v13, %s5894_s8  ;;  %v427_v28 = vrot.slane %v419_v26, %v6113_v24  ;;  %v423_v31 = vrot.slane %v419_v26, %v6116_v27  ;;  %v375_v33 = vrot.slane %v367_v32, %v6113_v24  ;;  %v756_v40 = vand.u32 37, %v6105_v19  ;;  %s5906_s11 = smov 1   ;;  %v416_v55 = vld [vmem:[%s6989_s1] sm:$0xff]  ;;  %s5907_s14 = smov 127   ;;  %v6200_v2 = vld [vmem:[%s5987_s16 + $0x28] sm:$0xff] }
  0x37   : > { %vm403_vm7 = vcmask 596992   ;;  %v435_v42 = vrot.slane %v419_v26, %v6126_v34  ;;  %v371_v45 = vrot.slane %v367_v32, %v6116_v27  ;;  %v431_v47 = vrot.slane %v419_v26, %v6134_v39  ;;  %v5667_v9 = vld [vmem:[%s6989_s1 + $0x10] sm:$0xff]  ;;  %s5908_s17 = smov 121  }
  0x38   : > { %vm437_vm3 = vcmp.eq.s32.totalorder %v427_v28, 1  ;;  %vm436_vm5 = vcmp.eq.s32.totalorder %v423_v31, 1  ;;  %vm385_vm8 = vcmp.eq.s32.totalorder %v375_v33, 1  ;;  %vm757_vm9 = vcmp.eq.s32.totalorder %v756_v40, 37 }
  0x39   : > { %vm439_vm10 = vcmp.eq.s32.totalorder %v435_v42, 1  ;;  %v383_v48 = vrot.slane %v367_v32, %v6126_v34  ;;  %vm384_vm11 = vcmp.eq.s32.totalorder %v371_v45, 1  ;;  %v379_v51 = vrot.slane %v367_v32, %v6134_v39 }
  0x3a   : > { %397 = vrot.lane.b32.xlu0 %v6001_v15, %s5894_s8  ;;  %446 = vrot.lane.b32.xlu1 %v6010_v17, %s5892_s20  ;;  %v758_v52 = vsel %vm757_vm9, 1, %v5905_v25  ;;  %vm438_vm12 = vcmp.eq.s32.totalorder %v431_v47, 1  ;;  %v953_v62 = vand.u32 17, %v6105_v19  ;;  %vm789_vm15 = vcmask 580608  }
  0x3b   : > { %vm387_vm13 = vcmp.eq.s32.totalorder %v383_v48, 1  ;;  %v766_v57 = vrot.slane %v758_v52, %v6113_v24  ;;  %vm386_vm14 = vcmp.eq.s32.totalorder %v379_v51, 1  ;;  %v762_v63 = vrot.slane %v758_v52, %v6116_v27 }
  0x3c   : > { %vm954_vm1 = vcmp.eq.s32.totalorder %v953_v62, 17  ;;  %v774_v4 = vrot.slane %v758_v52, %v6126_v34  ;;  %v770_v7 = vrot.slane %v758_v52, %v6134_v39  ;;  %v1150_v11 = vand.u32 1, %v6105_v19 }
  0x3d   : > { %vm776_vm0 = vcmp.eq.s32.totalorder %v766_v57, 1  ;;  %vm775_vm2 = vcmp.eq.s32.totalorder %v762_v63, 1  ;;  %v955_v8 = vsel %vm954_vm1, 1, %v5905_v25  ;;  %vm986_vm9 = vcmask 531456   ;;  %v5681_v57 = vld [vmem:[%s6989_s1 + $0x20] sm:$0xff] }
  0x3e   : > { %448 = vrot.lane.b32.xlu0 %v6017_v18, %s5892_s20  ;;  %393 = vrot.lane.b32.xlu1 %v5994_v14, %s5894_s8  ;;  %v963_v12 = vrot.slane %v955_v8, %v6113_v24  ;;  %v959_v21 = vrot.slane %v955_v8, %v6116_v27  ;;  %v971_v26 = vrot.slane %v955_v8, %v6126_v34  ;;  %v1544_v62 = vand.u32 25, %v6105_v19 }
  0x42   : > { %399 = vrot.lane.b32.xlu0 %v6010_v17, %s5894_s8  ;;  %401 = vrot.lane.b32.xlu1 %v6017_v18, %s5894_s8 }
  0x46   : > { %781 = vrot.lane.b32.xlu0 %v5991_v13, %s5895_s21  ;;  %783 = vrot.lane.b32.xlu1 %v6001_v15, %s5895_s21 }
  0x4a   : > { %779 = vrot.lane.b32.xlu0 %v5994_v14, %s5895_s21  ;;  %785 = vrot.lane.b32.xlu1 %v6010_v17, %s5895_s21 }
  0x4e   : > { %787 = vrot.lane.b32.xlu0 %v6017_v18, %s5895_s21  ;;  %978 = vrot.lane.b32.xlu1 %v5991_v13, %s5896_s22 }
  0x52   : > { %980 = vrot.lane.b32.xlu0 %v6001_v15, %s5896_s22  ;;  %976 = vrot.lane.b32.xlu1 %v5994_v14, %s5896_s22 }
  0x56   : > { %982 = vrot.lane.b32.xlu0 %v6010_v17, %s5896_s22  ;;  %984 = vrot.lane.b32.xlu1 %v6017_v18, %s5896_s22 }
  0x5a   : > { %1175 = vrot.lane.b32.xlu0 %v5991_v13, %s5897_s23  ;;  %1177 = vrot.lane.b32.xlu1 %v6001_v15, %s5897_s23 }
  0x5e   : > { %1173 = vrot.lane.b32.xlu0 %v5994_v14, %s5897_s23  ;;  %1179 = vrot.lane.b32.xlu1 %v6010_v17, %s5897_s23 }
  0x62   : > { %1181 = vrot.lane.b32.xlu0 %v6017_v18, %s5897_s23  ;;  %1372 = vrot.lane.b32.xlu1 %v5991_v13, %s5898_s24 }
  0x66   : > { %1374 = vrot.lane.b32.xlu0 %v6001_v15, %s5898_s24  ;;  %1370 = vrot.lane.b32.xlu1 %v5994_v14, %s5898_s24 }
  0x6a   : > { %1376 = vrot.lane.b32.xlu0 %v6010_v17, %s5898_s24  ;;  %1378 = vrot.lane.b32.xlu1 %v6017_v18, %s5898_s24 }
  0x6e   : > { %1569 = vrot.lane.b32.xlu0 %v5991_v13, %s5899_s26  ;;  %1571 = vrot.lane.b32.xlu1 %v6001_v15, %s5899_s26 }
  0x72   : > { %1567 = vrot.lane.b32.xlu0 %v5994_v14, %s5899_s26  ;;  %1573 = vrot.lane.b32.xlu1 %v6010_v17, %s5899_s26 }
  0x76   : > { %1575 = vrot.lane.b32.xlu0 %v6017_v18, %s5899_s26  ;;  %1766 = vrot.lane.b32.xlu1 %v5991_v13, %s5900_s27 }
  0x7a   : > { %1768 = vrot.lane.b32.xlu0 %v6001_v15, %s5900_s27  ;;  %1764 = vrot.lane.b32.xlu1 %v5994_v14, %s5900_s27 }
  0x7e   : > { %1770 = vrot.lane.b32.xlu0 %v6010_v17, %s5900_s27  ;;  %1772 = vrot.lane.b32.xlu1 %v6017_v18, %s5900_s27 }
  0x82   : > { %1963 = vrot.lane.b32.xlu0 %v5991_v13, %s5901_s28  ;;  %1965 = vrot.lane.b32.xlu1 %v6001_v15, %s5901_s28 }
  0x86   : > { %1961 = vrot.lane.b32.xlu0 %v5994_v14, %s5901_s28  ;;  %1967 = vrot.lane.b32.xlu1 %v6010_v17, %s5901_s28 }
  0x8a   : > { %1969 = vrot.lane.b32.xlu0 %v6017_v18, %s5901_s28  ;;  %2160 = vrot.lane.b32.xlu1 %v5991_v13, %s5902_s29 }
  0x8e   : > { %2162 = vrot.lane.b32.xlu0 %v6001_v15, %s5902_s29  ;;  %2158 = vrot.lane.b32.xlu1 %v5994_v14, %s5902_s29 }
  0x92   : > { %2164 = vrot.lane.b32.xlu0 %v6010_v17, %s5902_s29  ;;  %2166 = vrot.lane.b32.xlu1 %v6017_v18, %s5902_s29 }
  0x96   : > { %2357 = vrot.lane.b32.xlu0 %v5991_v13, %s5903_s30  ;;  %2359 = vrot.lane.b32.xlu1 %v6001_v15, %s5903_s30 }
  0x9a   : > { %2355 = vrot.lane.b32.xlu0 %v5994_v14, %s5903_s30  ;;  %2361 = vrot.lane.b32.xlu1 %v6010_v17, %s5903_s30 }
  0x9e   : > { %2363 = vrot.lane.b32.xlu0 %v6017_v18, %s5903_s30  ;;  %2553 = vrot.lane.b32.xlu1 %v5991_v13, %s5904_s7 }
  0xa2   : > { %2555 = vrot.lane.b32.xlu0 %v6001_v15, %s5904_s7  ;;  %2551 = vrot.lane.b32.xlu1 %v5994_v14, %s5904_s7 }
  0xa4   : > { %v443_v29 = vpop.permute.xlu0 %442  ;;  %v441_v30 = vpop.permute.xlu1 %440 }
  0xa5   : > { %v451_v41 = vsel %vm450_vm4, %v441_v30, %v443_v29  ;;  %v967_v30 = vrot.slane %v955_v8, %v6134_v39 }
  0xa6   : > { %2557 = vrot.lane.b32.xlu0 %v6010_v17, %s5904_s7  ;;  %2559 = vrot.lane.b32.xlu1 %v6017_v18, %s5904_s7  ;;  %s5909_s7 = smov 120  }
  0xa8   : > { %v445_v35 = vpop.permute.xlu0 %444  ;;  %v396_v36 = vpop.permute.xlu1 %395 }
  0xa9   : > { %v6129_v37 = vsel %vm450_vm4, %v443_v29, %v445_v35 }
  0xaa   : > { %5655 = vmatprep.subr.msk.mxu0 %vm437_vm3, %v6129_v37  ;;  %2750 = vrot.lane.b32.xlu0 %v5991_v13, %s5906_s11  ;;  %vm778_vm3 = vcmp.eq.s32.totalorder %v774_v4, 1 }
  0xab   : > { %2752 = vrot.lane.b32.xlu1 %v6001_v15, %s5906_s11  ;;  %5656 = vmatpush1.msk.msra.mxu0 %vm436_vm5, %v451_v41  ;;  %vm777_vm5 = vcmp.eq.s32.totalorder %v770_v7, 1 }
  0xac   : > { %v398_v43 = vpop.permute.xlu0 %397  ;;  %v447_v44 = vpop.permute.xlu1 %446  ;;  %5657 = vmatmul.mubr.msk.f32.vlgmr.msra.gmra.mxu0 %vm465_vm6, %v5654_v38 }
  0xad   : > { %v6147_v46 = vsel %vm403_vm7, %v396_v36, %v398_v43  ;;  %678 = vmatprep.mubr.f32.mxu0 %v5893_v16  ;;  %v6175_v56 = vsel %vm450_vm4, %v445_v35, %v447_v44  ;;  %v5674_v35 = vld [vmem:[%s6989_s1 + $0x18] sm:$0xff] }
  0xae   : > { %2748 = vrot.lane.b32.xlu0 %v5994_v14, %s5906_s11  ;;  %5661 = vmatprep.subr.msk.mxu0 %vm385_vm8, %v6147_v46  ;;  %vm1151_vm8 = vcmp.eq.s32.totalorder %v1150_v11, 1 }
  0xaf   : > { %2754 = vrot.lane.b32.xlu1 %v6010_v17, %s5906_s11  ;;  %v1152_v31 = vsel %vm1151_vm8, 1, %v5905_v25  ;;  %vm1545_vm8 = vcmp.eq.s32.totalorder %v1544_v62, 25 }
  0xb0   : > { %v6157_v49 = vpop.permute.xlu0 %448  ;;  %v394_v50 = vpop.permute.xlu1 %393 }
  0xb1   : > { %v404_v53 = vsel %vm403_vm7, %v394_v50, %v396_v36  ;;  %v6164_v54 = vsel %vm450_vm4, %v447_v44, %v6157_v49  ;;  %v1160_v36 = vrot.slane %v1152_v31, %v6113_v24  ;;  %v1156_v44 = vrot.slane %v1152_v31, %v6116_v27 }
  0xb2   : > { %2756 = vrot.lane.b32.xlu0 %v6017_v18, %s5906_s11  ;;  %5658 = vmatprep.subr.msk.mxu1 %vm439_vm10, %v6164_v54  ;;  %vm973_vm10 = vcmp.eq.s32.totalorder %v963_v12, 1  ;;  %v1168_v50 = vrot.slane %v1152_v31, %v6126_v34  ;;  %s5910_s11 = smov 119  }
  0xb3   : > { %3099 = vrot.lane.b32.xlu1 %v6001_v15, %s5907_s14  ;;  %5662 = vmatpush1.msk.msra.mxu0 %vm384_vm11, %v404_v53  ;;  %vm972_vm11 = vcmp.eq.s32.totalorder %v959_v21, 1  ;;  %v1164_v53 = vrot.slane %v1152_v31, %v6134_v39 }
  0xb4   : > { %5659 = vmatpush1.msk.msra.mxu1 %vm438_vm12, %v6175_v56  ;;  %v400_v58 = vpop.permute.xlu0 %399  ;;  %v6179_v59 = vpop.permute.xlu1 %401  ;;  %5663 = vmatmul.mubr.msk.f32.vlgmr.msra.gmra.mxu0 %vm465_vm6, %v416_v55  ;;  %vm975_vm12 = vcmp.eq.s32.totalorder %v971_v26, 1 }
  0xb5   : > { %v6183_v60 = vsel %vm403_vm7, %v398_v43, %v400_v58  ;;  %v6187_v61 = vsel %vm403_vm7, %v400_v58, %v6179_v59  ;;  %5660 = vmatmul.mubr.msk.f32.vlgmr.msra.gmra.mxu1 %vm465_vm6, %v5654_v38  ;;  %871 = vmatprep.mubr.f32.mxu0 %v5893_v16  ;;  %v1347_v43 = vand.u32 33, %v6105_v19 }
  0xb6   : > { %3101 = vrot.lane.b32.xlu0 %v6010_v17, %s5907_s14  ;;  %5664 = vmatprep.subr.msk.mxu1 %vm387_vm13, %v6187_v61  ;;  %vm974_vm13 = vcmp.eq.s32.totalorder %v967_v30, 1 }
  0xb7   : > { %3097 = vrot.lane.b32.xlu1 %v5991_v13, %s5907_s14  ;;  %5665 = vmatpush1.msk.msra.mxu1 %vm386_vm14, %v6183_v60  ;;  %vm1183_vm14 = vcmask 523264   ;;  %vm1348_vm1 = vcmp.eq.s32.totalorder %v1347_v43, 33 }
  0xb8   : > { %v782_v0 = vpop.permute.xlu0 %781  ;;  %v784_v1 = vpop.permute.xlu1 %783  ;;  %749 = vmatprep.mubr.f32.mxu1 %v5893_v16 }
  0xb9   : > { %v6204_v3 = vsel %vm789_vm15, %v782_v0, %v784_v1  ;;  %5666 = vmatmul.mubr.msk.f32.vlgmr.msra.gmra.mxu1 %vm465_vm6, %v416_v55  ;;  %v1349_v55 = vsel %vm1348_vm1, 1, %v5905_v25  ;;  %vm1577_vm1 = vcmask 465920  }
  0xba   : > { %3103 = vrot.lane.b32.xlu0 %v6017_v18, %s5907_s14  ;;  %5668 = vmatprep.subr.msk.mxu0 %vm776_vm0, %v6204_v3  ;;  %vm1170_vm0 = vcmp.eq.s32.totalorder %v1160_v36, 1  ;;  %v1357_v63 = vrot.slane %v1349_v55, %v6113_v24  ;;  %v1353_v4 = vrot.slane %v1349_v55, %v6116_v27 }
  0xbb   : > { %3105 = vrot.lane.b32.xlu1 %v6200_v2, %s5907_s14  ;;  %942 = vmatprep.mubr.f32.mxu1 %v5893_v16 }
  0xbc   : > { %v780_v5 = vpop.permute.xlu0 %779  ;;  %v786_v6 = vpop.permute.xlu1 %785 }
  0xbd   : > { %v790_v10 = vsel %vm789_vm15, %v780_v5, %v782_v0  ;;  %v6236_v23 = vsel %vm789_vm15, %v784_v1, %v786_v6 }
  0xbe   : > { %3296 = vrot.lane.b32.xlu0 %v6001_v15, %s5908_s17  ;;  %5669 = vmatpush1.msk.msra.mxu0 %vm775_vm2, %v790_v10  ;;  %vm1169_vm2 = vcmp.eq.s32.totalorder %v1156_v44, 1 }
  0xbf   : > { %3298 = vrot.lane.b32.xlu1 %v6010_v17, %s5908_s17  ;;  %5670 = vmatmul.mubr.msk.f32.vlgmr.msra.gmra.mxu0 %vm465_vm6, %v5667_v9 }
  0xc0   : > { %v6227_v14 = vpop.permute.xlu0 %787  ;;  %v979_v20 = vpop.permute.xlu1 %978  ;;  %1068 = vmatprep.mubr.f32.mxu0 %v5893_v16 }
  0xc1   : > { %v6233_v22 = vsel %vm789_vm15, %v786_v6, %v6227_v14  ;;  %v1365_v6 = vrot.slane %v1349_v55, %v6126_v34 }
  0xc2   : > { %3294 = vrot.lane.b32.xlu0 %v5991_v13, %s5908_s17  ;;  %5671 = vmatprep.subr.msk.mxu1 %vm778_vm3, %v6233_v22  ;;  %vm1172_vm3 = vcmp.eq.s32.totalorder %v1168_v50, 1 }
  0xc3   : > { %3300 = vrot.lane.b32.xlu1 %v6017_v18, %s5908_s17  ;;  %5672 = vmatpush1.msk.msra.mxu1 %vm777_vm5, %v6236_v23  ;;  %vm1171_vm5 = vcmp.eq.s32.totalorder %v1164_v53, 1 }
  0xc4   : > { %v981_v28 = vpop.permute.xlu0 %980  ;;  %v977_v29 = vpop.permute.xlu1 %976  ;;  %5673 = vmatmul.mubr.msk.f32.vlgmr.msra.gmra.mxu1 %vm465_vm6, %v5667_v9  ;;  %v1361_v9 = vrot.slane %v1349_v55, %v6134_v39 }
  0xc5   : > { %v6249_v32 = vsel %vm986_vm9, %v979_v20, %v981_v28  ;;  %v987_v33 = vsel %vm986_vm9, %v977_v29, %v979_v20  ;;  %1139 = vmatprep.mubr.f32.mxu1 %v5893_v16  ;;  %v1741_v29 = vand.u32 9, %v6105_v19 }
  0xc6   : > { %3302 = vrot.lane.b32.xlu0 %v6200_v2, %s5908_s17  ;;  %5675 = vmatprep.subr.msk.mxu0 %vm973_vm10, %v6249_v32  ;;  %vm1380_vm10 = vcmask 515072  }
  0xc7   : > { %3493 = vrot.lane.b32.xlu1 %v6001_v15, %s5909_s7  ;;  %5676 = vmatpush1.msk.msra.mxu0 %vm972_vm11, %v987_v33  ;;  %vm1367_vm11 = vcmp.eq.s32.totalorder %v1357_v63, 1 }
  0xc8   : > { %v983_v38 = vpop.permute.xlu0 %982  ;;  %v6261_v40 = vpop.permute.xlu1 %984  ;;  %5677 = vmatmul.mubr.msk.f32.vlgmr.msra.gmra.mxu0 %vm465_vm6, %v5674_v35 }
  0xc9   : > { %v6265_v41 = vsel %vm986_vm9, %v981_v28, %v983_v38  ;;  %v6269_v42 = vsel %vm986_vm9, %v983_v38, %v6261_v40  ;;  %1265 = vmatprep.mubr.f32.mxu0 %v5893_v16 }
  0xca   : > { %3495 = vrot.lane.b32.xlu0 %v6010_v17, %s5909_s7  ;;  %5678 = vmatprep.subr.msk.mxu1 %vm975_vm12, %v6269_v42  ;;  %vm1366_vm12 = vcmp.eq.s32.totalorder %v1353_v4, 1 }
  0xcb   : > { %3491 = vrot.lane.b32.xlu1 %v5991_v13, %s5909_s7  ;;  %5679 = vmatpush1.msk.msra.mxu1 %vm974_vm13, %v6265_v41  ;;  %vm1369_vm13 = vcmp.eq.s32.totalorder %v1365_v6, 1 }
  0xcc   : > { %v1176_v45 = vpop.permute.xlu0 %1175  ;;  %v1178_v47 = vpop.permute.xlu1 %1177  ;;  %5680 = vmatmul.mubr.msk.f32.vlgmr.msra.gmra.mxu1 %vm465_vm6, %v5674_v35 }
  0xcd   : > { %v6280_v48 = vsel %vm1183_vm14, %v1176_v45, %v1178_v47  ;;  %1336 = vmatprep.mubr.f32.mxu1 %v5893_v16 }
  0xce   : > { %3497 = vrot.lane.b32.xlu0 %v6017_v18, %s5909_s7  ;;  %5682 = vmatprep.subr.msk.mxu0 %vm1170_vm0, %v6280_v48  ;;  %vm1368_vm0 = vcmp.eq.s32.totalorder %v1361_v9, 1 }
  0xcf   : > { %3499 = vrot.lane.b32.xlu1 %v6200_v2, %s5909_s7 }
  0xd0   : > { %v1174_v51 = vpop.permute.xlu0 %1173  ;;  %v1180_v52 = vpop.permute.xlu1 %1179 }
  0xd1   : > { %v1184_v58 = vsel %vm1183_vm14, %v1174_v51, %v1176_v45  ;;  %v1938_v51 = vand.u32 41, %v6105_v19 }
  0xd2   : > { %3690 = vrot.lane.b32.xlu0 %v6001_v15, %s5910_s11  ;;  %5683 = vmatpush1.msk.msra.mxu0 %vm1169_vm2, %v1184_v58 }
  0xd3   : > { %3692 = vrot.lane.b32.xlu1 %v6010_v17, %s5910_s11  ;;  %5684 = vmatmul.mubr.msk.f32.vlgmr.msra.gmra.mxu0 %vm465_vm6, %v5681_v57  ;;  %v6309_v17 = vsel %vm1183_vm14, %v1178_v47, %v1180_v52  ;;  %v5695_v47 = vld [vmem:[%s6989_s1 + $0x30] sm:$0xff] }
  0xd4   : > { %v6300_v0 = vpop.permute.xlu0 %1181  ;;  %v1373_v1 = vpop.permute.xlu1 %1372  ;;  %1462 = vmatprep.mubr.f32.mxu0 %v5893_v16 }
  0xd5   : > { %v6306_v5 = vsel %vm1183_vm14, %v1180_v52, %v6300_v0 }
  0xd6   : > { %3688 = vrot.lane.b32.xlu0 %v5991_v13, %s5910_s11  ;;  %5685 = vmatprep.subr.msk.mxu1 %vm1172_vm3, %v6306_v5  ;;  %v1546_v13 = vsel %vm1545_vm8, 1, %v5905_v25  ;;  %vm1742_vm3 = vcmp.eq.s32.totalorder %v1741_v29, 9  ;;  %v2135_v29 = vand.u32 20, %v6105_v19 }
  0xd7   : > { %3694 = vrot.lane.b32.xlu1 %v6017_v18, %s5910_s11  ;;  %5686 = vmatpush1.msk.msra.mxu1 %vm1171_vm5, %v6309_v17  ;;  %v5688_v18 = vld [vmem:[%s6989_s1 + $0x28] sm:$0xff]  ;;  %v1554_v12 = vrot.slane %v1546_v13, %v6113_v24  ;;  %v1550_v30 = vrot.slane %v1546_v13, %v6116_v27  ;;  %v1562_v36 = vrot.slane %v1546_v13, %v6126_v34  ;;  %v1743_v45 = vsel %vm1742_vm3, 1, %v5905_v25 }
  0xd8   : > { %v1375_v7 = vpop.permute.xlu0 %1374  ;;  %v1371_v8 = vpop.permute.xlu1 %1370  ;;  %5687 = vmatmul.mubr.msk.f32.vlgmr.msra.gmra.mxu1 %vm465_vm6, %v5681_v57  ;;  %v1558_v44 = vrot.slane %v1546_v13, %v6134_v39  ;;  %v1751_v52 = vrot.slane %v1743_v45, %v6113_v24  ;;  %v1747_v57 = vrot.slane %v1743_v45, %v6116_v27  ;;  %v1759_v63 = vrot.slane %v1743_v45, %v6126_v34 }
  0xd9   : > { %v6322_v10 = vsel %vm1380_vm10, %v1373_v1, %v1375_v7  ;;  %v1381_v11 = vsel %vm1380_vm10, %v1371_v8, %v1373_v1  ;;  %1533 = vmatprep.mubr.f32.mxu1 %v5893_v16  ;;  %vm1564_vm2 = vcmp.eq.s32.totalorder %v1554_v12, 1  ;;  %vm1563_vm5 = vcmp.eq.s32.totalorder %v1550_v30, 1 }
  0xda   : > { %3696 = vrot.lane.b32.xlu0 %v6200_v2, %s5910_s11  ;;  %5689 = vmatprep.subr.msk.mxu0 %vm1367_vm11, %v6322_v10  ;;  %vm1566_vm8 = vcmp.eq.s32.totalorder %v1562_v36, 1  ;;  %vm1565_vm11 = vcmp.eq.s32.totalorder %v1558_v44, 1  ;;  %v1755_v6 = vrot.slane %v1743_v45, %v6134_v39  ;;  %vm1763_vm3 = vcmp.eq.s32.totalorder %v1759_v63, 1 }
  0xdb   : > { %3885 = vrot.lane.b32.xlu1 %v6200_v2, %s5894_s8  ;;  %5690 = vmatpush1.msk.msra.mxu0 %vm1366_vm12, %v1381_v11  ;;  %vm1939_vm12 = vcmp.eq.s32.totalorder %v1938_v51, 41 }
  0xdc   : > { %v1377_v20 = vpop.permute.xlu0 %1376  ;;  %v6335_v21 = vpop.permute.xlu1 %1378  ;;  %5691 = vmatmul.mubr.msk.f32.vlgmr.msra.gmra.mxu0 %vm465_vm6, %v5688_v18 }
  0xdd   : > { %v6339_v26 = vsel %vm1380_vm10, %v1375_v7, %v1377_v20  ;;  %v6343_v28 = vsel %vm1380_vm10, %v1377_v20, %v6335_v21  ;;  %1659 = vmatprep.mubr.f32.mxu0 %v5893_v16  ;;  %v1940_v7 = vsel %vm1939_vm12, 1, %v5905_v25  ;;  %vm2136_vm12 = vcmp.eq.s32.totalorder %v2135_v29, 20 }
  0xde   : > { %4067 = vrot.lane.b32.xlu0 %v6200_v2, %s5892_s20  ;;  %5692 = vmatprep.subr.msk.mxu1 %vm1369_vm13, %v6343_v28  ;;  %vm6996_vm13 = vcmask 457728   ;;  %v1948_v13 = vrot.slane %v1940_v7, %v6113_v24  ;;  %v1944_v30 = vrot.slane %v1940_v7, %v6116_v27  ;;  %v1952_v45 = vrot.slane %v1940_v7, %v6134_v39 }
  0xdf   : > { %4249 = vrot.lane.b32.xlu1 %v6200_v2, %s5895_s21  ;;  %5693 = vmatpush1.msk.msra.mxu1 %vm1368_vm0, %v6339_v26  ;;  %vm1761_vm0 = vcmp.eq.s32.totalorder %v1751_v52, 1  ;;  %v2332_v52 = vand.u32 4, %v6105_v19 }
  0xe0   : > { %v1570_v31 = vpop.permute.xlu0 %1569  ;;  %v1572_v33 = vpop.permute.xlu1 %1571  ;;  %5694 = vmatmul.mubr.msk.f32.vlgmr.msra.gmra.mxu1 %vm465_vm6, %v5688_v18 }
  0xe1   : > { %v6356_v35 = vsel %vm1577_vm1, %v1570_v31, %v1572_v33  ;;  %1730 = vmatprep.mubr.f32.mxu1 %v5893_v16 }
  0xe2   : > { %4431 = vrot.lane.b32.xlu0 %v6200_v2, %s5896_s22  ;;  %5696 = vmatprep.subr.msk.mxu0 %vm1564_vm2, %v6356_v35  ;;  %vm1760_vm2 = vcmp.eq.s32.totalorder %v1747_v57, 1 }
  0xe3   : > { %4613 = vrot.lane.b32.xlu1 %v6200_v2, %s5897_s23 }
  0xe4   : > { %v1568_v38 = vpop.permute.xlu0 %1567  ;;  %v1574_v43 = vpop.permute.xlu1 %1573 }
  0xe5   : > { %v1578_v50 = vsel %vm1577_vm1, %v1568_v38, %v1570_v31  ;;  %v6387_v62 = vsel %vm1577_vm1, %v1572_v33, %v1574_v43  ;;  %v1956_v38 = vrot.slane %v1940_v7, %v6126_v34 }
  0xe6   : > { %4795 = vrot.lane.b32.xlu0 %v6200_v2, %s5898_s24  ;;  %5697 = vmatpush1.msk.msra.mxu0 %vm1563_vm5, %v1578_v50  ;;  %vm1762_vm5 = vcmp.eq.s32.totalorder %v1755_v6, 1  ;;  %v5709_v50 = vld [vmem:[%s6989_s1 + $0x40] sm:$0xff] }
  0xe7   : > { %4977 = vrot.lane.b32.xlu1 %v6200_v2, %s5899_s26  ;;  %5698 = vmatmul.mubr.msk.f32.vlgmr.msra.gmra.mxu0 %vm465_vm6, %v5695_v47 }
  0xe8   : > { %v6378_v53 = vpop.permute.xlu0 %1575  ;;  %v1767_v55 = vpop.permute.xlu1 %1766  ;;  %1856 = vmatprep.mubr.f32.mxu0 %v5893_v16 }
  0xe9   : > { %v6384_v58 = vsel %vm1577_vm1, %v1574_v43, %v6378_v53 }
  0xea   : > { %5159 = vrot.lane.b32.xlu0 %v6200_v2, %s5900_s27  ;;  %5699 = vmatprep.subr.msk.mxu1 %vm1566_vm8, %v6384_v58  ;;  %vm6994_vm8 = vcmask 449536  }
  0xeb   : > { %5341 = vrot.lane.b32.xlu1 %v6200_v2, %s5901_s28  ;;  %5700 = vmatpush1.msk.msra.mxu1 %vm1565_vm11, %v6387_v62  ;;  %v5702_v2 = vld [vmem:[%s6989_s1 + $0x38] sm:$0xff]  ;;  %vm1958_vm11 = vcmp.eq.s32.totalorder %v1948_v13, 1 }
  0xec   : > { %v1769_v1 = vpop.permute.xlu0 %1768  ;;  %v1765_v4 = vpop.permute.xlu1 %1764  ;;  %5701 = vmatmul.mubr.msk.f32.vlgmr.msra.gmra.mxu1 %vm465_vm6, %v5695_v47  ;;  %v2137_v47 = vsel %vm2136_vm12, 1, %v5905_v25 }
  0xed   : > { %v6400_v8 = vsel %vm6996_vm13, %v1767_v55, %v1769_v1  ;;  %v1775_v9 = vsel %vm6996_vm13, %v1765_v4, %v1767_v55  ;;  %1927 = vmatprep.mubr.f32.mxu1 %v5893_v16  ;;  %v2145_v55 = vrot.slane %v2137_v47, %v6113_v24  ;;  %v2153_v7 = vrot.slane %v2137_v47, %v6126_v34 }
  0xee   : > { %5703 = vmatprep.subr.msk.mxu0 %vm1761_vm0, %v6400_v8  ;;  %vm1957_vm0 = vcmp.eq.s32.totalorder %v1944_v30, 1  ;;  %v2149_v13 = vrot.slane %v2137_v47, %v6134_v39 }
  0xef   : > { %5704 = vmatpush1.msk.msra.mxu0 %vm1760_vm2, %v1775_v9  ;;  %vm1960_vm2 = vcmp.eq.s32.totalorder %v1956_v38, 1  ;;  %vm2155_vm12 = vcmp.eq.s32.totalorder %v2145_v55, 1 }
  0xf0   : > { %v1771_v11 = vpop.permute.xlu0 %1770  ;;  %v6409_v18 = vpop.permute.xlu1 %1772  ;;  %5705 = vmatmul.mubr.msk.f32.vlgmr.msra.gmra.mxu0 %vm465_vm6, %v5702_v2 }
  0xf1   : > { %v6413_v12 = vsel %vm6996_vm13, %v1769_v1, %v1771_v11  ;;  %v6417_v20 = vsel %vm6996_vm13, %v1771_v11, %v6409_v18  ;;  %2053 = vmatprep.mubr.f32.mxu0 %v5893_v16  ;;  %v2141_v1 = vrot.slane %v2137_v47, %v6116_v27  ;;  %v2528_v47 = vand.u32 36, %v6105_v19 }
  0xf2   : > { %5706 = vmatprep.subr.msk.mxu1 %vm1763_vm3, %v6417_v20  ;;  %vm1959_vm3 = vcmp.eq.s32.totalorder %v1952_v45, 1 }
  0xf3   : > { %5707 = vmatpush1.msk.msra.mxu1 %vm1762_vm5, %v6413_v12  ;;  %vm2333_vm5 = vcmp.eq.s32.totalorder %v2332_v52, 4 }
  0xf4   : > { %v1964_v31 = vpop.permute.xlu0 %1963  ;;  %v1966_v33 = vpop.permute.xlu1 %1965  ;;  %5708 = vmatmul.mubr.msk.f32.vlgmr.msra.gmra.mxu1 %vm465_vm6, %v5702_v2  ;;  %v2334_v11 = vsel %vm2333_vm5, 1, %v5905_v25 }
  0xf5   : > { %v6426_v36 = vsel %vm6994_vm8, %v1964_v31, %v1966_v33  ;;  %2124 = vmatprep.mubr.f32.mxu1 %v5893_v16 }
  0xf6   : > { %5710 = vmatprep.subr.msk.mxu0 %vm1958_vm11, %v6426_v36  ;;  %vm2168_vm11 = vcmask 72704  }
  0xf8   : > { %v1962_v43 = vpop.permute.xlu0 %1961  ;;  %v1968_v44 = vpop.permute.xlu1 %1967 }
  0xf9   : > { %v1972_v51 = vsel %vm6994_vm8, %v1962_v43, %v1964_v31  ;;  %v6449_v6 = vsel %vm6994_vm8, %v1966_v33, %v1968_v44  ;;  %v5716_v31 = vld [vmem:[%s6989_s1 + $0x48] sm:$0xff]  ;;  %v2342_v33 = vrot.slane %v2334_v11, %v6113_v24 }
  0xfa   : > { %5711 = vmatpush1.msk.msra.mxu0 %vm1957_vm0, %v1972_v51  ;;  %vm2154_vm0 = vcmp.eq.s32.totalorder %v2141_v1, 1 }
  0xfb   : > { %5712 = vmatmul.mubr.msk.f32.vlgmr.msra.gmra.mxu0 %vm465_vm6, %v5709_v50  ;;  %vm2352_vm5 = vcmp.eq.s32.totalorder %v2342_v33, 1 }
  0xfc   : > { %v6440_v57 = vpop.permute.xlu0 %1969  ;;  %v2161_v63 = vpop.permute.xlu1 %2160  ;;  %2250 = vmatprep.mubr.f32.mxu0 %v5893_v16 }
  0xfd   : > { %v6446_v4 = vsel %vm6994_vm8, %v1968_v44, %v6440_v57 }
  0xfe   : > { %5713 = vmatprep.subr.msk.mxu1 %vm1960_vm2, %v6446_v4  ;;  %vm2157_vm2 = vcmp.eq.s32.totalorder %v2153_v7, 1 }
  0xff   : > { %5714 = vmatpush1.msk.msra.mxu1 %vm1959_vm3, %v6449_v6  ;;  %vm2156_vm3 = vcmp.eq.s32.totalorder %v2149_v13, 1  ;;  %v5723_v13 = vld [vmem:[%s6989_s1 + $0x50] sm:$0xff] }
 0x100   : > { %v2163_v9 = vpop.permute.xlu0 %2162  ;;  %v2159_v2 = vpop.permute.xlu1 %2158  ;;  %5715 = vmatmul.mubr.msk.f32.vlgmr.msra.gmra.mxu1 %vm465_vm6, %v5709_v50  ;;  %v2338_v50 = vrot.slane %v2334_v11, %v6116_v27 }
 0x101   : > { %v2170_v29 = vsel %vm2168_vm11, %v2161_v63, %v2163_v9  ;;  %v2169_v30 = vsel %vm2168_vm11, %v2159_v2, %v2161_v63  ;;  %2321 = vmatprep.mubr.f32.mxu1 %v5893_v16  ;;  %v2350_v63 = vrot.slane %v2334_v11, %v6126_v34 }
 0x102   : > { %5717 = vmatprep.subr.msk.mxu0 %vm2155_vm12, %v2170_v29  ;;  %vm2529_vm12 = vcmp.eq.s32.totalorder %v2528_v47, 36 }
 0x103   : > { %5718 = vmatpush1.msk.msra.mxu0 %vm2154_vm0, %v2169_v30  ;;  %v2530_v2 = vsel %vm2529_vm12, 1, %v5905_v25  ;;  %v2725_v30 = vand.u32 16, %v6105_v19  ;;  %vm2354_vm0 = vcmp.eq.s32.totalorder %v2350_v63, 1 }
 0x104   : > { %v2165_v38 = vpop.permute.xlu0 %2164  ;;  %v2167_v43 = vpop.permute.xlu1 %2166  ;;  %5719 = vmatmul.mubr.msk.f32.vlgmr.msra.gmra.mxu0 %vm465_vm6, %v5716_v31 }
 0x105   : > { %v2171_v44 = vsel %vm2168_vm11, %v2163_v9, %v2165_v38  ;;  %v2172_v45 = vsel %vm2168_vm11, %v2165_v38, %v2167_v43  ;;  %2446 = vmatprep.mubr.f32.mxu0 %v5893_v16  ;;  %vm2351_vm11 = vcmp.eq.s32.totalorder %v2338_v50, 1  ;;  %v2346_v9 = vrot.slane %v2334_v11, %v6134_v39 }
 0x106   : > { %5720 = vmatprep.subr.msk.mxu1 %vm2157_vm2, %v2172_v45  ;;  %v2534_v11 = vrot.slane %v2530_v2, %v6116_v27  ;;  %v2546_v45 = vrot.slane %v2530_v2, %v6126_v34 }
 0x107   : > { %5721 = vmatpush1.msk.msra.mxu1 %vm2156_vm3, %v2171_v44  ;;  %vm2353_vm2 = vcmp.eq.s32.totalorder %v2346_v9, 1  ;;  %vm2561_vm3 = vcmask 56320  }
 0x108   : > { %v2358_v51 = vpop.permute.xlu0 %2357  ;;  %v2360_v52 = vpop.permute.xlu1 %2359  ;;  %5722 = vmatmul.mubr.msk.f32.vlgmr.msra.gmra.mxu1 %vm465_vm6, %v5716_v31  ;;  %v2538_v31 = vrot.slane %v2530_v2, %v6113_v24 }
 0x109   : > { %v2366_v55 = vsel %vm465_vm6, %v2358_v51, %v2360_v52  ;;  %2517 = vmatprep.mubr.f32.mxu1 %v5893_v16 }
 0x10a   : > { %5724 = vmatprep.subr.msk.mxu0 %vm2352_vm5, %v2366_v55  ;;  %vm2726_vm5 = vcmp.eq.s32.totalorder %v2725_v30, 16  ;;  %vm2548_vm12 = vcmp.eq.s32.totalorder %v2538_v31, 1  ;;  %v3073_v30 = vand.u32 32, %v6105_v19 }
 0x10c   : > { %v2356_v1 = vpop.permute.xlu0 %2355  ;;  %v2362_v7 = vpop.permute.xlu1 %2361 }
 0x10d   : > { %v2365_v29 = vsel %vm465_vm6, %v2356_v1, %v2358_v51  ;;  %v2367_v44 = vsel %vm465_vm6, %v2360_v52, %v2362_v7  ;;  %v2542_v51 = vrot.slane %v2530_v2, %v6134_v39  ;;  %v5730_v52 = vld [vmem:[%s6989_s1 + $0x58] sm:$0xff]  ;;  %v2727_v1 = vsel %vm2726_vm5, 1, %v5905_v25 }
 0x10e   : > { %5725 = vmatpush1.msk.msra.mxu0 %vm2351_vm11, %v2365_v29  ;;  %vm2547_vm11 = vcmp.eq.s32.totalorder %v2534_v11, 1  ;;  %v2735_v2 = vrot.slane %v2727_v1, %v6113_v24  ;;  %vm6995_vm5 = vcmask 7168   ;;  %v2731_v31 = vrot.slane %v2727_v1, %v6116_v27 }
 0x10f   : > { %5726 = vmatmul.mubr.msk.f32.vlgmr.msra.gmra.mxu0 %vm465_vm6, %v5723_v13 }
 0x110   : > { %v2364_v33 = vpop.permute.xlu0 %2363  ;;  %v2554_v38 = vpop.permute.xlu1 %2553  ;;  %2643 = vmatprep.mubr.f32.mxu0 %v5893_v16 }
 0x111   : > { %v2368_v43 = vsel %vm465_vm6, %v2362_v7, %v2364_v33 }
 0x112   : > { %5727 = vmatprep.subr.msk.mxu1 %vm2354_vm0, %v2368_v43  ;;  %vm2550_vm0 = vcmp.eq.s32.totalorder %v2546_v45, 1  ;;  %v2743_v43 = vrot.slane %v2727_v1, %v6126_v34  ;;  %v5737_v45 = vld [vmem:[%s6989_s1 + $0x60] sm:$0xff] }
 0x113   : > { %5728 = vmatpush1.msk.msra.mxu1 %vm2353_vm2, %v2367_v44  ;;  %vm2549_vm2 = vcmp.eq.s32.totalorder %v2542_v51, 1 }
 0x114   : > { %v2556_v47 = vpop.permute.xlu0 %2555  ;;  %v2552_v50 = vpop.permute.xlu1 %2551  ;;  %5729 = vmatmul.mubr.msk.f32.vlgmr.msra.gmra.mxu1 %vm465_vm6, %v5723_v13 }
 0x115   : > { %v2563_v55 = vsel %vm2561_vm3, %v2554_v38, %v2556_v47  ;;  %v2562_v63 = vsel %vm2561_vm3, %v2552_v50, %v2554_v38  ;;  %2714 = vmatprep.mubr.f32.mxu1 %v5893_v16 }
 0x116   : > { %5731 = vmatprep.subr.msk.mxu0 %vm2548_vm12, %v2563_v55  ;;  %vm2745_vm12 = vcmp.eq.s32.totalorder %v2735_v2, 1 }
 0x117   : > { %5732 = vmatpush1.msk.msra.mxu0 %vm2547_vm11, %v2562_v63  ;;  %vm3074_vm11 = vcmp.eq.s32.totalorder %v3073_v30, 32  ;;  %v3271_v63 = vand.u32 24, %v6105_v19 }
 0x118   : > { %v2558_v7 = vpop.permute.xlu0 %2557  ;;  %v2560_v9 = vpop.permute.xlu1 %2559  ;;  %5733 = vmatmul.mubr.msk.f32.vlgmr.msra.gmra.mxu0 %vm465_vm6, %v5730_v52  ;;  %v3075_v50 = vsel %vm3074_vm11, 1, %v5905_v25 }
 0x119   : > { %v2564_v13 = vsel %vm2561_vm3, %v2556_v47, %v2558_v7  ;;  %v2565_v29 = vsel %vm2561_vm3, %v2558_v7, %v2560_v9  ;;  %2840 = vmatprep.mubr.f32.mxu0 %v5893_v16  ;;  %vm2744_vm3 = vcmp.eq.s32.totalorder %v2731_v31, 1  ;;  %v2739_v47 = vrot.slane %v2727_v1, %v6134_v39  ;;  %v5877_v9 = vld [vmem:[%s5987_s16 + $0x8] sm:$0xff] }
 0x11a   : > { %5734 = vmatprep.subr.msk.mxu1 %vm2550_vm0, %v2565_v29  ;;  %vm2747_vm0 = vcmp.eq.s32.totalorder %v2743_v43, 1  ;;  %v5744_v1 = vld [vmem:[%s6989_s1 + $0x68] sm:$0xff]  ;;  %v3079_v2 = vrot.slane %v3075_v50, %v6116_v27  ;;  %vm6526_vm11 = vcmp.eq.s32.totalorder %v3271_v63, 24 }
 0x11b   : > { %5735 = vmatpush1.msk.msra.mxu1 %vm2549_vm2, %v2564_v13  ;;  %vm2746_vm2 = vcmp.eq.s32.totalorder %v2739_v47, 1  ;;  %v5879_v47 = vld [vmem:[%s5987_s16 + $0x18] sm:$0xff] }
 0x11c   : > { %v2751_v33 = vpop.permute.xlu0 %2750  ;;  %5736 = vmatmul.mubr.msk.f32.vlgmr.msra.gmra.mxu1 %vm465_vm6, %v5730_v52  ;;  %v3083_v52 = vrot.slane %v3075_v50, %v6113_v24  ;;  %vm3092_vm8 = vcmp.eq.s32.totalorder %v3079_v2, 1  ;;  %v3468_v2 = vand.u32 8, %v6105_v19 }
 0x11d   : > { %v2753_v38 = vpop.permute.xlu1 %2752  ;;  %2911 = vmatprep.mubr.f32.mxu1 %v5893_v16 }
 0x11e   : > { %v2760_v11 = vsel %vm6995_vm5, %v2751_v33, %v2753_v38 }
 0x11f   : > { %5738 = vmatprep.subr.msk.mxu0 %vm2745_vm12, %v2760_v11  ;;  %vm3107_vm12 = vcmask 1039360   ;;  %v5878_v11 = vld [vmem:[%s5987_s16 + $0x20] sm:$0xff] }
 0x120   : > { %v2749_v44 = vpop.permute.xlu0 %2748 }
 0x121   : > { %v2759_v51 = vsel %vm6995_vm5, %v2749_v44, %v2751_v33  ;;  %v2755_v55 = vpop.permute.xlu1 %2754 }
 0x122   : > { %5739 = vmatpush1.msk.msra.mxu0 %vm2744_vm3, %v2759_v51  ;;  %vm6531_vm3 = vcmp.eq.s32.totalorder %v3083_v52, 1  ;;  %v5747_v51 = vld [vmem:[%s6989_s1 + $0x70] sm:$0xff] }
 0x123   : > { %5740 = vmatmul.mubr.msk.f32.vlgmr.msra.gmra.mxu0 %vm465_vm6, %v5737_v45  ;;  %2957 = vmatprep.subr.mxu0 %v6001_v15  ;;  %v2761_v15 = vsel %vm6995_vm5, %v2753_v38, %v2755_v55  ;;  %v3091_v38 = vrot.slane %v3075_v50, %v6126_v34 }
 0x124   : > { %v2757_v7 = vpop.permute.xlu0 %2756  ;;  %2958 = vmatpush1.msra.mxu0 %v5877_v9  ;;  %2991 = vmatprep.mubr.f32.mxu0 %v5893_v16 }
 0x125   : > { %v2762_v13 = vsel %vm6995_vm5, %v2755_v55, %v2757_v7  ;;  %v3100_v29 = vpop.permute.xlu1 %3099  ;;  %v3087_v55 = vrot.slane %v3075_v50, %v6134_v39 }
 0x126   : > { %5741 = vmatprep.subr.msk.mxu1 %vm2747_vm0, %v2762_v13  ;;  %vm3095_vm0 = vcmp.eq.s32.totalorder %v3091_v38, 1 }
 0x127   : > { %5742 = vmatpush1.msk.msra.mxu1 %vm2746_vm2, %v2761_v15  ;;  %5745 = vmatmul.mubr.msk.f32.vlgmr.msra.gmra.mxu0 %vm465_vm6, %v5744_v1  ;;  %vm3094_vm2 = vcmp.eq.s32.totalorder %v3087_v55, 1 }
 0x128   : > { %v3102_v33 = vpop.permute.xlu0 %3101  ;;  %5743 = vmatmul.mubr.msk.f32.vlgmr.msra.gmra.mxu1 %vm465_vm6, %v5737_v45  ;;  %3028 = vmatprep.subr.mxu1 %v5878_v11  ;;  %v3273_v45 = vsel %vm6526_vm11, 1, %v5905_v25  ;;  %v5754_v11 = vld [vmem:[%s6989_s1 + $0x78] sm:$0xff] }
 0x129   : > { %v3109_v43 = vsel %vm3107_vm12, %v3100_v29, %v3102_v33  ;;  %v3098_v44 = vpop.permute.xlu1 %3097  ;;  %3029 = vmatpush1.msra.mxu1 %v5879_v47  ;;  %3062 = vmatprep.mubr.f32.mxu1 %v5893_v16  ;;  %v3281_v50 = vrot.slane %v3273_v45, %v6113_v24  ;;  %v3289_v31 = vrot.slane %v3273_v45, %v6126_v34 }
 0x12a   : > { %v3108_v63 = vsel %vm3107_vm12, %v3098_v44, %v3100_v29  ;;  %5748 = vmatprep.subr.msk.mxu0 %vm6531_vm3, %v3109_v43  ;;  %3189 = vmatprep.mubr.f32.mxu0 %v5893_v16  ;;  %vm3469_vm3 = vcmp.eq.s32.totalorder %v3468_v2, 8  ;;  %v3285_v38 = vrot.slane %v3273_v45, %v6134_v39 }
 0x12b   : > { %5749 = vmatpush1.msk.msra.mxu0 %vm3092_vm8, %v3108_v63  ;;  %vm3304_vm8 = vcmask 990208   ;;  %vm3291_vm11 = vcmp.eq.s32.totalorder %v3281_v50, 1  ;;  %v3470_v43 = vsel %vm3469_vm3, 1, %v5905_v25 }
 0x12c   : > { %v3104_v52 = vpop.permute.xlu0 %3103  ;;  %5746 = vmatmul.mubr.msk.f32.vlgmr.msra.gmra.mxu1 %vm465_vm6, %v5744_v1  ;;  %5750 = vmatmul.mubr.msk.f32.vlgmr.msra.gmra.mxu0 %vm465_vm6, %v5747_v51  ;;  %v3277_v1 = vrot.slane %v3273_v45, %v6116_v27  ;;  %v3478_v55 = vrot.slane %v3470_v43, %v6113_v24 }
 0x12d   : > { %v3110_v7 = vsel %vm3107_vm12, %v3102_v33, %v3104_v52  ;;  %v3106_v9 = vpop.permute.xlu1 %3105  ;;  %3260 = vmatprep.mubr.f32.mxu1 %v5893_v16  ;;  %3386 = vmatprep.mubr.f32.mxu0 %v5893_v16 }
 0x12e   : > { %v3111_v13 = vsel %vm3107_vm12, %v3104_v52, %v3106_v9  ;;  %vm3290_vm5 = vcmp.eq.s32.totalorder %v3277_v1, 1  ;;  %vm3293_vm12 = vcmp.eq.s32.totalorder %v3289_v31, 1  ;;  %v3474_v52 = vrot.slane %v3470_v43, %v6116_v27 }
 0x12f   : > { %5751 = vmatprep.subr.msk.mxu1 %vm3095_vm0, %v3111_v13  ;;  %vm3292_vm0 = vcmp.eq.s32.totalorder %v3285_v38, 1  ;;  %v3486_v13 = vrot.slane %v3470_v43, %v6126_v34  ;;  %v3482_v31 = vrot.slane %v3470_v43, %v6134_v39 }
 0x130   : > { %5752 = vmatpush1.msk.msra.mxu1 %vm3094_vm2, %v3110_v7  ;;  %v3297_v29 = vpop.permute.xlu0 %3296  ;;  %vm3487_vm3 = vcmp.eq.s32.totalorder %v3474_v52, 1 }
 0x131   : > { %5753 = vmatmul.mubr.msk.f32.vlgmr.msra.gmra.mxu1 %vm465_vm6, %v5747_v51  ;;  %v3299_v15 = vpop.permute.xlu1 %3298  ;;  %v3665_v51 = vand.u32 40, %v6105_v19  ;;  %v6579_v19 = vld [vmem:[%s5957_s25] sm:$0xf]  ;;  %vm3489_vm13 = vcmp.eq.s32.totalorder %v3482_v31, 1 }
 0x132   : > { %v3306_v30 = vsel %vm3304_vm8, %v3297_v29, %v3299_v15  ;;  %3457 = vmatprep.mubr.f32.mxu1 %v5893_v16  ;;  %v3862_v9 = vand.u32 22, %v6579_v19  ;;  %v4044_v1 = vand.u32 6, %v6579_v19 }
 0x133   : > { %5755 = vmatprep.subr.msk.mxu0 %vm3291_vm11, %v3306_v30  ;;  %vm3666_vm2 = vcmp.eq.s32.totalorder %v3665_v51, 40  ;;  %vm3488_vm11 = vcmp.eq.s32.totalorder %v3478_v55, 1  ;;  %v5761_v30 = vld [vmem:[%s6989_s1 + $0x80] sm:$0xff] }
 0x134   : > { %v3295_v33 = vpop.permute.xlu0 %3294 }
 0x135   : > { %v3305_v44 = vsel %vm3304_vm8, %v3295_v33, %v3297_v29  ;;  %v3301_v47 = vpop.permute.xlu1 %3300  ;;  %v3667_v33 = vsel %vm3666_vm2, 1, %v5905_v25  ;;  %vm3698_vm2 = vcmask 973824  }
 0x136   : > { %5756 = vmatpush1.msk.msra.mxu0 %vm3290_vm5, %v3305_v44  ;;  %v3307_v7 = vsel %vm3304_vm8, %v3299_v15, %v3301_v47  ;;  %vm3501_vm5 = vcmask 982016   ;;  %v3675_v44 = vrot.slane %v3667_v33, %v6113_v24  ;;  %v3671_v52 = vrot.slane %v3667_v33, %v6116_v27 }
 0x137   : > { %5757 = vmatmul.mubr.msk.f32.vlgmr.msra.gmra.mxu0 %vm465_vm6, %v5754_v11 }
 0x138   : > { %v3303_v63 = vpop.permute.xlu0 %3302  ;;  %3583 = vmatprep.mubr.f32.mxu0 %v5893_v16 }
 0x139   : > { %v3308_v45 = vsel %vm3304_vm8, %v3301_v47, %v3303_v63  ;;  %v3494_v50 = vpop.permute.xlu1 %3493  ;;  %vm3863_vm8 = vcmp.eq.s32.totalorder %v3862_v9, 22  ;;  %v4226_v47 = vand.u32 38, %v6579_v19 }
 0x13a   : > { %5758 = vmatprep.subr.msk.mxu1 %vm3293_vm12, %v3308_v45  ;;  %vm3490_vm12 = vcmp.eq.s32.totalorder %v3486_v13, 1  ;;  %v3864_v55 = vsel %vm3863_vm8, 1, %v5905_v25  ;;  %v4408_v13 = vand.u32 18, %v6579_v19 }
 0x13b   : > { %5759 = vmatpush1.msk.msra.mxu1 %vm3292_vm0, %v3307_v7  ;;  %vm4045_vm0 = vcmp.eq.s32.totalorder %v4044_v1, 6  ;;  %v3872_v7 = vrot.slane %v3864_v55, %v6113_v24  ;;  %v3868_v9 = vrot.slane %v3864_v55, %v6116_v27 }
 0x13c   : > { %v3496_v2 = vpop.permute.xlu0 %3495  ;;  %5760 = vmatmul.mubr.msk.f32.vlgmr.msra.gmra.mxu1 %vm465_vm6, %v5754_v11  ;;  %v6602_v45 = vsel %vm4045_vm0, 1, %v5905_v25 }
 0x13d   : > { %v3503_v29 = vsel %vm3501_vm5, %v3494_v50, %v3496_v2  ;;  %v3492_v15 = vpop.permute.xlu1 %3491  ;;  %3654 = vmatprep.mubr.f32.mxu1 %v5893_v16  ;;  %vm6619_vm8 = vcmp.eq.s32.totalorder %v3868_v9, 1 }
 0x13e   : > { %v3502_v11 = vsel %vm3501_vm5, %v3492_v15, %v3494_v50  ;;  %5762 = vmatprep.subr.msk.mxu0 %vm3488_vm11, %v3503_v29  ;;  %vm3685_vm11 = vcmp.eq.s32.totalorder %v3675_v44, 1  ;;  %v4054_v29 = vrot.slane %v6602_v45, %v6113_v24  ;;  %v3683_v15 = vrot.slane %v3667_v33, %v6126_v34 }
 0x13f   : > { %5763 = vmatpush1.msk.msra.mxu0 %vm3487_vm3, %v3502_v11  ;;  %vm4227_vm3 = vcmp.eq.s32.totalorder %v4226_v47, 38  ;;  %v3679_v44 = vrot.slane %v3667_v33, %v6134_v39  ;;  %v4050_v47 = vrot.slane %v6602_v45, %v6116_v27 }
 0x140   : > { %v3498_v38 = vpop.permute.xlu0 %3497  ;;  %5764 = vmatmul.mubr.msk.f32.vlgmr.msra.gmra.mxu0 %vm465_vm6, %v5761_v30  ;;  %v6614_v31 = vsel %vm4227_vm3, 1, %v5905_v25  ;;  %vm6633_vm0 = vcmp.eq.s32.totalorder %v4054_v29, 1 }
 0x141   : > { %v3504_v43 = vsel %vm3501_vm5, %v3496_v2, %v3498_v38  ;;  %v3500_v51 = vpop.permute.xlu1 %3499  ;;  %3780 = vmatprep.mubr.f32.mxu0 %v5893_v16  ;;  %v4236_v33 = vrot.slane %v6614_v31, %v6113_v24  ;;  %vm6650_vm3 = vcmp.eq.s32.totalorder %v3679_v44, 1 }
 0x142   : > { %v3505_v63 = vsel %vm3501_vm5, %v3498_v38, %v3500_v51  ;;  %vm3882_vm5 = vcmp.eq.s32.totalorder %v3872_v7, 1  ;;  %v4590_v7 = vand.u32 2, %v6579_v19 }
 0x143   : > { %5765 = vmatprep.subr.msk.mxu1 %vm3490_vm12, %v3505_v63  ;;  %v3880_v63 = vrot.slane %v3864_v55, %v6126_v34  ;;  %vm6628_vm12 = vcmp.eq.s32.totalorder %v4408_v13, 18  ;;  %v3876_v13 = vrot.slane %v3864_v55, %v6134_v39  ;;  %v4062_v55 = vrot.slane %v6602_v45, %v6126_v34 }
 0x144   : > { %5766 = vmatpush1.msk.msra.mxu1 %vm3489_vm13, %v3504_v43  ;;  %v3691_v50 = vpop.permute.xlu0 %3690  ;;  %vm3684_vm13 = vcmp.eq.s32.totalorder %v3671_v52, 1 }
 0x145   : > { %5767 = vmatmul.mubr.msk.f32.vlgmr.msra.gmra.mxu1 %vm465_vm6, %v5761_v30  ;;  %v3693_v2 = vpop.permute.xlu1 %3692  ;;  %v5768_v30 = vld [vmem:[%s6989_s1 + $0x88] sm:$0xff] }
 0x146   : > { %v3700_v1 = vsel %vm3698_vm2, %v3691_v50, %v3693_v2  ;;  %3851 = vmatprep.mubr.f32.mxu1 %v5893_v16 }
 0x147   : > { %5769 = vmatprep.subr.msk.mxu0 %vm3685_vm11, %v3700_v1  ;;  %vm6641_vm11 = vcmp.eq.s32.totalorder %v3683_v15, 1 }
 0x148   : > { %v3689_v11 = vpop.permute.xlu0 %3688 }
 0x149   : > { %v3699_v43 = vsel %vm3698_vm2, %v3689_v11, %v3691_v50  ;;  %v3695_v51 = vpop.permute.xlu1 %3694 }
 0x14a   : > { %5770 = vmatpush1.msk.msra.mxu0 %vm3684_vm13, %v3699_v43  ;;  %vm6657_vm13 = vcmp.eq.s32.totalorder %v4050_v47, 1  ;;  %v4772_v43 = vand.u32 34, %v6579_v19  ;;  %v3701_v52 = vsel %vm3698_vm2, %v3693_v2, %v3695_v51  ;;  %v5796_v47 = vld [vmem:[%s6989_s1 + $0xa8] sm:$0xff] }
 0x14b   : > { %5771 = vmatmul.mubr.msk.f32.vlgmr.msra.gmra.mxu0 %vm465_vm6, %v5768_v30  ;;  %5776 = vmatprep.subr.msk.mxu0 %vm3882_vm5, %v6183_v60  ;;  %v5775_v60 = vld [vmem:[%s6989_s1 + $0x90] sm:$0xff]  ;;  %vm6672_vm5 = vcmp.eq.s32.totalorder %v3880_v63, 1  ;;  %v4058_v63 = vrot.slane %v6602_v45, %v6134_v39 }
 0x14c   : > { %v3697_v1 = vpop.permute.xlu0 %3696  ;;  %5777 = vmatpush1.msk.msra.mxu0 %vm6619_vm8, %v6147_v46  ;;  %3962 = vmatprep.mubr.f32.mxu0 %v5893_v16  ;;  %v6666_v46 = vsel %vm6628_vm12, 1, %v5905_v25  ;;  %vm6676_vm8 = vcmp.eq.s32.totalorder %v4590_v7, 2  ;;  %vm6684_vm12 = vcmp.eq.s32.totalorder %v4236_v33, 1  ;;  %v4244_v7 = vrot.slane %v6614_v31, %v6126_v34 }
 0x14d   : > { %v3702_v11 = vsel %vm3698_vm2, %v3695_v51, %v3697_v1  ;;  %v3886_v38 = vpop.permute.xlu1 %3885  ;;  %5783 = vmatprep.subr.msk.mxu0 %vm6633_vm0, %v6175_v56  ;;  %v4232_v56 = vrot.slane %v6614_v31, %v6116_v27  ;;  %vm6695_vm0 = vcmp.eq.s32.totalorder %v3876_v13, 1  ;;  %v4418_v51 = vrot.slane %v6666_v46, %v6113_v24 }
 0x14e   : > { %5772 = vmatprep.subr.msk.mxu1 %vm6641_vm11, %v3702_v11  ;;  %v3887_v9 = vsel %vm403_vm7, %v6179_v59, %v3886_v38  ;;  %vm4066_vm2 = vcmp.eq.s32.totalorder %v4062_v55, 1  ;;  %v6712_v33 = vsel %vm6676_vm8, 1, %v5905_v25  ;;  %vm6724_vm7 = vcmp.eq.s32.totalorder %v4772_v43, 34  ;;  %v5789_v55 = vld [vmem:[%s6989_s1 + $0xa0] sm:$0xff] }
 0x14f   : > { %5773 = vmatpush1.msk.msra.mxu1 %vm6650_vm3, %v3701_v52  ;;  %5778 = vmatmul.mubr.msk.f32.vlgmr.msra.gmra.mxu0 %vm465_vm6, %v5775_v60  ;;  %vm4065_vm11 = vcmp.eq.s32.totalorder %v4058_v63, 1  ;;  %vm4428_vm3 = vcmp.eq.s32.totalorder %v4418_v51, 1  ;;  %v4600_v29 = vrot.slane %v6712_v33, %v6113_v24  ;;  %v6747_v15 = vsel %vm6724_vm7, 1, %v5905_v25  ;;  %v5803_v63 = vld [vmem:[%s6989_s1 + $0xb0] sm:$0xff] }
 0x150   : > { %5784 = vmatpush1.msk.msra.mxu0 %vm6657_vm13, %v6129_v37  ;;  %v4068_v45 = vpop.permute.xlu0 %4067  ;;  %5774 = vmatmul.mubr.msk.f32.vlgmr.msra.gmra.mxu1 %vm465_vm6, %v5768_v30  ;;  %v5782_v37 = vld [vmem:[%s6989_s1 + $0x98] sm:$0xff]  ;;  %v4954_v30 = vand.u32 26, %v6579_v19  ;;  %vm4248_vm13 = vcmp.eq.s32.totalorder %v4244_v7, 1  ;;  %v5318_v52 = vand.u32 42, %v6579_v19 }
 0x151   : > { %v4069_v50 = vsel %vm450_vm4, %v6157_v49, %v4068_v45  ;;  %5779 = vmatprep.subr.msk.mxu1 %vm6672_vm5, %v3887_v9  ;;  %5790 = vmatprep.subr.msk.mxu0 %vm6684_vm12, %v6236_v23  ;;  %v4250_v13 = vpop.permute.xlu1 %4249  ;;  %vm4245_vm4 = vcmp.eq.s32.totalorder %v4232_v56, 1  ;;  %v4414_v49 = vrot.slane %v6666_v46, %v6116_v27  ;;  %v4240_v23 = vrot.slane %v6614_v31, %v6134_v39  ;;  %v5810_v45 = vld [vmem:[%s6989_s1 + $0xb8] sm:$0xff] }
 0x152   : > { %5780 = vmatpush1.msk.msra.mxu1 %vm6695_vm0, %v6187_v61  ;;  %4144 = vmatprep.mubr.f32.mxu0 %v5893_v16  ;;  %v4426_v61 = vrot.slane %v6666_v46, %v6126_v34  ;;  %v4251_v31 = vsel %vm789_vm15, %v6227_v14, %v4250_v13  ;;  %vm6756_vm5 = vcmp.eq.s32.totalorder %v4954_v30, 26  ;;  %vm4610_vm12 = vcmp.eq.s32.totalorder %v4600_v29, 1 }
 0x153   : > { %5786 = vmatprep.subr.msk.mxu1 %vm4066_vm2, %v4069_v50  ;;  %4033 = vmatprep.mubr.f32.mxu1 %v5893_v16  ;;  %vm4427_vm8 = vcmp.eq.s32.totalorder %v4414_v49, 1  ;;  %vm4247_vm15 = vcmp.eq.s32.totalorder %v4240_v23, 1  ;;  %v4782_v14 = vrot.slane %v6747_v15, %v6113_v24  ;;  %v5817_v50 = vld [vmem:[%s6989_s1 + $0xc0] sm:$0xff] }
 0x154   : > { %5785 = vmatmul.mubr.msk.f32.vlgmr.msra.gmra.mxu0 %vm465_vm6, %v5782_v37  ;;  %5781 = vmatmul.mubr.msk.f32.vlgmr.msra.gmra.mxu1 %vm465_vm6, %v5775_v60  ;;  %v5136_v60 = vand.u32 10, %v6579_v19  ;;  %v4432_v38 = vpop.permute.xlu0 %4431  ;;  %vm4430_vm0 = vcmp.eq.s32.totalorder %v4426_v61, 1 }
 0x155   : > { %5791 = vmatpush1.msk.msra.mxu0 %vm4245_vm4, %v6204_v3  ;;  %5787 = vmatpush1.msk.msra.mxu1 %vm4065_vm11, %v6164_v54  ;;  %v4596_v3 = vrot.slane %v6712_v33, %v6116_v27  ;;  %v4422_v54 = vrot.slane %v6666_v46, %v6134_v39  ;;  %v6777_v46 = vsel %vm6756_vm5, 1, %v5905_v25  ;;  %v4433_v44 = vsel %vm986_vm9, %v6261_v40, %v4432_v38  ;;  %v4614_v1 = vpop.permute.xlu1 %4613 }
 0x156   : > { %5797 = vmatprep.subr.msk.mxu0 %vm4428_vm3, %v6265_v41  ;;  %5793 = vmatprep.subr.msk.mxu1 %vm4248_vm13, %v4251_v31  ;;  %v4608_v41 = vrot.slane %v6712_v33, %v6126_v34  ;;  %vm6786_vm2 = vcmp.eq.s32.totalorder %v5136_v60, 10  ;;  %vm4792_vm4 = vcmp.eq.s32.totalorder %v4782_v14, 1  ;;  %v4964_v40 = vrot.slane %v6777_v46, %v6113_v24 }
 0x157   : > { %4326 = vmatprep.mubr.f32.mxu0 %v5893_v16  ;;  %4215 = vmatprep.mubr.f32.mxu1 %v5893_v16  ;;  %vm4609_vm7 = vcmp.eq.s32.totalorder %v4596_v3, 1  ;;  %vm4429_vm9 = vcmp.eq.s32.totalorder %v4422_v54, 1  ;;  %v6807_v19 = vsel %vm6786_vm2, 1, %v5905_v25  ;;  %v4615_v56 = vsel %vm1183_vm14, %v6300_v0, %v4614_v1 }
 0x158   : > { %5792 = vmatmul.mubr.msk.f32.vlgmr.msra.gmra.mxu0 %vm465_vm6, %v5789_v55  ;;  %5788 = vmatmul.mubr.msk.f32.vlgmr.msra.gmra.mxu1 %vm465_vm6, %v5782_v37  ;;  %vm4612_vm11 = vcmp.eq.s32.totalorder %v4608_v41, 1  ;;  %vm6816_vm3 = vcmp.eq.s32.totalorder %v5318_v52, 42  ;;  %v4796_v51 = vpop.permute.xlu0 %4795  ;;  %v4960_v0 = vrot.slane %v6777_v46, %v6116_v27  ;;  %vm4974_vm14 = vcmp.eq.s32.totalorder %v4964_v40, 1 }
 0x159   : > { %5798 = vmatpush1.msk.msra.mxu0 %vm4427_vm8, %v6249_v32  ;;  %5794 = vmatpush1.msk.msra.mxu1 %vm4247_vm15, %v6233_v22  ;;  %v4778_v32 = vrot.slane %v6747_v15, %v6116_v27  ;;  %v4604_v22 = vrot.slane %v6712_v33, %v6134_v39  ;;  %v5320_v7 = vsel %vm6816_vm3, 1, %v5905_v25  ;;  %v4797_v9 = vsel %vm1380_vm10, %v6335_v21, %v4796_v51  ;;  %v4978_v33 = vpop.permute.xlu1 %4977 }
 0x15a   : > { %5804 = vmatprep.subr.msk.mxu0 %vm4610_vm12, %v6309_v17  ;;  %5800 = vmatprep.subr.msk.mxu1 %vm4430_vm0, %v4433_v44  ;;  %v4790_v17 = vrot.slane %v6747_v15, %v6126_v34  ;;  %vm4973_vm15 = vcmp.eq.s32.totalorder %v4960_v0, 1  ;;  %v5142_v25 = vrot.slane %v6807_v19, %v6116_v27  ;;  %v4968_v21 = vrot.slane %v6777_v46, %v6134_v39 }
 0x15b   : > { %4508 = vmatprep.mubr.f32.mxu0 %v5893_v16  ;;  %4397 = vmatprep.mubr.f32.mxu1 %v5893_v16  ;;  %vm4791_vm13 = vcmp.eq.s32.totalorder %v4778_v32, 1  ;;  %vm4611_vm5 = vcmp.eq.s32.totalorder %v4604_v22, 1  ;;  %v5150_v59 = vrot.slane %v6807_v19, %v6134_v39 }
 0x15c   : > { %5799 = vmatmul.mubr.msk.f32.vlgmr.msra.gmra.mxu0 %vm465_vm6, %v5796_v47  ;;  %5795 = vmatmul.mubr.msk.f32.vlgmr.msra.gmra.mxu1 %vm465_vm6, %v5789_v55  ;;  %vm4794_vm8 = vcmp.eq.s32.totalorder %v4790_v17, 1  ;;  %v5160_v37 = vpop.permute.xlu0 %5159  ;;  %vm5155_vm2 = vcmp.eq.s32.totalorder %v5142_v25, 1 }
 0x15d   : > { %5805 = vmatpush1.msk.msra.mxu0 %vm4609_vm7, %v6280_v48  ;;  %5801 = vmatpush1.msk.msra.mxu1 %vm4429_vm9, %v6269_v42  ;;  %v4786_v42 = vrot.slane %v6747_v15, %v6134_v39  ;;  %v5146_v48 = vrot.slane %v6807_v19, %v6113_v24  ;;  %vm4975_vm7 = vcmp.eq.s32.totalorder %v4968_v21, 1  ;;  %vm5157_vm3 = vcmp.eq.s32.totalorder %v5150_v59, 1 }
 0x15e   : > { %5811 = vmatprep.subr.msk.mxu0 %vm4792_vm4, %v6339_v26  ;;  %5807 = vmatprep.subr.msk.mxu1 %vm4612_vm11, %v4615_v56  ;;  %v4972_v26 = vrot.slane %v6777_v46, %v6126_v34  ;;  %vm7029_vm4 = vcmask 457728  }
 0x15f   : > { %4690 = vmatprep.mubr.f32.mxu0 %v5893_v16  ;;  %4579 = vmatprep.mubr.f32.mxu1 %v5893_v16  ;;  %vm4793_vm12 = vcmp.eq.s32.totalorder %v4786_v42, 1  ;;  %vm5156_vm10 = vcmp.eq.s32.totalorder %v5146_v48, 1 }
 0x160   : > { %5806 = vmatmul.mubr.msk.f32.vlgmr.msra.gmra.mxu0 %vm465_vm6, %v5803_v63  ;;  %5802 = vmatmul.mubr.msk.f32.vlgmr.msra.gmra.mxu1 %vm465_vm6, %v5796_v47  ;;  %vm4976_vm0 = vcmp.eq.s32.totalorder %v4972_v26, 1 }
 0x161   : > { %5812 = vmatpush1.msk.msra.mxu0 %vm4791_vm13, %v6322_v10  ;;  %5808 = vmatpush1.msk.msra.mxu1 %vm4611_vm5, %v6306_v5  ;;  %v5328_v5 = vrot.slane %v5320_v7, %v6113_v24  ;;  %v5154_v10 = vrot.slane %v6807_v19, %v6126_v34  ;;  %v5324_v24 = vrot.slane %v5320_v7, %v6116_v27  ;;  %v5824_v27 = vld [vmem:[%s6989_s1 + $0xc8] sm:$0xff]  ;;  %vm7030_vm5 = vcmask 449536  }
 0x162   : > { %5818 = vmatprep.subr.msk.mxu0 %vm4974_vm14, %v6387_v62  ;;  %5814 = vmatprep.subr.msk.mxu1 %vm4794_vm8, %v4797_v9  ;;  %v4979_v62 = vsel %vm1577_vm1, %v6378_v53, %v4978_v33  ;;  %v5342_v53 = vpop.permute.xlu1 %5341 }
 0x163   : > { %4872 = vmatprep.mubr.f32.mxu0 %v5893_v16  ;;  %4761 = vmatprep.mubr.f32.mxu1 %v5893_v16  ;;  %vm5338_vm1 = vcmp.eq.s32.totalorder %v5328_v5, 1  ;;  %vm5158_vm9 = vcmp.eq.s32.totalorder %v5154_v10, 1  ;;  %vm5337_vm11 = vcmp.eq.s32.totalorder %v5324_v24, 1 }
 0x164   : > { %5813 = vmatmul.mubr.msk.f32.vlgmr.msra.gmra.mxu0 %vm465_vm6, %v5810_v45  ;;  %5809 = vmatmul.mubr.msk.f32.vlgmr.msra.gmra.mxu1 %vm465_vm6, %v5803_v63 }
 0x165   : > { %5819 = vmatpush1.msk.msra.mxu0 %vm4973_vm15, %v6356_v35  ;;  %5815 = vmatpush1.msk.msra.mxu1 %vm4793_vm12, %v6343_v28  ;;  %v5336_v28 = vrot.slane %v5320_v7, %v6126_v34  ;;  %v5161_v35 = vsel %vm7029_vm4, %v6409_v18, %v5160_v37  ;;  %v5332_v34 = vrot.slane %v5320_v7, %v6134_v39  ;;  %v5831_v39 = vld [vmem:[%s6989_s1 + $0xd0] sm:$0xff] }
 0x166   : > { %5825 = vmatprep.subr.msk.mxu0 %vm5156_vm10, %v6413_v12  ;;  %5821 = vmatprep.subr.msk.mxu1 %vm4976_vm0, %v4979_v62 }
 0x167   : > { %5054 = vmatprep.mubr.f32.mxu0 %v5893_v16  ;;  %4943 = vmatprep.mubr.f32.mxu1 %v5893_v16  ;;  %vm5340_vm13 = vcmp.eq.s32.totalorder %v5336_v28, 1  ;;  %vm5339_vm14 = vcmp.eq.s32.totalorder %v5332_v34, 1 }
 0x168   : > { %5820 = vmatmul.mubr.msk.f32.vlgmr.msra.gmra.mxu0 %vm465_vm6, %v5817_v50  ;;  %5816 = vmatmul.mubr.msk.f32.vlgmr.msra.gmra.mxu1 %vm465_vm6, %v5810_v45 }
 0x169   : > { %5826 = vmatpush1.msk.msra.mxu0 %vm5155_vm2, %v6400_v8  ;;  %5822 = vmatpush1.msk.msra.mxu1 %vm4975_vm7, %v6384_v58  ;;  %v5343_v58 = vsel %vm7030_vm5, %v6440_v57, %v5342_v53 }
 0x16a   : > { %5832 = vmatprep.subr.msk.mxu0 %vm5338_vm1, %v6449_v6  ;;  %5828 = vmatprep.subr.msk.mxu1 %vm5158_vm9, %v5161_v35 }
 0x16b   : > { %5236 = vmatprep.mubr.f32.mxu0 %v5893_v16  ;;  %5125 = vmatprep.mubr.f32.mxu1 %v5893_v16 }
 0x16c   : > { %5827 = vmatmul.mubr.msk.f32.vlgmr.msra.gmra.mxu0 %vm465_vm6, %v5824_v27  ;;  %5823 = vmatmul.mubr.msk.f32.vlgmr.msra.gmra.mxu1 %vm465_vm6, %v5817_v50  ;;  %v535_v8 = vpop.f32.mrf.mxu0 }
 0x16d   : > { %5833 = vmatpush1.msk.msra.mxu0 %vm5337_vm11, %v6426_v36  ;;  %5829 = vmatpush1.msk.msra.mxu1 %vm5157_vm3, %v6417_v20 }
 0x16e   : > { %5835 = vmatprep.subr.msk.mxu1 %vm5340_vm13, %v5343_v58  ;;  %5418 = vmatprep.mubr.f32.mxu0 %v5893_v16  ;;  %v537_v18 = vpop.f32.mrf.mxu0 }
 0x16f   : > { %5307 = vmatprep.mubr.f32.mxu1 %v5893_v16 }
 0x170   : > { %5834 = vmatmul.mubr.msk.f32.vlgmr.msra.gmra.mxu0 %vm465_vm6, %v5831_v39  ;;  %5830 = vmatmul.mubr.msk.f32.vlgmr.msra.gmra.mxu1 %vm465_vm6, %v5824_v27 }
 0x171   : > { %5836 = vmatpush1.msk.msra.mxu1 %vm5339_vm14, %v6446_v4  ;;  %5489 = vmatprep.mubr.f32.mxu1 %v5893_v16 }
 0x174   : > { %5837 = vmatmul.mubr.msk.f32.vlgmr.msra.gmra.mxu1 %vm465_vm6, %v5831_v39  ;;  %v680_v20 = vpop.f32.mrf.mxu0  ;;  %vm7033_vm6 = vcmask 7168  }
 0x175   : > { %v606_v12 = vpop.f32.mrf.mxu1  ;;  %v681_v25 = vadd.f32 %v680_v20, %v535_v8  ;;  %vm7034_vm8 = vmmov %vm7033_vm6 }
 0x176   : > { %v682_v57 = vpop.f32.mrf.mxu0 }
 0x177   : > { %v608_v36 = vpop.f32.mrf.mxu1  ;;  %v683_v5 = vadd.f32 %v682_v57, %v537_v18 }
 0x179   : > { %v751_v6 = vpop.f32.mrf.mxu1 }
 0x17a   : > { %v752_v50 = vadd.f32 %v751_v6, %v606_v12 }
 0x17b   : > { %v753_v13 = vpop.f32.mrf.mxu1 }
 0x17c   : > { %v754_v24 = vadd.f32 %v753_v13, %v608_v36 }
 0x17f   : > { %v873_v30 = vpop.f32.mrf.mxu0 }
 0x180   : > { %v949_v37 = vadd.f32 %v873_v30, %v681_v25 }
 0x181   : > { %v875_v49 = vpop.f32.mrf.mxu0 }
 0x182   : > { %v950_v59 = vadd.f32 %v875_v49, %v683_v5 }
 0x184   : > { %v944_v23 = vpop.f32.mrf.mxu1 }
 0x185   : > { %v951_v27 = vadd.f32 %v944_v23, %v752_v50 }
 0x186   : > { %v946_v61 = vpop.f32.mrf.mxu1 }
 0x187   : > { %v952_v34 = vadd.f32 %v946_v61, %v754_v24 }
 0x188   : > { %v1070_v29 = vpop.f32.mrf.mxu0 }
 0x189   : > { %v1146_v53 = vadd.f32 %v1070_v29, %v949_v37 }
 0x18a   : > { %v1072_v15 = vpop.f32.mrf.mxu0 }
 0x18b   : > { %v1147_v58 = vadd.f32 %v1072_v15, %v950_v59 }
 0x18c   : > { %v1141_v31 = vpop.f32.mrf.mxu1 }
 0x18d   : > { %v1148_v18 = vadd.f32 %v1141_v31, %v951_v27 }
 0x18e   : > { %v1143_v55 = vpop.f32.mrf.mxu1 }
 0x18f   : > { %v1149_v57 = vadd.f32 %v1143_v55, %v952_v34 }
 0x193   : > { %v1267_v4 = vpop.f32.mrf.mxu0 }
 0x194   : > { %v1343_v20 = vadd.f32 %v1267_v4, %v1146_v53 }
 0x195   : > { %v1269_v16 = vpop.f32.mrf.mxu0 }
 0x198   : > { %v1338_v11 = vpop.f32.mrf.mxu1 }
 0x199   : > { %v1345_v36 = vadd.f32 %v1338_v11, %v1148_v18 }
 0x19a   : > { %v1340_v38 = vpop.f32.mrf.mxu1 }
 0x19b   : > { %v1346_v13 = vadd.f32 %v1340_v38, %v1149_v57 }
 0x19c   : > { %v1464_v60 = vpop.f32.mrf.mxu0 }
 0x19d   : > { %v1540_v30 = vadd.f32 %v1464_v60, %v1343_v20 }
 0x19e   : > { %v1466_v3 = vpop.f32.mrf.mxu0 }
 0x1a0   : > { %v1535_v54 = vpop.f32.mrf.mxu1 }
 0x1a1   : > { %v1542_v29 = vadd.f32 %v1535_v54, %v1345_v36 }
 0x1a2   : > { %v1537_v41 = vpop.f32.mrf.mxu1 }
 0x1a3   : > { %v1543_v5 = vadd.f32 %v1537_v41, %v1346_v13 }
 0x1a7   : > { %v1661_v14 = vpop.f32.mrf.mxu0 }
 0x1a8   : > { %v1737_v61 = vadd.f32 %v1661_v14, %v1540_v30 }
 0x1a9   : > { %v1663_v46 = vpop.f32.mrf.mxu0 }
 0x1ac   : > { %v1732_v44 = vpop.f32.mrf.mxu1 }
 0x1ad   : > { %v1739_v31 = vadd.f32 %v1732_v44, %v1542_v29 }
 0x1ae   : > { %v1734_v43 = vpop.f32.mrf.mxu1 }
 0x1af   : > { %v1740_v24 = vadd.f32 %v1734_v43, %v1543_v5 }
 0x1b0   : > { %v1858_v47 = vpop.f32.mrf.mxu0 }
 0x1b1   : > { %v1934_v4 = vadd.f32 %v1858_v47, %v1737_v61 }
 0x1b2   : > { %v1860_v52 = vpop.f32.mrf.mxu0 }
 0x1b4   : > { %v1929_v1 = vpop.f32.mrf.mxu1 }
 0x1b5   : > { %v1936_v11 = vadd.f32 %v1929_v1, %v1739_v31 }
 0x1b6   : > { %v1931_v22 = vpop.f32.mrf.mxu1 }
 0x1bb   : > { %v2055_v32 = vpop.f32.mrf.mxu0 }
 0x1bc   : > { %v2131_v60 = vadd.f32 %v2055_v32, %v1934_v4 }
 0x1bd   : > { %v2057_v40 = vpop.f32.mrf.mxu0 }
 0x1c0   : > { %v6898_v17 = vpop.f32.mrf.mxu1 }
 0x1c1   : > { %v2133_v54 = vadd.f32 %v6898_v17, %v1936_v11 }
 0x1c2   : > { %v6902_v56 = vpop.f32.mrf.mxu1 }
 0x1c4   : > { %v6900_v19 = vpop.f32.mrf.mxu0 }
 0x1c5   : > { %v2328_v14 = vadd.f32 %v6900_v19, %v2131_v60 }
 0x1c6   : > { %v6904_v63 = vpop.f32.mrf.mxu0 }
 0x1c8   : > { %v6906_v2 = vpop.f32.mrf.mxu1 }
 0x1ca   : > { %v6910_v0 = vpop.f32.mrf.mxu1 }
 0x1cf   : > { %v6908_v51 = vpop.f32.mrf.mxu0 }
 0x1d0   : > { %v2524_v1 = vadd.f32 %v6908_v51, %v2328_v14 }
 0x1d1   : > { %v6912_v42 = vpop.f32.mrf.mxu0 }
 0x1d4   : > { %v6914_v48 = vpop.f32.mrf.mxu1 }
 0x1d6   : > { %v6918_v7 = vpop.f32.mrf.mxu1 }
 0x1d8   : > { %v6916_v26 = vpop.f32.mrf.mxu0 }
 0x1da   : > { %v6920_v9 = vpop.f32.mrf.mxu0 }
 0x1dc   : > { %v6922_v45 = vpop.f32.mrf.mxu1 }
 0x1de   : > { %v6926_v21 = vpop.f32.mrf.mxu1 }
 0x1e3   : > { %v6924_v33 = vpop.f32.mrf.mxu0 }
 0x1e5   : > { %v6928_v10 = vpop.f32.mrf.mxu0 }
 0x1e7   : > { %v6932_v28 = vpop.f32.mrf.mxu0 }
 0x1e8   : > { %v6930_v62 = vpop.f32.mrf.mxu1 }
 0x1e9   : > { %7031 = vst [vmem:[#allocation7_spill] sm:$0xff] %v6930_v62  ;;  %v6936_v39 = vpop.f32.mrf.mxu0  ;;  %v1344_v62 = vadd.f32 %v1269_v16, %v1147_v58 }
 0x1ea   : > { %v6934_v35 = vpop.f32.mrf.mxu1 }
 0x1eb   : > { %v1541_v49 = vadd.f32 %v1466_v3, %v1344_v62  ;;  %v1937_v3 = vadd.f32 %v1931_v22, %v1740_v24 }
 0x1ec   : > { %v6938_v8 = vpop.f32.mrf.mxu1  ;;  %v3191_v12 = vpop.f32.mrf.mxu0 }
 0x1ed   : > { %v1738_v50 = vadd.f32 %v1663_v46, %v1541_v49  ;;  %v2134_v46 = vadd.f32 %v6902_v56, %v1937_v3  ;;  %v2721_v56 = vadd.f32 %v6916_v26, %v2524_v1 }
 0x1ee   : > { %v6940_v6 = vpop.f32.mrf.mxu1  ;;  %v3193_v25 = vpop.f32.mrf.mxu0 }
 0x1ef   : > { %v1935_v59 = vadd.f32 %v1860_v52, %v1738_v50  ;;  %v2330_v52 = vadd.f32 %v6906_v2, %v2133_v54  ;;  %v2918_v51 = vadd.f32 %v6924_v33, %v2721_v56 }
 0x1f0   : > { %v7032_v29 = vld [vmem:[#allocation7_spill] sm:$0xff] }
 0x1f1   : > { %v6942_v23 = vpop.f32.mrf.mxu1  ;;  %v2132_v62 = vadd.f32 %v2057_v40, %v1935_v59  ;;  %v2331_v40 = vadd.f32 %v6910_v0, %v2134_v46  ;;  %v2526_v19 = vadd.f32 %v6914_v48, %v2330_v52  ;;  %v3069_v13 = vadd.f32 %v6932_v28, %v2918_v51 }
 0x1f3   : > { %v3264_v37 = vpop.f32.mrf.mxu1  ;;  %v2329_v44 = vadd.f32 %v6904_v63, %v2132_v62  ;;  %v2527_v57 = vadd.f32 %v6918_v7, %v2331_v40  ;;  %v2723_v0 = vadd.f32 %v6922_v45, %v2526_v19  ;;  %v3267_v5 = vadd.f32 %v3191_v12, %v3069_v13 }
 0x1f5   : > { %v2525_v58 = vadd.f32 %v6912_v42, %v2329_v44  ;;  %v2724_v26 = vadd.f32 %v6926_v21, %v2527_v57  ;;  %v2920_v61 = vadd.f32 %v7032_v29, %v2723_v0 }
 0x1f7   : > { %v3388_v15 = vpop.f32.mrf.mxu0  ;;  %v2722_v2 = vadd.f32 %v6920_v9, %v2525_v58  ;;  %v2921_v33 = vadd.f32 %v6934_v35, %v2724_v26  ;;  %v3071_v31 = vadd.f32 %v6938_v8, %v2920_v61 }
 0x1f8   : > { %v3464_v4 = vadd.f32 %v3388_v15, %v3267_v5 }
 0x1f9   : > { %v3390_v55 = vpop.f32.mrf.mxu0  ;;  %v2919_v42 = vadd.f32 %v6928_v10, %v2722_v2  ;;  %v3072_v28 = vadd.f32 %v6940_v6, %v2921_v33  ;;  %v3269_v59 = vadd.f32 %v6942_v23, %v3071_v31 }
 0x1fb   : > { %v3070_v7 = vadd.f32 %v6936_v39, %v2919_v42  ;;  %v3270_v39 = vadd.f32 %v3264_v37, %v3072_v28 }
 0x1fc   : > { %v3459_v16 = vpop.f32.mrf.mxu1 }
 0x1fd   : > { %v3268_v45 = vadd.f32 %v3193_v25, %v3070_v7  ;;  %v3466_v12 = vadd.f32 %v3459_v16, %v3269_v59 }
 0x1fe   : > { %v3461_v38 = vpop.f32.mrf.mxu1 }
 0x1ff   : > { %v3465_v21 = vadd.f32 %v3390_v55, %v3268_v45  ;;  %v3467_v46 = vadd.f32 %v3461_v38, %v3270_v39 }
 0x200   : > { %v3585_v27 = vpop.f32.mrf.mxu0 }
 0x201   : > { %v3661_v11 = vadd.f32 %v3585_v27, %v3464_v4 }
 0x202   : > { %v3587_v53 = vpop.f32.mrf.mxu0 }
 0x203   : > { %v3662_v62 = vadd.f32 %v3587_v53, %v3465_v21 }
 0x205   : > { %v3656_v34 = vpop.f32.mrf.mxu1 }
 0x206   : > { %v3663_v8 = vadd.f32 %v3656_v34, %v3466_v12 }
 0x207   : > { %v3658_v43 = vpop.f32.mrf.mxu1 }
 0x208   : > { %v3664_v1 = vadd.f32 %v3658_v43, %v3467_v46 }
 0x20b   : > { %v3782_v41 = vpop.f32.mrf.mxu0 }
 0x20c   : > { %v3858_v54 = vadd.f32 %v3782_v41, %v3661_v11 }
 0x20d   : > { %v3784_v47 = vpop.f32.mrf.mxu0 }
 0x20e   : > { %v3859_v25 = vadd.f32 %v3784_v47, %v3662_v62 }
 0x20f   : > { %v3964_v32 = vpop.f32.mrf.mxu0 }
 0x210   : > { %v3853_v22 = vpop.f32.mrf.mxu1  ;;  %v4040_v15 = vadd.f32 %v3964_v32, %v3858_v54 }
 0x211   : > { %v3966_v17 = vpop.f32.mrf.mxu0  ;;  %v3860_v6 = vadd.f32 %v3853_v22, %v3663_v8 }
 0x212   : > { %v3855_v18 = vpop.f32.mrf.mxu1  ;;  %v4041_v40 = vadd.f32 %v3966_v17, %v3859_v25 }
 0x213   : > { %v3861_v58 = vadd.f32 %v3855_v18, %v3664_v1 }
 0x214   : > { %v4146_v20 = vpop.f32.mrf.mxu0  ;;  %v4035_v63 = vpop.f32.mrf.mxu1 }
 0x215   : > { %v4222_v23 = vadd.f32 %v4146_v20, %v4040_v15  ;;  %v4042_v19 = vadd.f32 %v4035_v63, %v3860_v6 }
 0x216   : > { %v4148_v36 = vpop.f32.mrf.mxu0  ;;  %v4037_v30 = vpop.f32.mrf.mxu1 }
 0x217   : > { %v4223_v37 = vadd.f32 %v4148_v36, %v4041_v40  ;;  %v4043_v56 = vadd.f32 %v4037_v30, %v3861_v58  ;;  %v5504_v40 = vld [vmem:[%s6992_s4] sm:$0xff] }
 0x218   : > { %v4328_v49 = vpop.f32.mrf.mxu0  ;;  %v4217_v48 = vpop.f32.mrf.mxu1 }
 0x219   : > { %v4404_v16 = vadd.f32 %v4328_v49, %v4222_v23  ;;  %v4224_v57 = vadd.f32 %v4217_v48, %v4042_v19 }
 0x21a   : > { %v4330_v9 = vpop.f32.mrf.mxu0  ;;  %v4219_v50 = vpop.f32.mrf.mxu1 }
 0x21b   : > { %v4405_v38 = vadd.f32 %v4330_v9, %v4223_v37  ;;  %v4225_v2 = vadd.f32 %v4219_v50, %v4043_v56 }
 0x21c   : > { %v4510_v10 = vpop.f32.mrf.mxu0  ;;  %v4399_v24 = vpop.f32.mrf.mxu1 }
 0x21d   : > { %v4586_v34 = vadd.f32 %v4510_v10, %v4404_v16  ;;  %v4406_v51 = vadd.f32 %v4399_v24, %v4224_v57 }
 0x21e   : > { %v4512_v60 = vpop.f32.mrf.mxu0  ;;  %v4401_v3 = vpop.f32.mrf.mxu1 }
 0x21f   : > { %v4587_v43 = vadd.f32 %v4512_v60, %v4405_v38  ;;  %v4407_v0 = vadd.f32 %v4401_v3, %v4225_v2 }
 0x220   : > { %v4692_v14 = vpop.f32.mrf.mxu0  ;;  %v4581_v35 = vpop.f32.mrf.mxu1 }
 0x221   : > { %v4768_v22 = vadd.f32 %v4692_v14, %v4586_v34  ;;  %v4588_v42 = vadd.f32 %v4581_v35, %v4406_v51 }
 0x222   : > { %v4694_v44 = vpop.f32.mrf.mxu0  ;;  %v4583_v52 = vpop.f32.mrf.mxu1 }
 0x223   : > { %v4769_v18 = vadd.f32 %v4694_v44, %v4587_v43  ;;  %v4589_v49 = vadd.f32 %v4583_v52, %v4407_v0 }
 0x224   : > { %v4874_v55 = vpop.f32.mrf.mxu0  ;;  %v4763_v27 = vpop.f32.mrf.mxu1 }
 0x225   : > { %v4950_v63 = vadd.f32 %v4874_v55, %v4768_v22  ;;  %v4770_v26 = vadd.f32 %v4763_v27, %v4588_v42  ;;  %v5512_v55 = vld [vmem:[%s6993_s5] sm:$0xff] }
 0x226   : > { %v4876_v53 = vpop.f32.mrf.mxu0  ;;  %v4765_v41 = vpop.f32.mrf.mxu1 }
 0x227   : > { %v4951_v30 = vadd.f32 %v4876_v53, %v4769_v18  ;;  %v4771_v7 = vadd.f32 %v4765_v41, %v4589_v49 }
 0x228   : > { %v5056_v47 = vpop.f32.mrf.mxu0  ;;  %v4945_v32 = vpop.f32.mrf.mxu1 }
 0x229   : > { %v5132_v48 = vadd.f32 %v5056_v47, %v4950_v63  ;;  %v4952_v5 = vadd.f32 %v4945_v32, %v4770_v26 }
 0x22a   : > { %v5058_v17 = vpop.f32.mrf.mxu0  ;;  %v4947_v20 = vpop.f32.mrf.mxu1 }
 0x22b   : > { %v5133_v9 = vadd.f32 %v5058_v17, %v4951_v30  ;;  %v4953_v45 = vadd.f32 %v4947_v20, %v4771_v7 }
 0x22c   : > { %v5238_v36 = vpop.f32.mrf.mxu0  ;;  %v5127_v13 = vpop.f32.mrf.mxu1 }
 0x22d   : > { %v5314_v50 = vadd.f32 %v5238_v36, %v5132_v48  ;;  %v5134_v4 = vadd.f32 %v5127_v13, %v4952_v5 }
 0x22e   : > { %v5240_v29 = vpop.f32.mrf.mxu0  ;;  %v5129_v61 = vpop.f32.mrf.mxu1 }
 0x22f   : > { %v5315_v10 = vadd.f32 %v5240_v29, %v5133_v9  ;;  %v5135_v21 = vadd.f32 %v5129_v61, %v4953_v45 }
 0x230   : > { %v5420_v33 = vpop.f32.mrf.mxu0  ;;  %v5309_v31 = vpop.f32.mrf.mxu1 }
 0x231   : > { %v5496_v24 = vadd.f32 %v5420_v33, %v5314_v50  ;;  %v5316_v11 = vadd.f32 %v5309_v31, %v5134_v4 }
 0x232   : > { %v5422_v28 = vpop.f32.mrf.mxu0  ;;  %v5311_v59 = vpop.f32.mrf.mxu1 }
 0x233   : > { %5500 = vst [vmem:[%s5963_s6] sm:$0xff] %v5496_v24  ;;  %v5497_v60 = vadd.f32 %v5422_v28, %v5315_v10  ;;  %v5513_v3 = vmul.f32 %v5496_v24, %v5496_v24  ;;  %v5317_v54 = vadd.f32 %v5311_v59, %v5135_v21 }
 0x234   : > { %v5491_v39 = vpop.f32.mrf.mxu1 }
 0x235   : > { %5501 = vst [vmem:[%s5963_s6 + $0x8] sm:$0xff] %v5497_v60  ;;  %v5505_v12 = vadd.f32 %v5497_v60, %v5496_v24  ;;  %v5514_v62 = vmul.f32 %v5497_v60, %v5497_v60  ;;  %v5498_v14 = vadd.f32 %v5491_v39, %v5316_v11 }
 0x236   : > { %v5493_v35 = vpop.f32.mrf.mxu1 }
 0x237   : > { %5502 = vst [vmem:[%s5963_s6 + $0x10] sm:$0xff] %v5498_v14  ;;  %v5515_v46 = vmul.f32 %v5498_v14, %v5498_v14  ;;  %v5499_v8 = vadd.f32 %v5493_v35, %v5317_v54  ;;  %v5506_v25 = vadd.f32 %v5505_v12, %v5498_v14  ;;  %v5517_v15 = vadd.f32 %v5514_v62, %v5513_v3 }
 0x239   : > { %5503 = vst [vmem:[%s5963_s6 + $0x18] sm:$0xff] %v5499_v8  ;;  %v5507_v44 = vadd.f32 %v5506_v25, %v5499_v8  ;;  %v5516_v52 = vmul.f32 %v5499_v8, %v5499_v8  ;;  %v5518_v1 = vadd.f32 %v5517_v15, %v5515_v46 }
 0x23b   : > { %5508 = vadd.xlane.f32.xlu0 %v5507_v44  ;;  %v5519_v6 = vadd.f32 %v5518_v1, %v5516_v52 }
 0x23d   : > { %5520 = vadd.xlane.f32.xlu1 %v5519_v6 }
 0x2c4   : > { %v5509_v23 = vpop.xlane.xlu0 %5508 }
 0x2c5   : > { %v5510_v27 = vadd.f32 %v5509_v23, %v5504_v40 }
 0x2c6   : > { %v5521_v58 = vpop.xlane.xlu1 %5520 }
 0x2c7   : > { %5511 = vst.msk [vmem:[%s6992_s4] sm:$0xff] %vm7033_vm6, %v5510_v27  ;;  %v5522_v19 = vadd.f32 %v5521_v58, %v5512_v55 }
 0x2c9   : > { %5523 = vst.msk [vmem:[%s6993_s5] sm:$0xff] %vm7034_vm8, %v5522_v19 }
 0x2ca PF: > { %s16_s18 = sadd.s32 1, %s5889_s18  }
 0x2cb   : > { %p13_p9 = scmp.ge.s32.totalorder %s16_s18, 4  }
 0x2cd   :  { %15 = sbr.rel (!%p13_p9) target bundleno = 1 (0x1), region = 201 }
 0x2d2   :  { %5561 = vsyncmov [#allocation3] }
 0x2d5   :  { %s5562_s22 = vpop.sfrf %5561 }
 0x2d6   :  { %p5840_p10 = scmp.ne.s32.totalorder %s5562_s22, 0 }
 0x2d8   :  { %5566 = shalt.err (%p5840_p10)  }
 0x2d9   :  { %5568 = vsyncmov [#allocation3 + $0x1] }
 0x2dc   :  { %s5569_s23 = vpop.sfrf %5568 }
 0x2dd   :  { %p5841_p11 = scmp.ne.s32.totalorder %s5569_s23, 0 }
 0x2df   :  { %5573 = shalt.err (%p5841_p11)  }

// kernel: resblock_pallas.4
= control target key start
LH: loop header
LB: loop body
LE: loop exit
PB: predicated region body
PF: predicated region fallthrough
CT: control target
= control target key end

     0   :  { %s6023_s24 = smov 0   ;;  %s7111_s0 = inlined_call_operand.vmem [shape: f32[8,2048], index: 0, kind: input, shape index: {}]   ;;  %s7112_s1 = inlined_call_operand.vmem [shape: f32[27,8,8], index: 1, kind: input, shape index: {}]   ;;  %s7113_s2 = inlined_call_operand.vmem [shape: s32[1,1024], index: 2, kind: input, shape index: {}]   ;;  %s7114_s3 = inlined_call_operand.vmem [shape: f32[8,1], index: 3, kind: input, shape index: {}]   ;;  %s7115_s4 = inlined_call_operand.vmem [shape: f32[8,1], index: 4, kind: input, shape index: {}]   ;;  %s7116_s5 = inlined_call_operand.vmem [shape: f32[8,1024], index: 5, kind: output, shape index: {0}]   ;;  %s7117_s6 = inlined_call_operand.vmem [shape: f32[8,1], index: 6, kind: output, shape index: {1}]   ;;  %s7118_s7 = inlined_call_operand.vmem [shape: f32[8,1], index: 7, kind: output, shape index: {2}]  }
   0x1 LB: > { %s6029_s25 = sadd.s32 4294967295, %s5961_s24   ;;  %p5714_p0 = scmp.ge.s32.totalorder %s5961_s24, 1  ;;  %s5961_s24 = sphi %s6023_s24, %s18_s24  }
   0x2   : > { %p208_p1 = scmp.lt.s32.totalorder %s5961_s24, 3 }
   0x4   : > { %p209_p2 = pnand %p5714_p0, %p208_p1 }
   0x5   : > { %s5715_s26 = sshll.u32 (!%p209_p2), %s6029_s25, 2  ;;  %s249_s27 = ssub.s32 (!%p209_p2), 0, %s6029_s25 }
   0x6   : > { %212 = sbr.rel (%p209_p2) target bundleno = 842 (0x34a), region = 36  ;;  %p238_p3 = scmp.lt.s32.totalorder (!%p209_p2), %s5715_s26, 7 }
   0x7   : > { %p248_p4 = scmp.lt.s32.totalorder (!%p209_p2), %s6029_s25, 0  ;;  %s5718_s28 = smin.u32 (!%p209_p2), %s6029_s25, %s249_s27 }
   0x8   : > { %s251_s29 = sand.u32 (!%p209_p2), 1, %s5718_s28   ;;  %p5721_p6 = scmp.ne.s32.totalorder (!%p209_p2), %s6029_s25, 0 }
   0x9   : > { %s252_s14 = ssub.s32 (!%p209_p2), 0, %s251_s29 }
   0xb   : > { %s7160_s26 = smov (!%p238_p3, %s5715_s26), 7  ;;  %s7162_s14 = smov (!%p248_p4, %s252_s14), %s251_s29 }
   0xc   : > { %s6040_s9 = scalar_lea.vmem %s7113_s2, %s7160_s26  ;;  %s5717_s10 = sshll.u32 %s7160_s26, 3 }
   0xd   : > { %s6045_s13 = scalar_lea.vmem %s7116_s5, %s5717_s10  ;;  %p5720_p5 = scmp.lt.s32.totalorder %s7162_s14, 0 }
   0xe   : > { %s258_s15 = sadd.s32 2, %s7162_s14  ;;  %263 = sbr.rel (%p5721_p6) target bundleno = 26 (0x1a), region = 40 }
   0xf   : > { %s7164_s15 = smov (!%p5720_p5, %s258_s15), %s7162_s14  ;;  %s5722_s16 = sshll.u32 (!%p5721_p6), %s6029_s25, 9 }
  0x10   : > { %s5918_s17 = smul.u32 (!%p5721_p6), 48, %s7164_s15  ;;  %s265_s18 = sadd.s32 (!%p5721_p6), 384, %s5722_s16 }
  0x11   : > { %s266_s19 = sshra.s32 (!%p5721_p6), %s265_s18, 7  ;;  %s273_s27 = scalar_lea.sflag (!%p5721_p6), [#allocation3], %s7164_s15 }
  0x12   : > { %s5723_s20 = sshll.u32 (!%p5721_p6), %s266_s19, 3  ;;  %s272_s26 = scalar_lea.vmem (!%p5721_p6), [#allocation2], %s5918_s17 }
  0x13   : > { %s269_s23 = scalar_lea.vmem %s7111_s0, %s5723_s20 }
  0x14   : > { %v307_v0 = vld [vmem:[%s269_s23] sm:$0xff]  ;;  %v309_v1 = vld [vmem:[%s269_s23 + $0x8] sm:$0xff]  ;;  %v311_v2 = vld [vmem:[%s269_s23 + $0x10] sm:$0xff] }
  0x15   : > { %308 = vst [vmem:[%s272_s26] sm:$0xff] %v307_v0  ;;  %310 = vst [vmem:[%s272_s26 + $0x8] sm:$0xff] %v309_v1  ;;  %v313_v3 = vld [vmem:[%s269_s23 + $0x18] sm:$0xff]  ;;  %v315_v4 = vld [vmem:[%s269_s23 + $0x20] sm:$0xff] }
  0x16   : > { %312 = vst [vmem:[%s272_s26 + $0x10] sm:$0xff] %v311_v2  ;;  %v317_v5 = vld [vmem:[%s269_s23 + $0x28] sm:$0xff]  ;;  %314 = vst [vmem:[%s272_s26 + $0x18] sm:$0xff] %v313_v3 }
  0x17   : > { %316 = vst [vmem:[%s272_s26 + $0x20] sm:$0xff] %v315_v4  ;;  %318 = vst [vmem:[%s272_s26 + $0x28] sm:$0xff] %v317_v5 }
  0x18   : > { %326 = vsyncadd %s273_s27, 768  ;;  %vm327_vm0 = vcmask 7168   ;;  %v5963_v6 = vmov 0.0  }
  0x19   : > { %328 = vst.msk [vmem:[%s7117_s6] sm:$0xff] %vm327_vm0, %v5963_v6  ;;  %329 = vst.msk [vmem:[%s7118_s7] sm:$0xff] %vm327_vm0, %v5963_v6 }
  0x1a PF: > { %s330_s10 = sadd.s32 1, %s6029_s25 }
  0x1b   : > { %p5725_p7 = scmp.ge.s32.totalorder %s330_s10, 2 }
  0x1c   : > { %s335_s11 = ssub.s32 (!%p5725_p7), 1, %s7164_s15  ;;  %s5919_s12 = sshll.u32 (!%p5725_p7), %s6029_s25, 9 }
  0x1d   : > { %334 = sbr.rel (%p5725_p7) target bundleno = 39 (0x27), region = 78  ;;  %s5920_s14 = sadd.s32 (!%p5725_p7), 512, %s5919_s12 }
  0x1e   : > { %s5921_s16 = smul.u32 (!%p5725_p7), 48, %s335_s11  ;;  %s337_s17 = sadd.s32 (!%p5725_p7), 384, %s5920_s14 }
  0x1f   : > { %s338_s18 = sshra.s32 (!%p5725_p7), %s337_s17, 7  ;;  %s345_s25 = scalar_lea.sflag (!%p5725_p7), [#allocation3], %s335_s11 }
  0x20   : > { %s5727_s19 = sshll.u32 (!%p5725_p7), %s338_s18, 3  ;;  %s344_s23 = scalar_lea.vmem (!%p5725_p7), [#allocation2], %s5921_s16 }
  0x21   : > { %s341_s22 = scalar_lea.vmem (!%p5725_p7), %s7111_s0, %s5727_s19 }
  0x22   : > { %v379_v7 = vld [vmem:[%s341_s22] sm:$0xff]  ;;  %v381_v8 = vld [vmem:[%s341_s22 + $0x8] sm:$0xff]  ;;  %v383_v9 = vld [vmem:[%s341_s22 + $0x10] sm:$0xff] }
  0x23   : > { %380 = vst [vmem:[%s344_s23] sm:$0xff] %v379_v7  ;;  %382 = vst [vmem:[%s344_s23 + $0x8] sm:$0xff] %v381_v8  ;;  %v385_v10 = vld [vmem:[%s341_s22 + $0x18] sm:$0xff]  ;;  %v387_v11 = vld [vmem:[%s341_s22 + $0x20] sm:$0xff] }
  0x24   : > { %384 = vst [vmem:[%s344_s23 + $0x10] sm:$0xff] %v383_v9  ;;  %v389_v12 = vld [vmem:[%s341_s22 + $0x28] sm:$0xff]  ;;  %386 = vst [vmem:[%s344_s23 + $0x18] sm:$0xff] %v385_v10 }
  0x25   : > { %388 = vst [vmem:[%s344_s23 + $0x20] sm:$0xff] %v387_v11  ;;  %390 = vst [vmem:[%s344_s23 + $0x28] sm:$0xff] %v389_v12 }
  0x26   : > { %398 = vsyncadd %s345_s25, 768 }
  0x27 PF: > { %s5922_s26 = smul.u32 48, %s7164_s15  ;;  %s402_s28 = scalar_lea.sflag [#allocation3], %s7164_s15 }
  0x29   : > { %s6069_s27 = scalar_lea.vmem [#allocation2], %s5922_s26 }
  0x2a   : > { %5957 = dma.done.wait %s402_s28, 768 }
  0x2b   : > { %5958 = vsyncadd %s402_s28, 4294966528  ;;  %v5964_v13 = vmov 0   ;;  %v413_v14 = vld [vmem:[%s7114_s3] sm:$0xff]  ;;  %s5965_s15 = smov 72   ;;  %s5966_s11 = smov 73   ;;  %v7119_v35 = vmov 0.0   ;;  %v447_v40 = vlaneseq }
  0x2c   : > { %5951 = vset.pattern.permute.xlu0 %v5964_v13  ;;  %v425_v15 = vld [vmem:[%s7115_s4] sm:$0xff]  ;;  %v408_v18 = vld [vmem:[%s6069_s27 + $0x8] sm:$0xff]  ;;  %v410_v31 = vld [vmem:[%s6069_s27 + $0x18] sm:$0xff]  ;;  %612 = vmatprep.mubr.f32.mxu0 %v7119_v35  ;;  %s5968_s12 = smov 71   ;;  %s5969_s14 = smov 65   ;;  %vm529_vm4 = vcmask 588800  }
  0x2d   : > { %416 = vperm.xlu0 %5951, %v413_v14   ;;  %v407_v17 = vld [vmem:[%s6069_s27] sm:$0xff]  ;;  %v409_v19 = vld [vmem:[%s6069_s27 + $0x10] sm:$0xff]  ;;  %683 = vmatprep.mubr.f32.mxu1 %v7119_v35  ;;  %s5970_s16 = smov 64   ;;  %s5971_s17 = smov 63   ;;  %v448_v42 = vshrl.u32 %v447_v40, 7  ;;  %v5730_v58 = vld [vmem:[%s7112_s1 + $0x8] sm:$0xff] }
  0x2e   : > { %v411_v26 = vld [vmem:[%s6069_s27 + $0x20] sm:$0xff]  ;;  %s5972_s18 = smov 57   ;;  %s5973_s19 = smov 56   ;;  %vm544_vm6 = vcmask 64512   ;;  %vm482_vm7 = vcmask 596992   ;;  %v412_v7 = vld [vmem:[%s6069_s27 + $0x28] sm:$0xff] }
  0x2f   : > { %s5974_s20 = smov 55   ;;  %s5975_s21 = smov 9   ;;  %v6208_v39 = vld [vmem:[%s6040_s9] sm:$0xf]  ;;  %v6216_v44 = vsub.s32 1, %v448_v42  ;;  %v6219_v46 = vsub.s32 0, %v448_v42 }
  0x30   : > { %s5976_s22 = smov 8   ;;  %v496_v41 = vand.u32 5, %v6208_v39  ;;  %v444_v43 = vand.u32 21, %v6208_v39  ;;  %s5977_s23 = smov 7   ;;  %v6233_v53 = vsub.s32 3, %v448_v42  ;;  %v6237_v56 = vsub.s32 2, %v448_v42 }
  0x31   : > { %428 = vperm.xlu0 %5951, %v425_v15   ;;  %s5978_s25 = smov 1   ;;  %v835_v1 = vand.u32 37, %v6208_v39  ;;  %s5979_s29 = smov 127   ;;  %v495_v14 = vld [vmem:[%s7112_s1] sm:$0xff]  ;;  %vm868_vm0 = vcmask 580608  }
  0x32   : > { %vm497_vm1 = vcmp.eq.s32.totalorder %v496_v41, 5  ;;  %vm445_vm2 = vcmp.eq.s32.totalorder %v444_v43, 21  ;;  %s5980_s8 = smov 121   ;;  %s5982_s26 = smov 119  }
  0x33   : > { %v498_v45 = vsel %vm497_vm1, 1, %v5964_v13  ;;  %v6226_v51 = vsel %vm445_vm2, 1, %v5964_v13  ;;  %vm836_vm11 = vcmp.eq.s32.totalorder %v835_v1, 37  ;;  %v1426_v1 = vand.u32 33, %v6208_v39 }
  0x34   : > { %v506_v47 = vrot.slane %v498_v45, %v6216_v44  ;;  %v502_v50 = vrot.slane %v498_v45, %v6219_v46  ;;  %v454_v52 = vrot.slane %v6226_v51, %v6216_v44  ;;  %v514_v60 = vrot.slane %v498_v45, %v6233_v53 }
  0x35   : > { %v510_v63 = vrot.slane %v498_v45, %v6237_v56  ;;  %v450_v2 = vrot.slane %v6226_v51, %v6219_v46  ;;  %v462_v8 = vrot.slane %v6226_v51, %v6233_v53  ;;  %v458_v11 = vrot.slane %v6226_v51, %v6237_v56 }
  0x36   : > { %vm516_vm3 = vcmp.eq.s32.totalorder %v506_v47, 1  ;;  %vm515_vm5 = vcmp.eq.s32.totalorder %v502_v50, 1  ;;  %vm464_vm8 = vcmp.eq.s32.totalorder %v454_v52, 1  ;;  %vm518_vm9 = vcmp.eq.s32.totalorder %v514_v60, 1 }
  0x37   : > { %vm517_vm10 = vcmp.eq.s32.totalorder %v510_v63, 1  ;;  %vm463_vm12 = vcmp.eq.s32.totalorder %v450_v2, 1  ;;  %v837_v12 = vsel %vm836_vm11, 1, %v5964_v13  ;;  %vm466_vm13 = vcmp.eq.s32.totalorder %v462_v8, 1 }
  0x38   : > { %vm465_vm14 = vcmp.eq.s32.totalorder %v458_v11, 1 }
  0xa8   : > { %v6079_v16 = vpop.permute.xlu0 %416 }
  0xa9   : > { %v419_v20 = vmul.f32 %v6079_v16, %v407_v17  ;;  %v420_v21 = vmul.f32 %v6079_v16, %v408_v18  ;;  %v421_v23 = vmul.f32 %v6079_v16, %v409_v19  ;;  %v423_v30 = vmul.f32 %v6079_v16, %v411_v26 }
  0xaa   : > { %v422_v34 = vmul.f32 %v6079_v16, %v410_v31  ;;  %v1032_v17 = vand.u32 17, %v6208_v39  ;;  %v424_v18 = vmul.f32 %v6079_v16, %v412_v7  ;;  %v845_v19 = vrot.slane %v837_v12, %v6216_v44 }
  0xab   : > { %v841_v16 = vrot.slane %v837_v12, %v6219_v46  ;;  %v849_v31 = vrot.slane %v837_v12, %v6237_v56 }
  0xac   : > { %v6086_v22 = vpop.permute.xlu0 %428  ;;  %vm6310_vm15 = vcmp.eq.s32.totalorder %v1032_v17, 17  ;;  %vm855_vm1 = vcmp.eq.s32.totalorder %v845_v19, 1 }
  0xad   : > { %v431_v24 = vadd.f32 %v6086_v22, %v419_v20  ;;  %v432_v25 = vadd.f32 %v6086_v22, %v420_v21  ;;  %v433_v27 = vadd.f32 %v6086_v22, %v421_v23  ;;  %v435_v32 = vadd.f32 %v6086_v22, %v423_v30 }
  0xae   : > { %v434_v36 = vadd.f32 %v6086_v22, %v422_v34  ;;  %v436_v20 = vadd.f32 %v6086_v22, %v424_v18  ;;  %v853_v22 = vrot.slane %v837_v12, %v6233_v53  ;;  %vm854_vm2 = vcmp.eq.s32.totalorder %v841_v16, 1  ;;  %v5757_v18 = vld [vmem:[%s7112_s1 + $0x20] sm:$0xff] }
  0xaf   : > { %v6093_v28 = vmax.f32 %v431_v24, 0.0  ;;  %v6095_v29 = vmax.f32 %v432_v25, 0.0  ;;  %v6104_v33 = vmax.f32 %v433_v27, 0.0  ;;  %v6114_v37 = vmax.f32 %v435_v32, 0.0 }
  0xb0   : > { %v6120_v38 = vmax.f32 %v434_v36, 0.0  ;;  %v6325_v27 = vmax.f32 %v436_v20, 0.0  ;;  %v1034_v32 = vsel %vm6310_vm15, 1, %v5964_v13  ;;  %v5743_v36 = vld [vmem:[%s7112_s1 + $0x10] sm:$0xff]  ;;  %vm1262_vm15 = vcmask 523264  }
  0xb1   : > { %521 = vrot.lane.b32.xlu1 %v6095_v29, %s5965_s15  ;;  %519 = vrot.lane.b32.xlu0 %v6093_v28, %s5965_s15  ;;  %v1042_v41 = vrot.slane %v1034_v32, %v6216_v44 }
  0xb5   : > { %523 = vrot.lane.b32.xlu1 %v6104_v33, %s5965_s15  ;;  %476 = vrot.lane.b32.xlu0 %v6104_v33, %s5966_s11 }
  0xb9   : > { %474 = vrot.lane.b32.xlu1 %v6095_v29, %s5966_s11  ;;  %527 = vrot.lane.b32.xlu0 %v6114_v37, %s5965_s15 }
  0xbd   : > { %525 = vrot.lane.b32.xlu1 %v6120_v38, %s5965_s15  ;;  %478 = vrot.lane.b32.xlu0 %v6120_v38, %s5966_s11 }
  0xc1   : > { %472 = vrot.lane.b32.xlu1 %v6093_v28, %s5966_s11  ;;  %860 = vrot.lane.b32.xlu0 %v6095_v29, %s5968_s12 }
  0xc5   : > { %480 = vrot.lane.b32.xlu1 %v6114_v37, %s5966_s11  ;;  %858 = vrot.lane.b32.xlu0 %v6093_v28, %s5968_s12 }
  0xc9   : > { %862 = vrot.lane.b32.xlu1 %v6104_v33, %s5968_s12  ;;  %866 = vrot.lane.b32.xlu0 %v6114_v37, %s5968_s12 }
  0xcd   : > { %864 = vrot.lane.b32.xlu1 %v6120_v38, %s5968_s12  ;;  %1059 = vrot.lane.b32.xlu0 %v6104_v33, %s5969_s14 }
  0xd1   : > { %1057 = vrot.lane.b32.xlu1 %v6095_v29, %s5969_s14  ;;  %1061 = vrot.lane.b32.xlu0 %v6120_v38, %s5969_s14 }
  0xd5   : > { %1055 = vrot.lane.b32.xlu1 %v6093_v28, %s5969_s14  ;;  %1254 = vrot.lane.b32.xlu0 %v6095_v29, %s5970_s16 }
  0xd9   : > { %1063 = vrot.lane.b32.xlu1 %v6114_v37, %s5969_s14  ;;  %1252 = vrot.lane.b32.xlu0 %v6093_v28, %s5970_s16 }
  0xdd   : > { %1256 = vrot.lane.b32.xlu1 %v6104_v33, %s5970_s16  ;;  %1260 = vrot.lane.b32.xlu0 %v6114_v37, %s5970_s16 }
  0xe1   : > { %1258 = vrot.lane.b32.xlu1 %v6120_v38, %s5970_s16  ;;  %1453 = vrot.lane.b32.xlu0 %v6104_v33, %s5971_s17 }
  0xe5   : > { %1451 = vrot.lane.b32.xlu1 %v6095_v29, %s5971_s17  ;;  %1455 = vrot.lane.b32.xlu0 %v6120_v38, %s5971_s17 }
  0xe9   : > { %1449 = vrot.lane.b32.xlu1 %v6093_v28, %s5971_s17  ;;  %1648 = vrot.lane.b32.xlu0 %v6095_v29, %s5972_s18 }
  0xed   : > { %1457 = vrot.lane.b32.xlu1 %v6114_v37, %s5971_s17  ;;  %1646 = vrot.lane.b32.xlu0 %v6093_v28, %s5972_s18 }
  0xf1   : > { %1650 = vrot.lane.b32.xlu1 %v6104_v33, %s5972_s18  ;;  %1654 = vrot.lane.b32.xlu0 %v6114_v37, %s5972_s18 }
  0xf5   : > { %1652 = vrot.lane.b32.xlu1 %v6120_v38, %s5972_s18  ;;  %1847 = vrot.lane.b32.xlu0 %v6104_v33, %s5973_s19 }
  0xf9   : > { %1845 = vrot.lane.b32.xlu1 %v6095_v29, %s5973_s19  ;;  %1849 = vrot.lane.b32.xlu0 %v6120_v38, %s5973_s19 }
  0xfd   : > { %1843 = vrot.lane.b32.xlu1 %v6093_v28, %s5973_s19  ;;  %2042 = vrot.lane.b32.xlu0 %v6095_v29, %s5974_s20 }
 0x101   : > { %1851 = vrot.lane.b32.xlu1 %v6114_v37, %s5973_s19  ;;  %2040 = vrot.lane.b32.xlu0 %v6093_v28, %s5974_s20 }
 0x105   : > { %2044 = vrot.lane.b32.xlu1 %v6104_v33, %s5974_s20  ;;  %2048 = vrot.lane.b32.xlu0 %v6114_v37, %s5974_s20 }
 0x109   : > { %2046 = vrot.lane.b32.xlu1 %v6120_v38, %s5974_s20  ;;  %2241 = vrot.lane.b32.xlu0 %v6104_v33, %s5975_s21 }
 0x10d   : > { %2239 = vrot.lane.b32.xlu1 %v6095_v29, %s5975_s21  ;;  %2243 = vrot.lane.b32.xlu0 %v6120_v38, %s5975_s21 }
 0x111   : > { %2237 = vrot.lane.b32.xlu1 %v6093_v28, %s5975_s21  ;;  %2436 = vrot.lane.b32.xlu0 %v6095_v29, %s5976_s22 }
 0x115   : > { %2245 = vrot.lane.b32.xlu1 %v6114_v37, %s5975_s21  ;;  %2434 = vrot.lane.b32.xlu0 %v6093_v28, %s5976_s22 }
 0x119   : > { %2438 = vrot.lane.b32.xlu1 %v6104_v33, %s5976_s22  ;;  %2442 = vrot.lane.b32.xlu0 %v6114_v37, %s5976_s22 }
 0x11d   : > { %2440 = vrot.lane.b32.xlu1 %v6120_v38, %s5976_s22  ;;  %2634 = vrot.lane.b32.xlu0 %v6104_v33, %s5977_s23  ;;  %s5981_s22 = smov 120  }
 0x121   : > { %2632 = vrot.lane.b32.xlu1 %v6095_v29, %s5977_s23  ;;  %2636 = vrot.lane.b32.xlu0 %v6120_v38, %s5977_s23 }
 0x123   : > { %v522_v48 = vpop.permute.xlu1 %521  ;;  %v520_v49 = vpop.permute.xlu0 %519 }
 0x124   : > { %v530_v59 = vsel %vm529_vm4, %v520_v49, %v522_v48  ;;  %v1038_v49 = vrot.slane %v1034_v32, %v6219_v46 }
 0x125   : > { %2630 = vrot.lane.b32.xlu1 %v6093_v28, %s5977_s23  ;;  %2829 = vrot.lane.b32.xlu0 %v6095_v29, %s5978_s25 }
 0x126   : > { %vm1051_vm11 = vcmp.eq.s32.totalorder %v1038_v49, 1 }
 0x127   : > { %v524_v54 = vpop.permute.xlu1 %523  ;;  %v6235_v55 = vpop.permute.xlu0 %476 }
 0x128   : > { %v6240_v57 = vsel %vm529_vm4, %v522_v48, %v524_v54  ;;  %v1229_v48 = vand.u32 1, %v6208_v39 }
 0x129   : > { %5731 = vmatprep.subr.msk.mxu0 %vm516_vm3, %v6240_v57  ;;  %2638 = vrot.lane.b32.xlu1 %v6114_v37, %s5977_s23  ;;  %vm857_vm3 = vcmp.eq.s32.totalorder %v853_v22, 1 }
 0x12a   : > { %2827 = vrot.lane.b32.xlu0 %v6093_v28, %s5978_s25  ;;  %5732 = vmatpush1.msk.msra.mxu0 %vm515_vm5, %v530_v59  ;;  %vm856_vm5 = vcmp.eq.s32.totalorder %v849_v31, 1  ;;  %v1046_v59 = vrot.slane %v1034_v32, %v6237_v56 }
 0x12b   : > { %v475_v61 = vpop.permute.xlu1 %474  ;;  %v6251_v62 = vpop.permute.xlu0 %527  ;;  %5733 = vmatmul.mubr.msk.f32.vlgmr.msra.gmra.mxu0 %vm544_vm6, %v5730_v58 }
 0x12c   : > { %v6257_v0 = vsel %vm482_vm7, %v475_v61, %v6235_v55  ;;  %757 = vmatprep.mubr.f32.mxu0 %v7119_v35 }
 0x12d   : > { %2831 = vrot.lane.b32.xlu1 %v6104_v33, %s5978_s25  ;;  %5737 = vmatprep.subr.msk.mxu0 %vm464_vm8, %v6257_v0  ;;  %vm1065_vm8 = vcmask 531456  }
 0x12e   : > { %2835 = vrot.lane.b32.xlu0 %v6114_v37, %s5978_s25 }
 0x12f   : > { %v526_v3 = vpop.permute.xlu1 %525  ;;  %v479_v4 = vpop.permute.xlu0 %478 }
 0x130   : > { %v6270_v5 = vsel %vm529_vm4, %v526_v3, %v6251_v62  ;;  %v6273_v6 = vsel %vm529_vm4, %v524_v54, %v526_v3  ;;  %v6316_v26 = vsel %vm482_vm7, %v6235_v55, %v479_v4  ;;  %v1050_v54 = vrot.slane %v1034_v32, %v6233_v53 }
 0x131   : > { %2833 = vrot.lane.b32.xlu1 %v6120_v38, %s5978_s25  ;;  %5734 = vmatprep.subr.msk.mxu1 %vm518_vm9, %v6270_v5  ;;  %vm1052_vm9 = vcmp.eq.s32.totalorder %v1042_v41, 1 }
 0x132   : > { %3180 = vrot.lane.b32.xlu0 %v6120_v38, %s5979_s29  ;;  %5735 = vmatpush1.msk.msra.mxu1 %vm517_vm10, %v6273_v6  ;;  %vm1230_vm10 = vcmp.eq.s32.totalorder %v1229_v48, 1 }
 0x133   : > { %v473_v9 = vpop.permute.xlu1 %472  ;;  %v861_v10 = vpop.permute.xlu0 %860  ;;  %5736 = vmatmul.mubr.msk.f32.vlgmr.msra.gmra.mxu1 %vm544_vm6, %v5730_v58  ;;  %v1231_v60 = vsel %vm1230_vm10, 1, %v5964_v13 }
 0x134   : > { %v483_v15 = vsel %vm482_vm7, %v473_v9, %v475_v61  ;;  %828 = vmatprep.mubr.f32.mxu1 %v7119_v35  ;;  %v5750_v61 = vld [vmem:[%s7112_s1 + $0x18] sm:$0xff]  ;;  %v1239_v2 = vrot.slane %v1231_v60, %v6216_v44  ;;  %v1235_v7 = vrot.slane %v1231_v60, %v6219_v46 }
 0x135   : > { %3178 = vrot.lane.b32.xlu1 %v6104_v33, %s5979_s29  ;;  %5738 = vmatpush1.msk.msra.mxu0 %vm463_vm12, %v483_v15  ;;  %vm1054_vm12 = vcmp.eq.s32.totalorder %v1050_v54, 1  ;;  %v1820_v54 = vand.u32 9, %v6208_v39 }
 0x136   : > { %3182 = vrot.lane.b32.xlu0 %v6114_v37, %s5979_s29  ;;  %5739 = vmatmul.mubr.msk.f32.vlgmr.msra.gmra.mxu0 %vm544_vm6, %v495_v14 }
 0x137   : > { %v6302_v21 = vpop.permute.xlu1 %480  ;;  %v859_v23 = vpop.permute.xlu0 %858  ;;  %950 = vmatprep.mubr.f32.mxu0 %v7119_v35 }
 0x138   : > { %v6308_v24 = vsel %vm482_vm7, %v479_v4, %v6302_v21  ;;  %v869_v40 = vsel %vm868_vm0, %v859_v23, %v861_v10 }
 0x139   : > { %3176 = vrot.lane.b32.xlu1 %v6095_v29, %s5979_s29  ;;  %5740 = vmatprep.subr.msk.mxu1 %vm466_vm13, %v6308_v24  ;;  %vm1053_vm13 = vcmp.eq.s32.totalorder %v1046_v59, 1 }
 0x13a   : > { %3375 = vrot.lane.b32.xlu0 %v6104_v33, %s5980_s8  ;;  %5741 = vmatpush1.msk.msra.mxu1 %vm465_vm14, %v6316_v26  ;;  %vm1427_vm14 = vcmp.eq.s32.totalorder %v1426_v1, 33 }
 0x13b   : > { %v863_v28 = vpop.permute.xlu1 %862  ;;  %v6327_v30 = vpop.permute.xlu0 %866  ;;  %5742 = vmatmul.mubr.msk.f32.vlgmr.msra.gmra.mxu1 %vm544_vm6, %v495_v14  ;;  %v1243_v14 = vrot.slane %v1231_v60, %v6237_v56  ;;  %v1428_v15 = vsel %vm1427_vm14, 1, %v5964_v13 }
 0x13c   : > { %v6335_v34 = vsel %vm868_vm0, %v861_v10, %v863_v28  ;;  %1021 = vmatprep.mubr.f32.mxu1 %v7119_v35  ;;  %v1247_v10 = vrot.slane %v1231_v60, %v6233_v53  ;;  %v1436_v20 = vrot.slane %v1428_v15, %v6216_v44  ;;  %v1432_v31 = vrot.slane %v1428_v15, %v6219_v46 }
 0x13d   : > { %3184 = vrot.lane.b32.xlu1 %v6325_v27, %s5979_s29  ;;  %5744 = vmatprep.subr.msk.mxu0 %vm855_vm1, %v6335_v34  ;;  %vm1249_vm1 = vcmp.eq.s32.totalorder %v1239_v2, 1  ;;  %v1444_v41 = vrot.slane %v1428_v15, %v6233_v53  ;;  %v1440_v48 = vrot.slane %v1428_v15, %v6237_v56 }
 0x13e   : > { %3373 = vrot.lane.b32.xlu0 %v6095_v29, %s5980_s8  ;;  %5745 = vmatpush1.msk.msra.mxu0 %vm854_vm2, %v869_v40  ;;  %vm1248_vm2 = vcmp.eq.s32.totalorder %v1235_v7, 1  ;;  %vm1446_vm10 = vcmp.eq.s32.totalorder %v1436_v20, 1 }
 0x13f   : > { %v865_v42 = vpop.permute.xlu1 %864  ;;  %v1060_v43 = vpop.permute.xlu0 %1059  ;;  %5746 = vmatmul.mubr.msk.f32.vlgmr.msra.gmra.mxu0 %vm544_vm6, %v5743_v36  ;;  %vm1447_vm14 = vcmp.eq.s32.totalorder %v1440_v48, 1 }
 0x140   : > { %v6350_v45 = vsel %vm868_vm0, %v863_v28, %v865_v42  ;;  %v6354_v47 = vsel %vm868_vm0, %v865_v42, %v6327_v30  ;;  %1147 = vmatprep.mubr.f32.mxu0 %v7119_v35  ;;  %v1623_v28 = vand.u32 25, %v6208_v39 }
 0x141   : > { %3377 = vrot.lane.b32.xlu1 %v6120_v38, %s5980_s8  ;;  %5747 = vmatprep.subr.msk.mxu1 %vm857_vm3, %v6354_v47  ;;  %vm1251_vm3 = vcmp.eq.s32.totalorder %v1247_v10, 1 }
 0x142   : > { %3381 = vrot.lane.b32.xlu0 %v6325_v27, %s5980_s8  ;;  %5748 = vmatpush1.msk.msra.mxu1 %vm856_vm5, %v6350_v45  ;;  %vm1250_vm5 = vcmp.eq.s32.totalorder %v1243_v14, 1  ;;  %v5771_v14 = vld [vmem:[%s7112_s1 + $0x30] sm:$0xff] }
 0x143   : > { %v1058_v50 = vpop.permute.xlu1 %1057  ;;  %v1062_v51 = vpop.permute.xlu0 %1061  ;;  %5749 = vmatmul.mubr.msk.f32.vlgmr.msra.gmra.mxu1 %vm544_vm6, %v5743_v36 }
 0x144   : > { %v6367_v52 = vsel %vm1065_vm8, %v1058_v50, %v1060_v43  ;;  %1218 = vmatprep.mubr.f32.mxu1 %v7119_v35  ;;  %v6398_v9 = vsel %vm1065_vm8, %v1060_v43, %v1062_v51 }
 0x145   : > { %3379 = vrot.lane.b32.xlu1 %v6114_v37, %s5980_s8  ;;  %5751 = vmatprep.subr.msk.mxu0 %vm1052_vm9, %v6367_v52  ;;  %vm1459_vm9 = vcmask 515072  }
 0x146   : > { %3574 = vrot.lane.b32.xlu0 %v6120_v38, %s5981_s22 }
 0x147   : > { %v1056_v55 = vpop.permute.xlu1 %1055  ;;  %v1255_v58 = vpop.permute.xlu0 %1254 }
 0x148   : > { %v1066_v63 = vsel %vm1065_vm8, %v1056_v55, %v1058_v50  ;;  %v5764_v50 = vld [vmem:[%s7112_s1 + $0x28] sm:$0xff] }
 0x149   : > { %3572 = vrot.lane.b32.xlu1 %v6104_v33, %s5981_s22  ;;  %5752 = vmatpush1.msk.msra.mxu0 %vm1051_vm11, %v1066_v63  ;;  %vm1624_vm11 = vcmp.eq.s32.totalorder %v1623_v28, 25  ;;  %v2017_v28 = vand.u32 41, %v6208_v39 }
 0x14a   : > { %3576 = vrot.lane.b32.xlu0 %v6114_v37, %s5981_s22  ;;  %5753 = vmatmul.mubr.msk.f32.vlgmr.msra.gmra.mxu0 %vm544_vm6, %v5750_v61  ;;  %v1625_v49 = vsel %vm1624_vm11, 1, %v5964_v13 }
 0x14b   : > { %v6389_v3 = vpop.permute.xlu1 %1063  ;;  %v1253_v4 = vpop.permute.xlu0 %1252  ;;  %1344 = vmatprep.mubr.f32.mxu0 %v7119_v35  ;;  %v1633_v55 = vrot.slane %v1625_v49, %v6216_v44  ;;  %v1629_v60 = vrot.slane %v1625_v49, %v6219_v46  ;;  %v1641_v1 = vrot.slane %v1625_v49, %v6233_v53  ;;  %v1637_v7 = vrot.slane %v1625_v49, %v6237_v56 }
 0x14c   : > { %v6395_v8 = vsel %vm1065_vm8, %v1062_v51, %v6389_v3  ;;  %v1263_v19 = vsel %vm1262_vm15, %v1253_v4, %v1255_v58 }
 0x14d   : > { %3570 = vrot.lane.b32.xlu1 %v6095_v29, %s5981_s22  ;;  %5754 = vmatprep.subr.msk.mxu1 %vm1054_vm12, %v6395_v8  ;;  %vm1445_vm12 = vcmp.eq.s32.totalorder %v1432_v31, 1  ;;  %vm1644_vm11 = vcmp.eq.s32.totalorder %v1637_v7, 1 }
 0x14e   : > { %3769 = vrot.lane.b32.xlu0 %v6104_v33, %s5982_s26  ;;  %5755 = vmatpush1.msk.msra.mxu1 %vm1053_vm13, %v6398_v9  ;;  %vm1448_vm13 = vcmp.eq.s32.totalorder %v1444_v41, 1 }
 0x14f   : > { %v1257_v11 = vpop.permute.xlu1 %1256  ;;  %v6407_v12 = vpop.permute.xlu0 %1260  ;;  %5756 = vmatmul.mubr.msk.f32.vlgmr.msra.gmra.mxu1 %vm544_vm6, %v5750_v61 }
 0x150   : > { %v6413_v17 = vsel %vm1262_vm15, %v1255_v58, %v1257_v11  ;;  %1415 = vmatprep.mubr.f32.mxu1 %v7119_v35 }
 0x151   : > { %3578 = vrot.lane.b32.xlu1 %v6325_v27, %s5981_s22  ;;  %5758 = vmatprep.subr.msk.mxu0 %vm1249_vm1, %v6413_v17  ;;  %vm1821_vm1 = vcmp.eq.s32.totalorder %v1820_v54, 9 }
 0x152   : > { %3767 = vrot.lane.b32.xlu0 %v6095_v29, %s5982_s26  ;;  %5759 = vmatpush1.msk.msra.mxu0 %vm1248_vm2, %v1263_v19  ;;  %vm1656_vm2 = vcmask 465920   ;;  %v1822_v10 = vsel %vm1821_vm1, 1, %v5964_v13 }
 0x153   : > { %v1259_v23 = vpop.permute.xlu1 %1258  ;;  %v1454_v16 = vpop.permute.xlu0 %1453  ;;  %5760 = vmatmul.mubr.msk.f32.vlgmr.msra.gmra.mxu0 %vm544_vm6, %v5757_v18  ;;  %v1826_v31 = vrot.slane %v1822_v10, %v6219_v46  ;;  %v1834_v49 = vrot.slane %v1822_v10, %v6237_v56 }
 0x154   : > { %v6428_v25 = vsel %vm1262_vm15, %v1257_v11, %v1259_v23  ;;  %v6432_v22 = vsel %vm1262_vm15, %v1259_v23, %v6407_v12  ;;  %1541 = vmatprep.mubr.f32.mxu0 %v7119_v35 }
 0x155   : > { %3771 = vrot.lane.b32.xlu1 %v6120_v38, %s5982_s26  ;;  %5761 = vmatprep.subr.msk.mxu1 %vm1251_vm3, %v6432_v22  ;;  %vm1643_vm3 = vcmp.eq.s32.totalorder %v1633_v55, 1  ;;  %vm1839_vm1 = vcmp.eq.s32.totalorder %v1826_v31, 1  ;;  %v2214_v55 = vand.u32 20, %v6208_v39 }
 0x156   : > { %3775 = vrot.lane.b32.xlu0 %v6325_v27, %s5982_s26  ;;  %5762 = vmatpush1.msk.msra.mxu1 %vm1250_vm5, %v6428_v25  ;;  %vm1642_vm5 = vcmp.eq.s32.totalorder %v1629_v60, 1 }
 0x157   : > { %v1452_v32 = vpop.permute.xlu1 %1451  ;;  %v1456_v36 = vpop.permute.xlu0 %1455  ;;  %5763 = vmatmul.mubr.msk.f32.vlgmr.msra.gmra.mxu1 %vm544_vm6, %v5757_v18  ;;  %v1830_v18 = vrot.slane %v1822_v10, %v6216_v44 }
 0x158   : > { %v6445_v40 = vsel %vm1459_vm9, %v1452_v32, %v1454_v16  ;;  %1612 = vmatprep.mubr.f32.mxu1 %v7119_v35  ;;  %v6476_v63 = vsel %vm1459_vm9, %v1454_v16, %v1456_v36 }
 0x159   : > { %3773 = vrot.lane.b32.xlu1 %v6114_v37, %s5982_s26  ;;  %5765 = vmatprep.subr.msk.mxu0 %vm1446_vm10, %v6445_v40  ;;  %vm1645_vm10 = vcmp.eq.s32.totalorder %v1641_v1, 1 }
 0x15a   : > { %4146 = vrot.lane.b32.xlu0 %v6325_v27, %s5965_s15 }
 0x15b   : > { %v1450_v42 = vpop.permute.xlu1 %1449  ;;  %v1649_v43 = vpop.permute.xlu0 %1648 }
 0x15c   : > { %v1460_v51 = vsel %vm1459_vm9, %v1450_v42, %v1452_v32  ;;  %v1838_v42 = vrot.slane %v1822_v10, %v6233_v53 }
 0x15d   : > { %3964 = vrot.lane.b32.xlu1 %v6325_v27, %s5966_s11  ;;  %5766 = vmatpush1.msk.msra.mxu0 %vm1445_vm12, %v1460_v51  ;;  %vm7123_vm12 = vcmask 457728   ;;  %v5778_v51 = vld [vmem:[%s7112_s1 + $0x38] sm:$0xff] }
 0x15e   : > { %4510 = vrot.lane.b32.xlu0 %v6325_v27, %s5969_s14  ;;  %5767 = vmatmul.mubr.msk.f32.vlgmr.msra.gmra.mxu0 %vm544_vm6, %v5764_v50 }
 0x15f   : > { %v6467_v58 = vpop.permute.xlu1 %1457  ;;  %v1647_v59 = vpop.permute.xlu0 %1646  ;;  %1738 = vmatprep.mubr.f32.mxu0 %v7119_v35 }
 0x160   : > { %v6473_v61 = vsel %vm1459_vm9, %v1456_v36, %v6467_v58  ;;  %v1657_v15 = vsel %vm1656_vm2, %v1647_v59, %v1649_v43 }
 0x161   : > { %4328 = vrot.lane.b32.xlu1 %v6325_v27, %s5968_s12  ;;  %5768 = vmatprep.subr.msk.mxu1 %vm1448_vm13, %v6473_v61  ;;  %vm1840_vm13 = vcmp.eq.s32.totalorder %v1830_v18, 1 }
 0x162   : > { %4874 = vrot.lane.b32.xlu0 %v6325_v27, %s5971_s17  ;;  %5769 = vmatpush1.msk.msra.mxu1 %vm1447_vm14, %v6476_v63  ;;  %vm2018_vm14 = vcmp.eq.s32.totalorder %v2017_v28, 41  ;;  %v5785_v28 = vld [vmem:[%s7112_s1 + $0x40] sm:$0xff] }
 0x163   : > { %v1651_v2 = vpop.permute.xlu1 %1650  ;;  %v6485_v4 = vpop.permute.xlu0 %1654  ;;  %5770 = vmatmul.mubr.msk.f32.vlgmr.msra.gmra.mxu1 %vm544_vm6, %v5764_v50  ;;  %v2019_v50 = vsel %vm2018_vm14, 1, %v5964_v13 }
 0x164   : > { %v6491_v11 = vsel %vm1656_vm2, %v1649_v43, %v1651_v2  ;;  %1809 = vmatprep.mubr.f32.mxu1 %v7119_v35  ;;  %v2023_v1 = vrot.slane %v2019_v50, %v6219_v46  ;;  %v2035_v10 = vrot.slane %v2019_v50, %v6233_v53  ;;  %v2031_v18 = vrot.slane %v2019_v50, %v6237_v56 }
 0x165   : > { %4692 = vrot.lane.b32.xlu1 %v6325_v27, %s5970_s16  ;;  %5772 = vmatprep.subr.msk.mxu0 %vm1643_vm3, %v6491_v11  ;;  %vm1842_vm3 = vcmp.eq.s32.totalorder %v1838_v42, 1 }
 0x166   : > { %5238 = vrot.lane.b32.xlu0 %v6325_v27, %s5973_s19  ;;  %5773 = vmatpush1.msk.msra.mxu0 %vm1642_vm5, %v1657_v15  ;;  %vm1841_vm5 = vcmp.eq.s32.totalorder %v1834_v49, 1  ;;  %vm2036_vm14 = vcmp.eq.s32.totalorder %v2023_v1, 1 }
 0x167   : > { %v1653_v19 = vpop.permute.xlu1 %1652  ;;  %v1848_v20 = vpop.permute.xlu0 %1847  ;;  %5774 = vmatmul.mubr.msk.f32.vlgmr.msra.gmra.mxu0 %vm544_vm6, %v5771_v14 }
 0x168   : > { %v6506_v23 = vsel %vm1656_vm2, %v1651_v2, %v1653_v19  ;;  %v6510_v16 = vsel %vm1656_vm2, %v1653_v19, %v6485_v4  ;;  %1935 = vmatprep.mubr.f32.mxu0 %v7119_v35 }
 0x169   : > { %5056 = vrot.lane.b32.xlu1 %v6325_v27, %s5972_s18  ;;  %5775 = vmatprep.subr.msk.mxu1 %vm1645_vm10, %v6510_v16  ;;  %vm2215_vm10 = vcmp.eq.s32.totalorder %v2214_v55, 20 }
 0x16a   : > { %5776 = vmatpush1.msk.msra.mxu1 %vm1644_vm11, %v6506_v23  ;;  %vm7121_vm11 = vcmask 449536   ;;  %v2216_v19 = vsel %vm2215_vm10, 1, %v5964_v13 }
 0x16b   : > { %v1846_v32 = vpop.permute.xlu1 %1845  ;;  %v1850_v36 = vpop.permute.xlu0 %1849  ;;  %5777 = vmatmul.mubr.msk.f32.vlgmr.msra.gmra.mxu1 %vm544_vm6, %v5771_v14 }
 0x16c   : > { %v6521_v41 = vsel %vm7123_vm12, %v1846_v32, %v1848_v20  ;;  %2006 = vmatprep.mubr.f32.mxu1 %v7119_v35  ;;  %v6546_v7 = vsel %vm7123_vm12, %v1848_v20, %v1850_v36 }
 0x16d   : > { %5420 = vrot.lane.b32.xlu1 %v6325_v27, %s5974_s20  ;;  %5779 = vmatprep.subr.msk.mxu0 %vm1840_vm13, %v6521_v41  ;;  %v2027_v27 = vrot.slane %v2019_v50, %v6216_v44  ;;  %v2220_v50 = vrot.slane %v2216_v19, %v6219_v46 }
 0x16f   : > { %v1844_v43 = vpop.permute.xlu1 %1843  ;;  %v2043_v48 = vpop.permute.xlu0 %2042  ;;  %vm2037_vm13 = vcmp.eq.s32.totalorder %v2027_v27, 1  ;;  %v2232_v27 = vrot.slane %v2216_v19, %v6233_v53 }
 0x170   : > { %v1854_v54 = vsel %vm7123_vm12, %v1844_v43, %v1846_v32  ;;  %v2224_v32 = vrot.slane %v2216_v19, %v6216_v44 }
 0x171   : > { %5780 = vmatpush1.msk.msra.mxu0 %vm1839_vm1, %v1854_v54  ;;  %vm2039_vm1 = vcmp.eq.s32.totalorder %v2035_v10, 1  ;;  %v2228_v10 = vrot.slane %v2216_v19, %v6237_v56 }
 0x172   : > { %5781 = vmatmul.mubr.msk.f32.vlgmr.msra.gmra.mxu0 %vm544_vm6, %v5778_v51  ;;  %vm2234_vm10 = vcmp.eq.s32.totalorder %v2224_v32, 1 }
 0x173   : > { %v6537_v59 = vpop.permute.xlu1 %1851  ;;  %v2041_v60 = vpop.permute.xlu0 %2040  ;;  %2132 = vmatprep.mubr.f32.mxu0 %v7119_v35 }
 0x174   : > { %v6543_v2 = vsel %vm7123_vm12, %v1850_v36, %v6537_v59  ;;  %v2051_v31 = vsel %vm7121_vm11, %v2041_v60, %v2043_v48 }
 0x175   : > { %5782 = vmatprep.subr.msk.mxu1 %vm1842_vm3, %v6543_v2  ;;  %vm2038_vm3 = vcmp.eq.s32.totalorder %v2031_v18, 1  ;;  %v5792_v18 = vld [vmem:[%s7112_s1 + $0x48] sm:$0xff] }
 0x176   : > { %5783 = vmatpush1.msk.msra.mxu1 %vm1841_vm5, %v6546_v7  ;;  %vm2247_vm5 = vcmask 72704  }
 0x177   : > { %v2045_v14 = vpop.permute.xlu1 %2044  ;;  %v6551_v15 = vpop.permute.xlu0 %2048  ;;  %5784 = vmatmul.mubr.msk.f32.vlgmr.msra.gmra.mxu1 %vm544_vm6, %v5778_v51 }
 0x178   : > { %v6557_v20 = vsel %vm7121_vm11, %v2043_v48, %v2045_v14  ;;  %2203 = vmatprep.mubr.f32.mxu1 %v7119_v35  ;;  %v2411_v48 = vand.u32 4, %v6208_v39 }
 0x179   : > { %5786 = vmatprep.subr.msk.mxu0 %vm2037_vm13, %v6557_v20 }
 0x17a   : > { %5787 = vmatpush1.msk.msra.mxu0 %vm2036_vm14, %v2051_v31  ;;  %vm2412_vm13 = vcmp.eq.s32.totalorder %v2411_v48, 4  ;;  %vm2233_vm14 = vcmp.eq.s32.totalorder %v2220_v50, 1  ;;  %v2607_v31 = vand.u32 36, %v6208_v39 }
 0x17b   : > { %v2047_v36 = vpop.permute.xlu1 %2046  ;;  %v2242_v42 = vpop.permute.xlu0 %2241  ;;  %5788 = vmatmul.mubr.msk.f32.vlgmr.msra.gmra.mxu0 %vm544_vm6, %v5785_v28 }
 0x17c   : > { %v6568_v43 = vsel %vm7121_vm11, %v2045_v14, %v2047_v36  ;;  %v6572_v49 = vsel %vm7121_vm11, %v2047_v36, %v6551_v15  ;;  %2329 = vmatprep.mubr.f32.mxu0 %v7119_v35  ;;  %v2413_v14 = vsel %vm2412_vm13, 1, %v5964_v13 }
 0x17d   : > { %5789 = vmatprep.subr.msk.mxu1 %vm2039_vm1, %v6572_v49  ;;  %vm2236_vm1 = vcmp.eq.s32.totalorder %v2232_v27, 1  ;;  %v2421_v32 = vrot.slane %v2413_v14, %v6216_v44  ;;  %v2417_v19 = vrot.slane %v2413_v14, %v6219_v46 }
 0x17e   : > { %5790 = vmatpush1.msk.msra.mxu1 %vm2038_vm3, %v6568_v43  ;;  %vm2235_vm3 = vcmp.eq.s32.totalorder %v2228_v10, 1  ;;  %v2425_v10 = vrot.slane %v2413_v14, %v6237_v56 }
 0x17f   : > { %v2240_v51 = vpop.permute.xlu1 %2239  ;;  %v2244_v54 = vpop.permute.xlu0 %2243  ;;  %5791 = vmatmul.mubr.msk.f32.vlgmr.msra.gmra.mxu1 %vm544_vm6, %v5785_v28  ;;  %vm2431_vm13 = vcmp.eq.s32.totalorder %v2421_v32, 1 }
 0x180   : > { %v2249_v55 = vsel %vm2247_vm5, %v2240_v51, %v2242_v42  ;;  %2400 = vmatprep.mubr.f32.mxu1 %v7119_v35 }
 0x181   : > { %5793 = vmatprep.subr.msk.mxu0 %vm2234_vm10, %v2249_v55  ;;  %vm2608_vm10 = vcmp.eq.s32.totalorder %v2607_v31, 36  ;;  %v2429_v55 = vrot.slane %v2413_v14, %v6233_v53 }
 0x183   : > { %v2238_v60 = vpop.permute.xlu1 %2237  ;;  %v2437_v1 = vpop.permute.xlu0 %2436 }
 0x184   : > { %v2248_v28 = vsel %vm2247_vm5, %v2238_v60, %v2240_v51  ;;  %v2250_v51 = vsel %vm2247_vm5, %v2242_v42, %v2244_v54  ;;  %v5799_v42 = vld [vmem:[%s7112_s1 + $0x50] sm:$0xff] }
 0x185   : > { %5794 = vmatpush1.msk.msra.mxu0 %vm2233_vm14, %v2248_v28  ;;  %vm2430_vm14 = vcmp.eq.s32.totalorder %v2417_v19, 1  ;;  %v2609_v28 = vsel %vm2608_vm10, 1, %v5964_v13 }
 0x186   : > { %5795 = vmatmul.mubr.msk.f32.vlgmr.msra.gmra.mxu0 %vm544_vm6, %v5792_v18  ;;  %v2617_v32 = vrot.slane %v2609_v28, %v6216_v44 }
 0x187   : > { %v2246_v36 = vpop.permute.xlu1 %2245  ;;  %v2435_v48 = vpop.permute.xlu0 %2434  ;;  %2525 = vmatprep.mubr.f32.mxu0 %v7119_v35 }
 0x188   : > { %v2251_v50 = vsel %vm2247_vm5, %v2244_v54, %v2246_v36  ;;  %v7126_v54 = vmov 0.0   ;;  %v2444_v31 = vsel %vm544_vm6, %v2435_v48, %v2437_v1  ;;  %vm2433_vm5 = vcmp.eq.s32.totalorder %v2429_v55, 1 }
 0x189   : > { %5796 = vmatprep.subr.msk.mxu1 %vm2236_vm1, %v2251_v50  ;;  %vm2432_vm1 = vcmp.eq.s32.totalorder %v2425_v10, 1  ;;  %v2804_v50 = vand.u32 16, %v6208_v39  ;;  %vm2627_vm10 = vcmp.eq.s32.totalorder %v2617_v32, 1  ;;  %v2625_v55 = vrot.slane %v2609_v28, %v6233_v53  ;;  %v5806_v10 = vld [vmem:[%s7112_s1 + $0x58] sm:$0xff] }
 0x18a   : > { %5797 = vmatpush1.msk.msra.mxu1 %vm2235_vm3, %v2250_v51  ;;  %vm2640_vm3 = vcmask 56320  }
 0x18b   : > { %v2439_v27 = vpop.permute.xlu1 %2438  ;;  %v2443_v60 = vpop.permute.xlu0 %2442  ;;  %5798 = vmatmul.mubr.msk.f32.vlgmr.msra.gmra.mxu1 %vm544_vm6, %v5792_v18 }
 0x18c   : > { %v2445_v35 = vsel %vm544_vm6, %v2437_v1, %v2439_v27  ;;  %2596 = vmatprep.mubr.f32.mxu1 %v7126_v54 }
 0x18d   : > { %5800 = vmatprep.subr.msk.mxu0 %vm2431_vm13, %v2445_v35  ;;  %v2613_v35 = vrot.slane %v2609_v28, %v6219_v46  ;;  %vm2805_vm13 = vcmp.eq.s32.totalorder %v2804_v50, 16 }
 0x18e   : > { %5801 = vmatpush1.msk.msra.mxu0 %vm2430_vm14, %v2444_v31  ;;  %v2621_v31 = vrot.slane %v2609_v28, %v6237_v56  ;;  %v2806_v32 = vsel %vm2805_vm13, 1, %v5964_v13  ;;  %vm7122_vm13 = vcmask 7168  }
 0x18f   : > { %v2441_v18 = vpop.permute.xlu1 %2440  ;;  %v2635_v36 = vpop.permute.xlu0 %2634  ;;  %5802 = vmatmul.mubr.msk.f32.vlgmr.msra.gmra.mxu0 %vm544_vm6, %v5799_v42  ;;  %vm2626_vm14 = vcmp.eq.s32.totalorder %v2613_v35, 1  ;;  %v2810_v50 = vrot.slane %v2806_v32, %v6219_v46 }
 0x190   : > { %v2446_v14 = vsel %vm544_vm6, %v2439_v27, %v2441_v18  ;;  %v2447_v19 = vsel %vm544_vm6, %v2441_v18, %v2443_v60  ;;  %2722 = vmatprep.mubr.f32.mxu0 %v7126_v54  ;;  %v3152_v18 = vand.u32 32, %v6208_v39 }
 0x191   : > { %5803 = vmatprep.subr.msk.mxu1 %vm2433_vm5, %v2447_v19  ;;  %vm2629_vm5 = vcmp.eq.s32.totalorder %v2625_v55, 1  ;;  %vm2823_vm11 = vcmp.eq.s32.totalorder %v2810_v50, 1 }
 0x192   : > { %5804 = vmatpush1.msk.msra.mxu1 %vm2432_vm1, %v2446_v14  ;;  %v2814_v14 = vrot.slane %v2806_v32, %v6216_v44  ;;  %vm2628_vm1 = vcmp.eq.s32.totalorder %v2621_v31, 1 }
 0x193   : > { %v2633_v1 = vpop.permute.xlu1 %2632  ;;  %v2637_v48 = vpop.permute.xlu0 %2636  ;;  %5805 = vmatmul.mubr.msk.f32.vlgmr.msra.gmra.mxu1 %vm544_vm6, %v5799_v42 }
 0x194   : > { %v2642_v51 = vsel %vm2640_vm3, %v2633_v1, %v2635_v36  ;;  %2793 = vmatprep.mubr.f32.mxu1 %v7126_v54 }
 0x195   : > { %5807 = vmatprep.subr.msk.mxu0 %vm2627_vm10, %v2642_v51  ;;  %vm3153_vm10 = vcmp.eq.s32.totalorder %v3152_v18, 32  ;;  %v2822_v51 = vrot.slane %v2806_v32, %v6233_v53 }
 0x196   : > { %v3154_v31 = vsel %vm3153_vm10, 1, %v5964_v13 }
 0x197   : > { %v2631_v27 = vpop.permute.xlu1 %2630  ;;  %v2830_v60 = vpop.permute.xlu0 %2829 }
 0x198   : > { %v2641_v42 = vsel %vm2640_vm3, %v2631_v27, %v2633_v1  ;;  %v2643_v1 = vsel %vm2640_vm3, %v2635_v36, %v2637_v48  ;;  %v2818_v27 = vrot.slane %v2806_v32, %v6237_v56  ;;  %v5813_v36 = vld [vmem:[%s7112_s1 + $0x60] sm:$0xff] }
 0x199   : > { %5808 = vmatpush1.msk.msra.mxu0 %vm2626_vm14, %v2641_v42  ;;  %vm2824_vm14 = vcmp.eq.s32.totalorder %v2814_v14, 1 }
 0x19a   : > { %5809 = vmatmul.mubr.msk.f32.vlgmr.msra.gmra.mxu0 %vm544_vm6, %v5806_v10 }
 0x19b   : > { %v2639_v19 = vpop.permute.xlu1 %2638  ;;  %2919 = vmatprep.mubr.f32.mxu0 %v7126_v54 }
 0x19c   : > { %v2644_v28 = vsel %vm2640_vm3, %v2637_v48, %v2639_v19  ;;  %v2828_v35 = vpop.permute.xlu0 %2827  ;;  %vm2826_vm3 = vcmp.eq.s32.totalorder %v2822_v51, 1  ;;  %v3170_v51 = vrot.slane %v3154_v31, %v6233_v53 }
 0x19d   : > { %5810 = vmatprep.subr.msk.mxu1 %vm2629_vm5, %v2644_v28  ;;  %v2838_v48 = vsel %vm7122_vm13, %v2828_v35, %v2830_v60  ;;  %vm2825_vm5 = vcmp.eq.s32.totalorder %v2818_v27, 1  ;;  %v3350_v28 = vand.u32 24, %v6208_v39  ;;  %v5823_v27 = vld [vmem:[%s7112_s1 + $0x70] sm:$0xff] }
 0x19e   : > { %5811 = vmatpush1.msk.msra.mxu1 %vm2628_vm1, %v2643_v1 }
 0x19f   : > { %v2832_v55 = vpop.permute.xlu1 %2831  ;;  %5812 = vmatmul.mubr.msk.f32.vlgmr.msra.gmra.mxu1 %vm544_vm6, %v5806_v10  ;;  %v3162_v10 = vrot.slane %v3154_v31, %v6216_v44  ;;  %vm3351_vm10 = vcmp.eq.s32.totalorder %v3350_v28, 24 }
 0x1a0   : > { %v2839_v42 = vsel %vm7122_vm13, %v2830_v60, %v2832_v55  ;;  %v2836_v19 = vpop.permute.xlu0 %2835  ;;  %2990 = vmatprep.mubr.f32.mxu1 %v7126_v54  ;;  %v5820_v60 = vld [vmem:[%s7112_s1 + $0x68] sm:$0xff] }
 0x1a1   : > { %5814 = vmatprep.subr.msk.mxu0 %vm2824_vm14, %v2839_v42  ;;  %vm3172_vm1 = vcmp.eq.s32.totalorder %v3162_v10, 1  ;;  %v3352_v42 = vsel %vm3351_vm10, 1, %v5964_v13  ;;  %vm3383_vm10 = vcmask 990208  }
 0x1a2   : > { %5815 = vmatpush1.msk.msra.mxu0 %vm2823_vm11, %v2838_v48  ;;  %vm3186_vm11 = vcmask 1039360   ;;  %v3360_v48 = vrot.slane %v3352_v42, %v6216_v44  ;;  %v3364_v28 = vrot.slane %v3352_v42, %v6237_v56 }
 0x1a3   : > { %v2834_v18 = vpop.permute.xlu1 %2833  ;;  %5816 = vmatmul.mubr.msk.f32.vlgmr.msra.gmra.mxu0 %vm544_vm6, %v5813_v36  ;;  %3036 = vmatprep.subr.mxu0 %v6104_v33  ;;  %v3158_v33 = vrot.slane %v3154_v31, %v6219_v46 }
 0x1a4   : > { %v2840_v32 = vsel %vm7122_vm13, %v2832_v55, %v2834_v18  ;;  %v2841_v14 = vsel %vm7122_vm13, %v2834_v18, %v2836_v19  ;;  %v3181_v50 = vpop.permute.xlu0 %3180  ;;  %3037 = vmatpush1.msra.mxu0 %v6095_v29  ;;  %3070 = vmatprep.mubr.f32.mxu0 %v7126_v54  ;;  %v3356_v18 = vrot.slane %v3352_v42, %v6219_v46 }
 0x1a5   : > { %5817 = vmatprep.subr.msk.mxu1 %vm2826_vm3, %v2841_v14  ;;  %vm3171_vm14 = vcmp.eq.s32.totalorder %v3158_v33, 1  ;;  %vm3174_vm3 = vcmp.eq.s32.totalorder %v3170_v51, 1 }
 0x1a6   : > { %5818 = vmatpush1.msk.msra.mxu1 %vm2825_vm5, %v2840_v32  ;;  %vm3369_vm13 = vcmp.eq.s32.totalorder %v3356_v18, 1 }
 0x1a7   : > { %v3179_v35 = vpop.permute.xlu1 %3178  ;;  %5819 = vmatmul.mubr.msk.f32.vlgmr.msra.gmra.mxu1 %vm544_vm6, %v5813_v36  ;;  %5821 = vmatmul.mubr.msk.f32.vlgmr.msra.gmra.mxu0 %vm544_vm6, %v5820_v60  ;;  %v3547_v36 = vand.u32 8, %v6208_v39  ;;  %v3368_v39 = vrot.slane %v3352_v42, %v6233_v53 }
 0x1a8   : > { %v3188_v29 = vsel %vm3186_vm11, %v3179_v35, %v3181_v50  ;;  %3107 = vmatprep.subr.mxu1 %v6114_v37  ;;  %v3183_v1 = vpop.permute.xlu0 %3182  ;;  %3141 = vmatprep.mubr.f32.mxu1 %v7126_v54  ;;  %v3166_v37 = vrot.slane %v3154_v31, %v6237_v56 }
 0x1a9   : > { %3108 = vmatpush1.msra.mxu1 %v6120_v38  ;;  %5824 = vmatprep.subr.msk.mxu0 %vm3172_vm1, %v3188_v29  ;;  %vm3548_vm1 = vcmp.eq.s32.totalorder %v3547_v36, 8  ;;  %v3189_v14 = vsel %vm3186_vm11, %v3181_v50, %v3183_v1  ;;  %v5830_v50 = vld [vmem:[%s7112_s1 + $0x78] sm:$0xff] }
 0x1aa   : > { %3268 = vmatprep.mubr.f32.mxu0 %v7126_v54  ;;  %vm3173_vm5 = vcmp.eq.s32.totalorder %v3166_v37, 1  ;;  %v3549_v33 = vsel %vm3548_vm1, 1, %v5964_v13 }
 0x1ab   : > { %v3177_v55 = vpop.permute.xlu1 %3176  ;;  %5822 = vmatmul.mubr.msk.f32.vlgmr.msra.gmra.mxu1 %vm544_vm6, %v5820_v60  ;;  %v3557_v51 = vrot.slane %v3549_v33, %v6216_v44  ;;  %v3553_v36 = vrot.slane %v3549_v33, %v6219_v46 }
 0x1ac   : > { %v3187_v19 = vsel %vm3186_vm11, %v3177_v55, %v3179_v35  ;;  %v3376_v38 = vpop.permute.xlu0 %3375  ;;  %3339 = vmatprep.mubr.f32.mxu1 %v7126_v54 }
 0x1ad   : > { %5825 = vmatpush1.msk.msra.mxu0 %vm3171_vm14, %v3187_v19  ;;  %vm3370_vm14 = vcmp.eq.s32.totalorder %v3360_v48, 1  ;;  %v6691_v19 = vld [vmem:[%s6040_s9] sm:$0xf] }
 0x1ae   : > { %5826 = vmatmul.mubr.msk.f32.vlgmr.msra.gmra.mxu0 %vm544_vm6, %v5823_v27  ;;  %v3941_v48 = vand.u32 22, %v6691_v19 }
 0x1af   : > { %v3185_v10 = vpop.permute.xlu1 %3184  ;;  %3465 = vmatprep.mubr.f32.mxu0 %v7126_v54 }
 0x1b0   : > { %v3190_v31 = vsel %vm3186_vm11, %v3183_v1, %v3185_v10  ;;  %v3374_v32 = vpop.permute.xlu0 %3373  ;;  %vm3372_vm11 = vcmp.eq.s32.totalorder %v3368_v39, 1 }
 0x1b1   : > { %5827 = vmatprep.subr.msk.mxu1 %vm3174_vm3, %v3190_v31  ;;  %v3384_v1 = vsel %vm3383_vm10, %v3374_v32, %v3376_v38  ;;  %vm3371_vm3 = vcmp.eq.s32.totalorder %v3364_v28, 1  ;;  %v4123_v32 = vand.u32 6, %v6691_v19  ;;  %v3561_v28 = vrot.slane %v3549_v33, %v6237_v56 }
 0x1b2   : > { %5828 = vmatpush1.msk.msra.mxu1 %vm3173_vm5, %v3189_v14  ;;  %vm3567_vm5 = vcmp.eq.s32.totalorder %v3557_v51, 1  ;;  %v3565_v14 = vrot.slane %v3549_v33, %v6233_v53 }
 0x1b3   : > { %v3378_v60 = vpop.permute.xlu1 %3377  ;;  %5829 = vmatmul.mubr.msk.f32.vlgmr.msra.gmra.mxu1 %vm544_vm6, %v5823_v27 }
 0x1b4   : > { %v3385_v35 = vsel %vm3383_vm10, %v3376_v38, %v3378_v60  ;;  %v3382_v29 = vpop.permute.xlu0 %3381  ;;  %3536 = vmatprep.mubr.f32.mxu1 %v7126_v54  ;;  %v3744_v38 = vand.u32 40, %v6691_v19 }
 0x1b5   : > { %5831 = vmatprep.subr.msk.mxu0 %vm3370_vm14, %v3385_v35  ;;  %vm3942_vm14 = vcmp.eq.s32.totalorder %v3941_v48, 22 }
 0x1b6   : > { %5832 = vmatpush1.msk.msra.mxu0 %vm3369_vm13, %v3384_v1  ;;  %vm3580_vm13 = vcmask 982016   ;;  %vm3745_vm1 = vcmp.eq.s32.totalorder %v3744_v38, 40  ;;  %v4305_v1 = vand.u32 38, %v6691_v19  ;;  %v6709_v51 = vsel %vm3942_vm14, 1, %v5964_v13 }
 0x1b7   : > { %v3380_v55 = vpop.permute.xlu1 %3379  ;;  %5833 = vmatmul.mubr.msk.f32.vlgmr.msra.gmra.mxu0 %vm544_vm6, %v5830_v50  ;;  %v3746_v35 = vsel %vm3745_vm1, 1, %v5964_v13  ;;  %v3951_v48 = vrot.slane %v6709_v51, %v6216_v44 }
 0x1b8   : > { %v3386_v27 = vsel %vm3383_vm10, %v3378_v60, %v3380_v55  ;;  %v3387_v37 = vsel %vm3383_vm10, %v3380_v55, %v3382_v29  ;;  %v3575_v42 = vpop.permute.xlu0 %3574  ;;  %3662 = vmatprep.mubr.f32.mxu0 %v7126_v54  ;;  %vm3566_vm10 = vcmp.eq.s32.totalorder %v3553_v36, 1  ;;  %v5837_v60 = vld [vmem:[%s7112_s1 + $0x80] sm:$0xff]  ;;  %v3754_v55 = vrot.slane %v3746_v35, %v6216_v44 }
 0x1b9   : > { %5834 = vmatprep.subr.msk.mxu1 %vm3372_vm11, %v3387_v37  ;;  %vm4124_vm11 = vcmp.eq.s32.totalorder %v4123_v32, 6  ;;  %v3750_v33 = vrot.slane %v3746_v35, %v6219_v46  ;;  %vm4306_vm1 = vcmp.eq.s32.totalorder %v4305_v1, 38  ;;  %v3947_v32 = vrot.slane %v6709_v51, %v6219_v46  ;;  %v5844_v1 = vld [vmem:[%s7112_s1 + $0x88] sm:$0xff] }
 0x1ba   : > { %5835 = vmatpush1.msk.msra.mxu1 %vm3371_vm3, %v3386_v27  ;;  %vm3569_vm3 = vcmp.eq.s32.totalorder %v3565_v14, 1  ;;  %v6716_v37 = vsel %vm4124_vm11, 1, %v5964_v13  ;;  %vm3764_vm14 = vcmp.eq.s32.totalorder %v3754_v55, 1  ;;  %v3762_v14 = vrot.slane %v3746_v35, %v6233_v53 }
 0x1bb   : > { %v3573_v10 = vpop.permute.xlu1 %3572  ;;  %5836 = vmatmul.mubr.msk.f32.vlgmr.msra.gmra.mxu1 %vm544_vm6, %v5830_v50  ;;  %vm3763_vm11 = vcmp.eq.s32.totalorder %v3750_v33, 1  ;;  %v4851_v55 = vand.u32 34, %v6691_v19 }
 0x1bc   : > { %v3582_v18 = vsel %vm3580_vm13, %v3573_v10, %v3575_v42  ;;  %v3577_v31 = vpop.permute.xlu0 %3576  ;;  %3733 = vmatprep.mubr.f32.mxu1 %v7126_v54 }
 0x1bd   : > { %5838 = vmatprep.subr.msk.mxu0 %vm3567_vm5, %v3582_v18  ;;  %vm3568_vm5 = vcmp.eq.s32.totalorder %v3561_v28, 1  ;;  %v3583_v18 = vsel %vm3580_vm13, %v3575_v42, %v3577_v31  ;;  %v6731_v42 = vsel %vm4306_vm1, 1, %v5964_v13  ;;  %vm6754_vm1 = vcmp.eq.s32.totalorder %v3762_v14, 1 }
 0x1be   : > { %v3955_v14 = vrot.slane %v6709_v51, %v6237_v56 }
 0x1bf   : > { %v3571_v39 = vpop.permute.xlu1 %3570 }
 0x1c0   : > { %v3581_v29 = vsel %vm3580_vm13, %v3571_v39, %v3573_v10  ;;  %v3770_v50 = vpop.permute.xlu0 %3769  ;;  %v4487_v10 = vand.u32 18, %v6691_v19  ;;  %v4133_v39 = vrot.slane %v6716_v37, %v6216_v44 }
 0x1c1   : > { %5839 = vmatpush1.msk.msra.mxu0 %vm3566_vm10, %v3581_v29  ;;  %vm3777_vm10 = vcmask 973824   ;;  %v3758_v29 = vrot.slane %v3746_v35, %v6237_v56 }
 0x1c2   : > { %5840 = vmatmul.mubr.msk.f32.vlgmr.msra.gmra.mxu0 %vm544_vm6, %v5837_v60  ;;  %vm6758_vm12 = vcmp.eq.s32.totalorder %v4133_v39, 1 }
 0x1c3   : > { %v3579_v27 = vpop.permute.xlu1 %3578  ;;  %3859 = vmatprep.mubr.f32.mxu0 %v7126_v54 }
 0x1c4   : > { %v3584_v38 = vsel %vm3580_vm13, %v3577_v31, %v3579_v27  ;;  %v3768_v36 = vpop.permute.xlu0 %3767  ;;  %vm6737_vm13 = vcmp.eq.s32.totalorder %v3951_v48, 1  ;;  %v4669_v48 = vand.u32 2, %v6691_v19 }
 0x1c5   : > { %5841 = vmatprep.subr.msk.mxu1 %vm3569_vm3, %v3584_v38  ;;  %vm6742_vm3 = vcmp.eq.s32.totalorder %v4487_v10, 18  ;;  %v3778_v35 = vsel %vm3777_vm10, %v3768_v36, %v3770_v50  ;;  %v4129_v38 = vrot.slane %v6716_v37, %v6219_v46  ;;  %v3959_v36 = vrot.slane %v6709_v51, %v6233_v53 }
 0x1c6   : > { %5842 = vmatpush1.msk.msra.mxu1 %vm3568_vm5, %v3583_v18  ;;  %vm6747_vm5 = vcmp.eq.s32.totalorder %v3947_v32, 1  ;;  %v6775_v39 = vsel %vm6742_vm3, 1, %v5964_v13  ;;  %v4141_v51 = vrot.slane %v6716_v37, %v6233_v53  ;;  %v4323_v18 = vrot.slane %v6731_v42, %v6233_v53 }
 0x1c7   : > { %v3772_v28 = vpop.permute.xlu1 %3771  ;;  %5843 = vmatmul.mubr.msk.f32.vlgmr.msra.gmra.mxu1 %vm544_vm6, %v5837_v60  ;;  %vm6808_vm3 = vcmp.eq.s32.totalorder %v3959_v36, 1  ;;  %v4497_v33 = vrot.slane %v6775_v39, %v6216_v44  ;;  %v5872_v60 = vld [vmem:[%s7112_s1 + $0xa8] sm:$0xff] }
 0x1c8   : > { %v3779_v31 = vsel %vm3777_vm10, %v3770_v50, %v3772_v28  ;;  %3930 = vmatprep.mubr.f32.mxu1 %v7126_v54  ;;  %v3776_v27 = vpop.permute.xlu0 %3775  ;;  %v4315_v50 = vrot.slane %v6731_v42, %v6216_v44 }
 0x1c9   : > { %5845 = vmatprep.subr.msk.mxu0 %vm3764_vm14, %v3779_v31  ;;  %vm3765_vm14 = vcmp.eq.s32.totalorder %v3758_v29, 1 }
 0x1ca   : > { %5846 = vmatpush1.msk.msra.mxu0 %vm3763_vm11, %v3778_v35  ;;  %vm6799_vm11 = vcmp.eq.s32.totalorder %v4669_v48, 2 }
 0x1cb   : > { %v3774_v32 = vpop.permute.xlu1 %3773  ;;  %5847 = vmatmul.mubr.msk.f32.vlgmr.msra.gmra.mxu0 %vm544_vm6, %v5844_v1  ;;  %5852 = vmatprep.subr.msk.mxu0 %vm6737_vm13, %v6316_v26  ;;  %v5851_v26 = vld [vmem:[%s7112_s1 + $0x90] sm:$0xff]  ;;  %vm6804_vm13 = vcmp.eq.s32.totalorder %v4315_v50, 1  ;;  %v6836_v50 = vsel %vm6799_vm11, 1, %v5964_v13  ;;  %vm4327_vm11 = vcmp.eq.s32.totalorder %v4323_v18, 1 }
 0x1cc   : > { %v3780_v31 = vsel %vm3777_vm10, %v3772_v28, %v3774_v32  ;;  %v3781_v35 = vsel %vm3777_vm10, %v3774_v32, %v3776_v27  ;;  %5853 = vmatpush1.msk.msra.mxu0 %vm6747_vm5, %v6257_v0  ;;  %4041 = vmatprep.mubr.f32.mxu0 %v7126_v54  ;;  %vm6793_vm10 = vcmp.eq.s32.totalorder %v4129_v38, 1  ;;  %v4311_v0 = vrot.slane %v6731_v42, %v6219_v46  ;;  %v4147_v38 = vpop.permute.xlu0 %4146 }
 0x1cd   : > { %5848 = vmatprep.subr.msk.mxu1 %vm6754_vm1, %v3781_v35  ;;  %5859 = vmatprep.subr.msk.mxu0 %vm6758_vm12, %v6273_v6  ;;  %v4137_v27 = vrot.slane %v6716_v37, %v6237_v56  ;;  %vm3962_vm12 = vcmp.eq.s32.totalorder %v3955_v14, 1  ;;  %v5858_v37 = vld [vmem:[%s7112_s1 + $0x98] sm:$0xff]  ;;  %vm6829_vm5 = vcmp.eq.s32.totalorder %v4141_v51, 1  ;;  %vm6849_vm1 = vcmp.eq.s32.totalorder %v4851_v55, 34 }
 0x1ce   : > { %5849 = vmatpush1.msk.msra.mxu1 %vm3765_vm14, %v3780_v31  ;;  %v5033_v32 = vand.u32 26, %v6691_v19  ;;  %v4505_v14 = vrot.slane %v6775_v39, %v6233_v53  ;;  %v5215_v28 = vand.u32 10, %v6691_v19 }
 0x1cf   : > { %v3965_v48 = vpop.permute.xlu1 %3964  ;;  %5850 = vmatmul.mubr.msk.f32.vlgmr.msra.gmra.mxu1 %vm544_vm6, %v5844_v1  ;;  %5854 = vmatmul.mubr.msk.f32.vlgmr.msra.gmra.mxu0 %vm544_vm6, %v5851_v26  ;;  %vm4144_vm14 = vcmp.eq.s32.totalorder %v4137_v27, 1  ;;  %v5886_v1 = vld [vmem:[%s7112_s1 + $0xb8] sm:$0xff] }
 0x1d0   : > { %v3966_v10 = vsel %vm482_vm7, %v6302_v21, %v3965_v48  ;;  %5860 = vmatpush1.msk.msra.mxu0 %vm6793_vm10, %v6240_v57  ;;  %4112 = vmatprep.mubr.f32.mxu1 %v7126_v54  ;;  %vm6843_vm7 = vcmp.eq.s32.totalorder %v4311_v0, 1  ;;  %v4319_v21 = vrot.slane %v6731_v42, %v6237_v56  ;;  %vm4507_vm10 = vcmp.eq.s32.totalorder %v4497_v33, 1  ;;  %v5879_v48 = vld [vmem:[%s7112_s1 + $0xb0] sm:$0xff]  ;;  %v5893_v57 = vld [vmem:[%s7112_s1 + $0xc0] sm:$0xff] }
 0x1d1   : > { %5866 = vmatprep.subr.msk.mxu0 %vm6804_vm13, %v6350_v45  ;;  %5855 = vmatprep.subr.msk.mxu1 %vm6808_vm3, %v3966_v10  ;;  %v4493_v45 = vrot.slane %v6775_v39, %v6219_v46  ;;  %v4148_v42 = vsel %vm529_vm4, %v6251_v62, %v4147_v38  ;;  %v6876_v62 = vsel %vm6849_vm1, 1, %v5964_v13  ;;  %vm4509_vm3 = vcmp.eq.s32.totalorder %v4505_v14, 1 }
 0x1d2   : > { %5856 = vmatpush1.msk.msra.mxu1 %vm3962_vm12, %v6308_v24  ;;  %4223 = vmatprep.mubr.f32.mxu0 %v7126_v54  ;;  %v4679_v24 = vrot.slane %v6836_v50, %v6216_v44  ;;  %vm6883_vm4 = vcmp.eq.s32.totalorder %v4319_v21, 1  ;;  %v4869_v27 = vrot.slane %v6876_v62, %v6233_v53 }
 0x1d3   : > { %v4329_v31 = vpop.permute.xlu1 %4328  ;;  %5857 = vmatmul.mubr.msk.f32.vlgmr.msra.gmra.mxu1 %vm544_vm6, %v5851_v26  ;;  %5861 = vmatmul.mubr.msk.f32.vlgmr.msra.gmra.mxu0 %vm544_vm6, %v5858_v37  ;;  %v4511_v26 = vpop.permute.xlu0 %4510  ;;  %vm4506_vm13 = vcmp.eq.s32.totalorder %v4493_v45, 1 }
 0x1d4   : > { %v4330_v35 = vsel %vm868_vm0, %v6327_v30, %v4329_v31  ;;  %5862 = vmatprep.subr.msk.mxu1 %vm6829_vm5, %v4148_v42  ;;  %5867 = vmatpush1.msk.msra.mxu0 %vm6843_vm7, %v6335_v34  ;;  %v5865_v30 = vld [vmem:[%s7112_s1 + $0xa0] sm:$0xff]  ;;  %v4501_v34 = vrot.slane %v6775_v39, %v6237_v56  ;;  %vm5034_vm0 = vcmp.eq.s32.totalorder %v5033_v32, 26  ;;  %vm4689_vm12 = vcmp.eq.s32.totalorder %v4679_v24, 1 }
 0x1d5   : > { %5863 = vmatpush1.msk.msra.mxu1 %vm4144_vm14, %v6270_v5  ;;  %5873 = vmatprep.subr.msk.mxu0 %vm4507_vm10, %v6398_v9  ;;  %v4675_v5 = vrot.slane %v6836_v50, %v6219_v46  ;;  %v4687_v9 = vrot.slane %v6836_v50, %v6233_v53  ;;  %v4861_v39 = vrot.slane %v6876_v62, %v6216_v44  ;;  %v6906_v29 = vsel %vm5034_vm0, 1, %v5964_v13 }
 0x1d6   : > { %5869 = vmatprep.subr.msk.mxu1 %vm4327_vm11, %v4330_v35  ;;  %4294 = vmatprep.mubr.f32.mxu1 %v7126_v54  ;;  %v4512_v0 = vsel %vm1065_vm8, %v6389_v3, %v4511_v26  ;;  %vm6912_vm5 = vcmp.eq.s32.totalorder %v4501_v34, 1  ;;  %v4683_v3 = vrot.slane %v6836_v50, %v6237_v56  ;;  %vm5216_vm8 = vcmp.eq.s32.totalorder %v5215_v28, 10 }
 0x1d7   : > { %4405 = vmatprep.mubr.f32.mxu0 %v7126_v54  ;;  %5864 = vmatmul.mubr.msk.f32.vlgmr.msra.gmra.mxu1 %vm544_vm6, %v5858_v37  ;;  %v4693_v55 = vpop.permute.xlu1 %4692  ;;  %vm4688_vm7 = vcmp.eq.s32.totalorder %v4675_v5, 1  ;;  %vm4691_vm1 = vcmp.eq.s32.totalorder %v4687_v9, 1  ;;  %vm4871_vm14 = vcmp.eq.s32.totalorder %v4861_v39, 1  ;;  %v6936_v33 = vsel %vm5216_vm8, 1, %v5964_v13  ;;  %v4875_v38 = vpop.permute.xlu0 %4874 }
 0x1d8   : > { %5868 = vmatmul.mubr.msk.f32.vlgmr.msra.gmra.mxu0 %vm544_vm6, %v5865_v30  ;;  %5870 = vmatpush1.msk.msra.mxu1 %vm6883_vm4, %v6354_v47  ;;  %v5397_v47 = vand.u32 42, %v6691_v19  ;;  %v5043_v19 = vrot.slane %v6906_v29, %v6216_v44  ;;  %vm4690_vm10 = vcmp.eq.s32.totalorder %v4683_v3, 1  ;;  %vm4873_vm4 = vcmp.eq.s32.totalorder %v4869_v27, 1 }
 0x1d9   : > { %5874 = vmatpush1.msk.msra.mxu0 %vm4506_vm13, %v6367_v52  ;;  %5876 = vmatprep.subr.msk.mxu1 %vm4509_vm3, %v4512_v0  ;;  %v4857_v52 = vrot.slane %v6876_v62, %v6219_v46  ;;  %v5225_v18 = vrot.slane %v6936_v33, %v6216_v44  ;;  %v5047_v50 = vrot.slane %v6906_v29, %v6237_v56 }
 0x1da   : > { %5880 = vmatprep.subr.msk.mxu0 %vm4689_vm12, %v6428_v25  ;;  %4476 = vmatprep.mubr.f32.mxu1 %v7126_v54  ;;  %v4694_v25 = vsel %vm1262_vm15, %v6407_v12, %v4693_v55  ;;  %v4865_v12 = vrot.slane %v6876_v62, %v6237_v56  ;;  %vm5398_vm15 = vcmp.eq.s32.totalorder %v5397_v47, 42  ;;  %vm5053_vm0 = vcmp.eq.s32.totalorder %v5043_v19, 1 }
 0x1db   : > { %4587 = vmatprep.mubr.f32.mxu0 %v7126_v54  ;;  %5871 = vmatmul.mubr.msk.f32.vlgmr.msra.gmra.mxu1 %vm544_vm6, %v5865_v30  ;;  %vm4870_vm11 = vcmp.eq.s32.totalorder %v4857_v52, 1  ;;  %v5399_v10 = vsel %vm5398_vm15, 1, %v5964_v13  ;;  %v5057_v37 = vpop.permute.xlu1 %5056  ;;  %v5221_v13 = vrot.slane %v6936_v33, %v6219_v46  ;;  %vm5235_vm12 = vcmp.eq.s32.totalorder %v5225_v18, 1 }
 0x1dc   : > { %5875 = vmatmul.mubr.msk.f32.vlgmr.msra.gmra.mxu0 %vm544_vm6, %v5872_v60  ;;  %5877 = vmatpush1.msk.msra.mxu1 %vm6912_vm5, %v6395_v8  ;;  %v5039_v8 = vrot.slane %v6906_v29, %v6219_v46  ;;  %vm4872_vm13 = vcmp.eq.s32.totalorder %v4865_v12, 1  ;;  %vm5054_vm5 = vcmp.eq.s32.totalorder %v5047_v50, 1  ;;  %v5229_v21 = vrot.slane %v6936_v33, %v6237_v56 }
 0x1dd   : > { %5881 = vmatpush1.msk.msra.mxu0 %vm4688_vm7, %v6413_v17  ;;  %5883 = vmatprep.subr.msk.mxu1 %vm4691_vm1, %v4694_v25  ;;  %v5051_v17 = vrot.slane %v6906_v29, %v6233_v53  ;;  %vm7155_vm1 = vcmask 457728  }
 0x1de   : > { %5887 = vmatprep.subr.msk.mxu0 %vm4871_vm14, %v6476_v63  ;;  %4658 = vmatprep.mubr.f32.mxu1 %v7126_v54  ;;  %v4876_v63 = vsel %vm1459_vm9, %v6467_v58, %v4875_v38  ;;  %vm5052_vm9 = vcmp.eq.s32.totalorder %v5039_v8, 1  ;;  %v5058_v58 = vsel %vm1656_vm2, %v6485_v4, %v5057_v37  ;;  %vm5234_vm2 = vcmp.eq.s32.totalorder %v5221_v13, 1 }
 0x1df   : > { %4769 = vmatprep.mubr.f32.mxu0 %v7126_v54  ;;  %5878 = vmatmul.mubr.msk.f32.vlgmr.msra.gmra.mxu1 %vm544_vm6, %v5872_v60  ;;  %vm5055_vm3 = vcmp.eq.s32.totalorder %v5051_v17, 1  ;;  %vm5236_vm14 = vcmp.eq.s32.totalorder %v5229_v21, 1 }
 0x1e0   : > { %5882 = vmatmul.mubr.msk.f32.vlgmr.msra.gmra.mxu0 %vm544_vm6, %v5879_v48  ;;  %5884 = vmatpush1.msk.msra.mxu1 %vm4690_vm10, %v6432_v22  ;;  %v5233_v22 = vrot.slane %v6936_v33, %v6233_v53 }
 0x1e1   : > { %5888 = vmatpush1.msk.msra.mxu0 %vm4870_vm11, %v6445_v40  ;;  %5890 = vmatprep.subr.msk.mxu1 %vm4873_vm4, %v4876_v63  ;;  %v5407_v40 = vrot.slane %v5399_v10, %v6216_v44  ;;  %v5403_v44 = vrot.slane %v5399_v10, %v6219_v46  ;;  %v5900_v46 = vld [vmem:[%s7112_s1 + $0xc8] sm:$0xff]  ;;  %vm7156_vm11 = vcmask 449536  }
 0x1e2   : > { %5894 = vmatprep.subr.msk.mxu0 %vm5053_vm0, %v6506_v23  ;;  %4840 = vmatprep.mubr.f32.mxu1 %v7126_v54  ;;  %v5239_v23 = vpop.permute.xlu0 %5238  ;;  %vm5237_vm8 = vcmp.eq.s32.totalorder %v5233_v22, 1 }
 0x1e3   : > { %4951 = vmatprep.mubr.f32.mxu0 %v7126_v54  ;;  %5885 = vmatmul.mubr.msk.f32.vlgmr.msra.gmra.mxu1 %vm544_vm6, %v5879_v48  ;;  %vm5417_vm7 = vcmp.eq.s32.totalorder %v5407_v40, 1  ;;  %v5240_v4 = vsel %vm7155_vm1, %v6537_v59, %v5239_v23  ;;  %vm5416_vm10 = vcmp.eq.s32.totalorder %v5403_v44, 1 }
 0x1e4   : > { %5889 = vmatmul.mubr.msk.f32.vlgmr.msra.gmra.mxu0 %vm544_vm6, %v5886_v1  ;;  %5891 = vmatpush1.msk.msra.mxu1 %vm4872_vm13, %v6473_v61  ;;  %v5415_v61 = vrot.slane %v5399_v10, %v6233_v53  ;;  %v5411_v53 = vrot.slane %v5399_v10, %v6237_v56  ;;  %v5907_v56 = vld [vmem:[%s7112_s1 + $0xd0] sm:$0xff] }
 0x1e5   : > { %5895 = vmatpush1.msk.msra.mxu0 %vm5052_vm9, %v6491_v11  ;;  %5897 = vmatprep.subr.msk.mxu1 %vm5055_vm3, %v5058_v58  ;;  %v5421_v11 = vpop.permute.xlu1 %5420 }
 0x1e6   : > { %5901 = vmatprep.subr.msk.mxu0 %vm5235_vm12, %v6546_v7  ;;  %5022 = vmatprep.mubr.f32.mxu1 %v7126_v54  ;;  %vm5419_vm15 = vcmp.eq.s32.totalorder %v5415_v61, 1  ;;  %vm5418_vm4 = vcmp.eq.s32.totalorder %v5411_v53, 1 }
 0x1e7   : > { %5133 = vmatprep.mubr.f32.mxu0 %v7126_v54  ;;  %5892 = vmatmul.mubr.msk.f32.vlgmr.msra.gmra.mxu1 %vm544_vm6, %v5886_v1 }
 0x1e8   : > { %5896 = vmatmul.mubr.msk.f32.vlgmr.msra.gmra.mxu0 %vm544_vm6, %v5893_v57  ;;  %5898 = vmatpush1.msk.msra.mxu1 %vm5054_vm5, %v6510_v16  ;;  %v5422_v16 = vsel %vm7156_vm11, %v6551_v15, %v5421_v11 }
 0x1e9   : > { %5902 = vmatpush1.msk.msra.mxu0 %vm5234_vm2, %v6521_v41  ;;  %5904 = vmatprep.subr.msk.mxu1 %vm5237_vm8, %v5240_v4 }
 0x1ea   : > { %5908 = vmatprep.subr.msk.mxu0 %vm5417_vm7, %v6568_v43  ;;  %5204 = vmatprep.mubr.f32.mxu1 %v7126_v54 }
 0x1eb   : > { %5315 = vmatprep.mubr.f32.mxu0 %v7126_v54  ;;  %5899 = vmatmul.mubr.msk.f32.vlgmr.msra.gmra.mxu1 %vm544_vm6, %v5893_v57  ;;  %v614_v41 = vpop.f32.mrf.mxu0 }
 0x1ec   : > { %5903 = vmatmul.mubr.msk.f32.vlgmr.msra.gmra.mxu0 %vm544_vm6, %v5900_v46  ;;  %5905 = vmatpush1.msk.msra.mxu1 %vm5236_vm14, %v6543_v2 }
 0x1ed   : > { %5909 = vmatpush1.msk.msra.mxu0 %vm5416_vm10, %v6557_v20  ;;  %5911 = vmatprep.subr.msk.mxu1 %vm5419_vm15, %v5422_v16  ;;  %v616_v59 = vpop.f32.mrf.mxu0 }
 0x1ee   : > { %5386 = vmatprep.mubr.f32.mxu1 %v7126_v54  ;;  %5497 = vmatprep.mubr.f32.mxu0 %v7126_v54 }
 0x1ef   : > { %5906 = vmatmul.mubr.msk.f32.vlgmr.msra.gmra.mxu1 %vm544_vm6, %v5900_v46 }
 0x1f0   : > { %5910 = vmatmul.mubr.msk.f32.vlgmr.msra.gmra.mxu0 %vm544_vm6, %v5907_v56  ;;  %5912 = vmatpush1.msk.msra.mxu1 %vm5418_vm4, %v6572_v49 }
 0x1f1   : > { %5568 = vmatprep.mubr.f32.mxu1 %v7126_v54 }
 0x1f3   : > { %5913 = vmatmul.mubr.msk.f32.vlgmr.msra.gmra.mxu1 %vm544_vm6, %v5907_v56  ;;  %v685_v2 = vpop.f32.mrf.mxu1  ;;  %vm7157_vm6 = vcmask 7168  }
 0x1f4   : > { %vm7158_vm0 = vmmov %vm7157_vm6 }
 0x1f5   : > { %v687_v15 = vpop.f32.mrf.mxu1 }
 0x1f6   : > { %v759_v7 = vpop.f32.mrf.mxu0 }
 0x1f7   : > { %v760_v1 = vadd.f32 %v759_v7, %v614_v41 }
 0x1f8   : > { %v761_v20 = vpop.f32.mrf.mxu0 }
 0x1f9   : > { %v762_v13 = vadd.f32 %v761_v20, %v616_v59 }
 0x1fb   : > { %v830_v43 = vpop.f32.mrf.mxu1 }
 0x1fc   : > { %v831_v40 = vadd.f32 %v830_v43, %v685_v2 }
 0x1fd   : > { %v832_v32 = vpop.f32.mrf.mxu1 }
 0x1fe   : > { %v833_v44 = vadd.f32 %v832_v32, %v687_v15 }
 0x1ff   : > { %v952_v36 = vpop.f32.mrf.mxu0 }
 0x200   : > { %v1028_v58 = vadd.f32 %v952_v36, %v760_v1 }
 0x201   : > { %v954_v45 = vpop.f32.mrf.mxu0 }
 0x202   : > { %v1029_v21 = vadd.f32 %v954_v45, %v762_v13 }
 0x203   : > { %v1023_v14 = vpop.f32.mrf.mxu1 }
 0x204   : > { %v1030_v61 = vadd.f32 %v1023_v14, %v831_v40 }
 0x205   : > { %v1025_v31 = vpop.f32.mrf.mxu1 }
 0x206   : > { %v1031_v16 = vadd.f32 %v1025_v31, %v833_v44 }
 0x20a   : > { %v1149_v42 = vpop.f32.mrf.mxu0 }
 0x20b   : > { %v1225_v4 = vadd.f32 %v1149_v42, %v1028_v58 }
 0x20c   : > { %v1151_v24 = vpop.f32.mrf.mxu0 }
 0x20d   : > { %v1226_v53 = vadd.f32 %v1151_v24, %v1029_v21 }
 0x20f   : > { %v1220_v35 = vpop.f32.mrf.mxu1 }
 0x210   : > { %v1227_v56 = vadd.f32 %v1220_v35, %v1030_v61 }
 0x211   : > { %v1222_v62 = vpop.f32.mrf.mxu1 }
 0x212   : > { %v1228_v43 = vadd.f32 %v1222_v62, %v1031_v16 }
 0x213   : > { %v1346_v49 = vpop.f32.mrf.mxu0 }
 0x214   : > { %v1422_v41 = vadd.f32 %v1346_v49, %v1225_v4 }
 0x215   : > { %v1348_v54 = vpop.f32.mrf.mxu0 }
 0x216   : > { %v1423_v7 = vadd.f32 %v1348_v54, %v1226_v53 }
 0x217   : > { %v1417_v26 = vpop.f32.mrf.mxu1 }
 0x218   : > { %v1424_v36 = vadd.f32 %v1417_v26, %v1227_v56 }
 0x219   : > { %v1419_v51 = vpop.f32.mrf.mxu1 }
 0x21a   : > { %v1425_v1 = vadd.f32 %v1419_v51, %v1228_v43 }
 0x21e   : > { %v1543_v30 = vpop.f32.mrf.mxu0 }
 0x21f   : > { %v1619_v45 = vadd.f32 %v1543_v30, %v1422_v41 }
 0x220   : > { %v1545_v34 = vpop.f32.mrf.mxu0 }
 0x221   : > { %v1620_v32 = vadd.f32 %v1545_v34, %v1423_v7 }
 0x223   : > { %v1614_v28 = vpop.f32.mrf.mxu1 }
 0x224   : > { %v1621_v24 = vadd.f32 %v1614_v28, %v1424_v36 }
 0x225   : > { %v1616_v9 = vpop.f32.mrf.mxu1 }
 0x226   : > { %v1622_v40 = vadd.f32 %v1616_v9, %v1425_v1 }
 0x227   : > { %v1740_v5 = vpop.f32.mrf.mxu0 }
 0x228   : > { %v1816_v31 = vadd.f32 %v1740_v5, %v1619_v45 }
 0x229   : > { %v1742_v39 = vpop.f32.mrf.mxu0 }
 0x22a   : > { %v1817_v49 = vadd.f32 %v1742_v39, %v1620_v32 }
 0x22b   : > { %v1811_v0 = vpop.f32.mrf.mxu1 }
 0x22c   : > { %v1818_v58 = vadd.f32 %v1811_v0, %v1621_v24 }
 0x22d   : > { %v1813_v55 = vpop.f32.mrf.mxu1 }
 0x22e   : > { %v1819_v30 = vadd.f32 %v1813_v55, %v1622_v40 }
 0x232   : > { %v1937_v29 = vpop.f32.mrf.mxu0 }
 0x233   : > { %v2013_v21 = vadd.f32 %v1937_v29, %v1816_v31 }
 0x234   : > { %v1939_v60 = vpop.f32.mrf.mxu0 }
 0x235   : > { %v2014_v62 = vadd.f32 %v1939_v60, %v1817_v49 }
 0x237   : > { %v2008_v6 = vpop.f32.mrf.mxu1 }
 0x238   : > { %v2015_v61 = vadd.f32 %v2008_v6, %v1818_v58 }
 0x239   : > { %v7018_v47 = vpop.f32.mrf.mxu1 }
 0x23a   : > { %v2016_v51 = vadd.f32 %v7018_v47, %v1819_v30 }
 0x23b   : > { %v2134_v3 = vpop.f32.mrf.mxu0 }
 0x23c   : > { %v2210_v4 = vadd.f32 %v2134_v3, %v2013_v21 }
 0x23d   : > { %v2136_v52 = vpop.f32.mrf.mxu0 }
 0x23e   : > { %v2211_v53 = vadd.f32 %v2136_v52, %v2014_v62 }
 0x23f   : > { %v7020_v27 = vpop.f32.mrf.mxu1 }
 0x240   : > { %v2212_v28 = vadd.f32 %v7020_v27, %v2015_v61 }
 0x241   : > { %v7024_v25 = vpop.f32.mrf.mxu1 }
 0x242   : > { %v2213_v60 = vadd.f32 %v7024_v25, %v2016_v51 }
 0x246   : > { %v7022_v19 = vpop.f32.mrf.mxu0 }
 0x247   : > { %v2407_v5 = vadd.f32 %v7022_v19, %v2210_v4 }
 0x248   : > { %v7026_v33 = vpop.f32.mrf.mxu0 }
 0x249   : > { %v2408_v39 = vadd.f32 %v7026_v33, %v2211_v53 }
 0x24b   : > { %v7028_v38 = vpop.f32.mrf.mxu1 }
 0x24c   : > { %v2409_v55 = vadd.f32 %v7028_v38, %v2212_v28 }
 0x24d   : > { %v7032_v12 = vpop.f32.mrf.mxu1 }
 0x24e   : > { %v2410_v27 = vadd.f32 %v7032_v12, %v2213_v60 }
 0x24f   : > { %v7030_v48 = vpop.f32.mrf.mxu0 }
 0x250   : > { %v2603_v6 = vadd.f32 %v7030_v48, %v2407_v5 }
 0x251   : > { %v7034_v8 = vpop.f32.mrf.mxu0 }
 0x252   : > { %v2604_v41 = vadd.f32 %v7034_v8, %v2408_v39 }
 0x253   : > { %v7036_v17 = vpop.f32.mrf.mxu1 }
 0x254   : > { %v2605_v19 = vadd.f32 %v7036_v17, %v2409_v55 }
 0x255   : > { %v7040_v63 = vpop.f32.mrf.mxu1 }
 0x256   : > { %v2606_v32 = vadd.f32 %v7040_v63, %v2410_v27 }
 0x25a   : > { %v7038_v18 = vpop.f32.mrf.mxu0 }
 0x25b   : > { %v2800_v33 = vadd.f32 %v7038_v18, %v2603_v6 }
 0x25c   : > { %v7042_v10 = vpop.f32.mrf.mxu0 }
 0x25d   : > { %v2801_v25 = vadd.f32 %v7042_v10, %v2604_v41 }
 0x25f   : > { %v7044_v37 = vpop.f32.mrf.mxu1 }
 0x260   : > { %v2802_v8 = vadd.f32 %v7044_v37, %v2605_v19 }
 0x261   : > { %v7048_v22 = vpop.f32.mrf.mxu1 }
 0x262   : > { %v2803_v17 = vadd.f32 %v7048_v22, %v2606_v32 }
 0x263   : > { %v7046_v50 = vpop.f32.mrf.mxu0 }
 0x264   : > { %v2997_v38 = vadd.f32 %v7046_v50, %v2800_v33 }
 0x265   : > { %v7050_v23 = vpop.f32.mrf.mxu0 }
 0x266   : > { %v2998_v1 = vadd.f32 %v7050_v23, %v2801_v25 }
 0x267   : > { %v7052_v57 = vpop.f32.mrf.mxu1  ;;  %v7054_v11 = vpop.f32.mrf.mxu0 }
 0x268   : > { %v3148_v12 = vadd.f32 %v7054_v11, %v2997_v38  ;;  %v2999_v18 = vadd.f32 %v7052_v57, %v2802_v8 }
 0x269   : > { %v7056_v46 = vpop.f32.mrf.mxu1  ;;  %v7058_v59 = vpop.f32.mrf.mxu0 }
 0x26a   : > { %v3149_v10 = vadd.f32 %v7058_v59, %v2998_v1  ;;  %v3000_v40 = vadd.f32 %v7056_v46, %v2803_v17 }
 0x26b   : > { %v7060_v2 = vpop.f32.mrf.mxu1 }
 0x26c   : > { %v3150_v63 = vadd.f32 %v7060_v2, %v2999_v18 }
 0x26d   : > { %v7062_v15 = vpop.f32.mrf.mxu1 }
 0x26e   : > { %v3270_v20 = vpop.f32.mrf.mxu0  ;;  %v3151_v11 = vadd.f32 %v7062_v15, %v3000_v40 }
 0x26f   : > { %v3346_v49 = vadd.f32 %v3270_v20, %v3148_v12 }
 0x270   : > { %v3272_v14 = vpop.f32.mrf.mxu0 }
 0x271   : > { %v3347_v37 = vadd.f32 %v3272_v14, %v3149_v10 }
 0x273   : > { %v7064_v42 = vpop.f32.mrf.mxu1 }
 0x274   : > { %v3348_v62 = vadd.f32 %v7064_v42, %v3150_v63 }
 0x275   : > { %v3343_v13 = vpop.f32.mrf.mxu1 }
 0x276   : > { %v3349_v4 = vadd.f32 %v3343_v13, %v3151_v11 }
 0x277   : > { %v3467_v35 = vpop.f32.mrf.mxu0 }
 0x278   : > { %v3543_v21 = vadd.f32 %v3467_v35, %v3346_v49 }
 0x279   : > { %v3469_v54 = vpop.f32.mrf.mxu0 }
 0x27a   : > { %v3544_v30 = vadd.f32 %v3469_v54, %v3347_v37 }
 0x27b   : > { %v3538_v44 = vpop.f32.mrf.mxu1 }
 0x27c   : > { %v3545_v59 = vadd.f32 %v3538_v44, %v3348_v62 }
 0x27d   : > { %v3540_v34 = vpop.f32.mrf.mxu1 }
 0x27e   : > { %v3546_v28 = vadd.f32 %v3540_v34, %v3349_v4 }
 0x282   : > { %v3664_v26 = vpop.f32.mrf.mxu0 }
 0x283   : > { %v3740_v57 = vadd.f32 %v3664_v26, %v3543_v21 }
 0x284   : > { %v3666_v16 = vpop.f32.mrf.mxu0 }
 0x285   : > { %v3741_v53 = vadd.f32 %v3666_v16, %v3544_v30 }
 0x287   : > { %v3735_v56 = vpop.f32.mrf.mxu1 }
 0x288   : > { %v3742_v2 = vadd.f32 %v3735_v56, %v3545_v59 }
 0x289   : > { %v3737_v0 = vpop.f32.mrf.mxu1 }
 0x28a   : > { %v3743_v60 = vadd.f32 %v3737_v0, %v3546_v28 }
 0x28b   : > { %v3861_v9 = vpop.f32.mrf.mxu0 }
 0x28c   : > { %v3937_v51 = vadd.f32 %v3861_v9, %v3740_v57 }
 0x28d   : > { %v3863_v29 = vpop.f32.mrf.mxu0 }
 0x28e   : > { %v3938_v14 = vadd.f32 %v3863_v29, %v3741_v53 }
 0x28f   : > { %v3932_v3 = vpop.f32.mrf.mxu1  ;;  %v4043_v52 = vpop.f32.mrf.mxu0 }
 0x290   : > { %v4119_v35 = vadd.f32 %v4043_v52, %v3937_v51  ;;  %v3939_v15 = vadd.f32 %v3932_v3, %v3742_v2 }
 0x291   : > { %v3934_v47 = vpop.f32.mrf.mxu1  ;;  %v4045_v7 = vpop.f32.mrf.mxu0 }
 0x292   : > { %v4120_v42 = vadd.f32 %v4045_v7, %v3938_v14  ;;  %v3940_v26 = vadd.f32 %v3934_v47, %v3743_v60 }
 0x293   : > { %v4114_v43 = vpop.f32.mrf.mxu1  ;;  %v4225_v36 = vpop.f32.mrf.mxu0 }
 0x294   : > { %v4301_v6 = vadd.f32 %v4225_v36, %v4119_v35  ;;  %v4121_v41 = vadd.f32 %v4114_v43, %v3939_v15 }
 0x295   : > { %v4116_v45 = vpop.f32.mrf.mxu1  ;;  %v4227_v48 = vpop.f32.mrf.mxu0 }
 0x296   : > { %v4302_v44 = vadd.f32 %v4227_v48, %v4120_v42  ;;  %v4122_v9 = vadd.f32 %v4116_v45, %v3940_v26  ;;  %v5583_v42 = vld [vmem:[%s7117_s6] sm:$0xff] }
 0x297   : > { %v4296_v24 = vpop.f32.mrf.mxu1 }
 0x298   : > { %v4407_v31 = vpop.f32.mrf.mxu0  ;;  %v4303_v19 = vadd.f32 %v4296_v24, %v4121_v41 }
 0x299   : > { %v4298_v50 = vpop.f32.mrf.mxu1  ;;  %v4483_v27 = vadd.f32 %v4407_v31, %v4301_v6 }
 0x29a   : > { %v4409_v58 = vpop.f32.mrf.mxu0  ;;  %v4304_v52 = vadd.f32 %v4298_v50, %v4122_v9 }
 0x29b   : > { %v4478_v23 = vpop.f32.mrf.mxu1  ;;  %v4484_v56 = vadd.f32 %v4409_v58, %v4302_v44 }
 0x29c   : > { %v4589_v22 = vpop.f32.mrf.mxu0  ;;  %v4485_v25 = vadd.f32 %v4478_v23, %v4303_v19 }
 0x29d   : > { %v4480_v61 = vpop.f32.mrf.mxu1  ;;  %v4665_v33 = vadd.f32 %v4589_v22, %v4483_v27 }
 0x29e   : > { %v4591_v20 = vpop.f32.mrf.mxu0  ;;  %v4486_v36 = vadd.f32 %v4480_v61, %v4304_v52 }
 0x29f   : > { %v4660_v46 = vpop.f32.mrf.mxu1  ;;  %v4666_v3 = vadd.f32 %v4591_v20, %v4484_v56 }
 0x2a0   : > { %v4771_v5 = vpop.f32.mrf.mxu0  ;;  %v4667_v32 = vadd.f32 %v4660_v46, %v4485_v25 }
 0x2a1   : > { %v4662_v39 = vpop.f32.mrf.mxu1  ;;  %v4847_v38 = vadd.f32 %v4771_v5, %v4665_v33 }
 0x2a2   : > { %v4773_v55 = vpop.f32.mrf.mxu0  ;;  %v4668_v1 = vadd.f32 %v4662_v39, %v4486_v36 }
 0x2a3   : > { %v4842_v54 = vpop.f32.mrf.mxu1  ;;  %v4848_v43 = vadd.f32 %v4773_v55, %v4666_v3 }
 0x2a4   : > { %v4953_v13 = vpop.f32.mrf.mxu0  ;;  %v4849_v12 = vadd.f32 %v4842_v54, %v4667_v32  ;;  %v5591_v54 = vld [vmem:[%s7118_s7] sm:$0xff] }
 0x2a5   : > { %v4844_v16 = vpop.f32.mrf.mxu1  ;;  %v5029_v8 = vadd.f32 %v4953_v13, %v4847_v38 }
 0x2a6   : > { %v4955_v34 = vpop.f32.mrf.mxu0  ;;  %v4850_v31 = vadd.f32 %v4844_v16, %v4668_v1 }
 0x2a7   : > { %v5024_v29 = vpop.f32.mrf.mxu1  ;;  %v5030_v24 = vadd.f32 %v4955_v34, %v4848_v43 }
 0x2a8   : > { %v5135_v0 = vpop.f32.mrf.mxu0  ;;  %v5031_v10 = vadd.f32 %v5024_v29, %v4849_v12 }
 0x2a9   : > { %v5026_v7 = vpop.f32.mrf.mxu1  ;;  %v5211_v17 = vadd.f32 %v5135_v0, %v5029_v8 }
 0x2aa   : > { %v5137_v47 = vpop.f32.mrf.mxu0  ;;  %v5032_v58 = vadd.f32 %v5026_v7, %v4850_v31 }
 0x2ab   : > { %v5206_v48 = vpop.f32.mrf.mxu1  ;;  %v5212_v50 = vadd.f32 %v5137_v47, %v5030_v24 }
 0x2ac   : > { %v5317_v45 = vpop.f32.mrf.mxu0  ;;  %v5213_v37 = vadd.f32 %v5206_v48, %v5031_v10 }
 0x2ad   : > { %v5208_v18 = vpop.f32.mrf.mxu1  ;;  %v5393_v40 = vadd.f32 %v5317_v45, %v5211_v17 }
 0x2ae   : > { %v5319_v49 = vpop.f32.mrf.mxu0  ;;  %v5214_v22 = vadd.f32 %v5208_v18, %v5032_v58 }
 0x2af   : > { %v5388_v63 = vpop.f32.mrf.mxu1  ;;  %v5394_v23 = vadd.f32 %v5319_v49, %v5212_v50 }
 0x2b0   : > { %v5499_v21 = vpop.f32.mrf.mxu0  ;;  %v5395_v30 = vadd.f32 %v5388_v63, %v5213_v37 }
 0x2b1   : > { %v5575_v11 = vadd.f32 %v5499_v21, %v5393_v40  ;;  %v5390_v62 = vpop.f32.mrf.mxu1 }
 0x2b2   : > { %v5501_v57 = vpop.f32.mrf.mxu0  ;;  %v5396_v59 = vadd.f32 %v5390_v62, %v5214_v22 }
 0x2b3   : > { %5579 = vst [vmem:[%s6045_s13] sm:$0xff] %v5575_v11  ;;  %v5576_v61 = vadd.f32 %v5501_v57, %v5394_v23  ;;  %v5570_v4 = vpop.f32.mrf.mxu1  ;;  %v5592_v53 = vmul.f32 %v5575_v11, %v5575_v11 }
 0x2b4   : > { %v5577_v20 = vadd.f32 %v5570_v4, %v5395_v30 }
 0x2b5   : > { %5580 = vst [vmem:[%s6045_s13 + $0x8] sm:$0xff] %v5576_v61  ;;  %v5584_v51 = vadd.f32 %v5576_v61, %v5575_v11  ;;  %v5593_v46 = vmul.f32 %v5576_v61, %v5576_v61  ;;  %v5572_v28 = vpop.f32.mrf.mxu1 }
 0x2b6   : > { %5581 = vst [vmem:[%s6045_s13 + $0x10] sm:$0xff] %v5577_v20  ;;  %v5594_v2 = vmul.f32 %v5577_v20, %v5577_v20  ;;  %v5578_v5 = vadd.f32 %v5572_v28, %v5396_v59 }
 0x2b7   : > { %v5585_v14 = vadd.f32 %v5584_v51, %v5577_v20  ;;  %v5596_v35 = vadd.f32 %v5593_v46, %v5592_v53 }
 0x2b8   : > { %5582 = vst [vmem:[%s6045_s13 + $0x18] sm:$0xff] %v5578_v5  ;;  %v5595_v39 = vmul.f32 %v5578_v5, %v5578_v5 }
 0x2b9   : > { %v5586_v60 = vadd.f32 %v5585_v14, %v5578_v5  ;;  %v5597_v15 = vadd.f32 %v5596_v35, %v5594_v2 }
 0x2bb   : > { %5587 = vadd.xlane.f32.xlu0 %v5586_v60  ;;  %v5598_v55 = vadd.f32 %v5597_v15, %v5595_v39 }
 0x2bd   : > { %5599 = vadd.xlane.f32.xlu1 %v5598_v55 }
 0x344   : > { %v5588_v6 = vpop.xlane.xlu0 %5587 }
 0x345   : > { %v5589_v26 = vadd.f32 %v5588_v6, %v5583_v42 }
 0x346   : > { %v5600_v41 = vpop.xlane.xlu1 %5599 }
 0x347   : > { %5590 = vst.msk [vmem:[%s7117_s6] sm:$0xff] %vm7157_vm6, %v5589_v26  ;;  %v5601_v13 = vadd.f32 %v5600_v41, %v5591_v54 }
 0x349   : > { %5602 = vst.msk [vmem:[%s7118_s7] sm:$0xff] %vm7158_vm0, %v5601_v13 }
 0x34a PF: > { %s18_s24 = sadd.s32 1, %s5961_s24  }
 0x34b   : > { %p15_p8 = scmp.ge.s32.totalorder %s18_s24, 4  }
 0x34d   :  { %17 = sbr.rel (!%p15_p8) target bundleno = 1 (0x1), region = 209 }
 0x352   :  { %5637 = vsyncmov [#allocation3] }
 0x355   :  { %s5638_s19 = vpop.sfrf %5637 }
 0x356   :  { %p5916_p9 = scmp.ne.s32.totalorder %s5638_s19, 0 }
 0x358   :  { %5642 = shalt.err (%p5916_p9)  }
 0x359   :  { %5644 = vsyncmov [#allocation3 + $0x1] }
 0x35c   :  { %s5645_s20 = vpop.sfrf %5644 }
 0x35d   :  { %p5917_p10 = scmp.ne.s32.totalorder %s5645_s20, 0 }
 0x35f   :  { %5649 = shalt.err (%p5917_p10)  }

</bundles_post_ra>
